<compile_context>
chip_gen: v7x
topology: tpu7x:2x2x1
jax: 0.10.0
libtpu: 0.0.40
codegen_flags: <defaults>
</compile_context>

<pallas_src>
import jax
import jax.numpy as jnp
from jax.experimental import pallas as pl
from jax.experimental.pallas import tpu as pltpu


def _relu(v):
    return jnp.maximum(v, 0.0)


def _pad128(d):
    return int(pl.cdiv(int(d), 128) * 128)


def _round8_down(d):
    return max(8, (int(d) // 8) * 8)


def _round8_up(d):
    return max(8, int(pl.cdiv(int(d), 8) * 8))


def _make_autoendecoder_kernel(n_layers, act, compute_dtype):
    """Fused kernel for the whole encoder/decoder chain.

    Ref ordering: x_tile, (W, b) per layer (encoder then decoder; W already
    transposed to (in, out) and padded lane-dense; b in f32), then the output tile.
    The activation is applied after every layer except the last one.
    """

    def kernel(*refs):
        h = refs[0][...].astype(compute_dtype)
        idx = 1
        for li in range(n_layers):
            w = refs[idx][...]          # (in_pad, out_pad), compute_dtype
            b = refs[idx + 1][...]      # (1, out_pad), f32
            idx += 2
            # MXU matmul with f32 accumulation; bias add + activation stay in f32 (VPU/EUP).
            y = jnp.dot(h, w, preferred_element_type=jnp.float32) + b
            if li < n_layers - 1:
                h = act(y).astype(compute_dtype)
            else:
                h = y
        out_ref = refs[idx]
        out_ref[...] = h.astype(out_ref.dtype)

    return kernel


def prepare_autoendecoder_params(en_params, de_params, compute_dtype=jnp.bfloat16):
    """One-time parameter prep (do NOT call per forward):
    - transpose torch-layout W (out, in) -> (in, out)
    - cast weights to compute_dtype (default bf16 -> full-rate MXU, half VMEM/DMA)
    - keep biases in f32 (exact bias add, negligible bytes)
    - zero-pad feature dims to multiples of 128 (lane-dense, unmasked stores)
    """
    params = list(en_params) + list(de_params)
    in_dim = int(params[0][0].shape[1])
    out_dim = int(params[-1][0].shape[0])
    flat = []
    for w, b in params:
        o, i = int(w.shape[0]), int(w.shape[1])
        ip, op = _pad128(i), _pad128(o)
        wt = jnp.zeros((ip, op), compute_dtype).at[:i, :o].set(
            jnp.asarray(w, compute_dtype).T)
        bb = jnp.zeros((1, op), jnp.float32).at[:, :o].set(
            jnp.asarray(b, jnp.float32).reshape(1, -1))
        flat.append(wt)
        flat.append(bb)
    return dict(
        flat_params=flat,
        n_layers=len(params),
        in_dim=in_dim,
        out_dim=out_dim,
        in_pad=_pad128(in_dim),
        out_pad=_pad128(out_dim),
        compute_dtype=compute_dtype,
    )


def autoendecoder_forward(x, prepared, act=_relu, *, batch_tile=512, out_dtype=None):
    """Fused Autoendecoder forward pass in a single pallas_call.

    x:        (B, in_dim)
    prepared: output of prepare_autoendecoder_params (params are VMEM-resident across
              the batch grid; x/out tiles are double-buffered against compute).
    """
    flat_params = prepared["flat_params"]
    n_layers = prepared["n_layers"]
    in_dim, out_dim = prepared["in_dim"], prepared["out_dim"]
    in_pad, out_pad = prepared["in_pad"], prepared["out_pad"]
    compute_dtype = prepared["compute_dtype"]

    B = int(x.shape[0])
    out_dtype = x.dtype if out_dtype is None else out_dtype

    # --- generation-aware VMEM cap (v7x: 64 MiB per TC; v5e/v6e: 128 MiB) ---
    try:
        vmem_cap = int(pltpu.get_tpu_info().vmem_capacity_bytes)
    except Exception:
        vmem_cap = 64 << 20  # conservative fallback works on every generation
    vmem_cap = max(vmem_cap - (12 << 20), 16 << 20)  # leave headroom

    # --- batch tile selection ---
    tb = _round8_down(batch_tile)
    tb = min(tb, _round8_up(B))                 # don't exceed the (rounded-up) batch
    if B >= 16:
        tb = min(tb, _round8_down(B // 2))      # keep >= 2 grid steps for v7x's 2 TCs

    param_bytes = sum(int(p.size) * p.dtype.itemsize for p in flat_params)
    max_pad = max([in_pad, out_pad] + [int(p.shape[-1]) for p in flat_params[::2]])

    def vmem_estimate(t):
        # single-buffered resident params + double-buffered x/out tiles + activation slack
        io = 2 * t * (in_pad * x.dtype.itemsize + out_pad * jnp.dtype(out_dtype).itemsize)
        acts = (n_layers + 2) * t * max_pad * 4
        return param_bytes + io + acts + (4 << 20)

    while tb > 8 and vmem_estimate(tb) > vmem_cap:
        tb = _round8_down(tb // 2)

    grid_b = int(pl.cdiv(B, tb))
    b_pad = grid_b * tb

    # --- pad x on batch and lane dims (padded weight rows are zero, so no effect) ---
    if b_pad != B or in_pad != in_dim:
        x_in = jnp.zeros((b_pad, in_pad), x.dtype).at[:B, :in_dim].set(x)
    else:
        x_in = x

    # --- BlockSpecs ---
    x_spec = pl.BlockSpec((tb, in_pad), lambda i: (i, 0))
    out_spec = pl.BlockSpec((tb, out_pad), lambda i: (i, 0))

    def param_specs(single_buffer):
        if single_buffer:
            # Block index never changes -> never re-DMA'd; one buffer is enough.
            return [pl.BlockSpec(p.shape, lambda i: (0, 0), pipeline_mode=pl.Buffered(1))
                    for p in flat_params]
        return [pl.BlockSpec(p.shape, lambda i: (0, 0)) for p in flat_params]

    kernel = _make_autoendecoder_kernel(n_layers, act, compute_dtype)
    compiler_params = pltpu.CompilerParams(
        dimension_semantics=("parallel",),      # shard batch tiles across TCs on v7x
        vmem_limit_bytes=int(min(max(vmem_estimate(tb), 32 << 20), vmem_cap)),
    )

    def build(single_buffer):
        return pl.pallas_call(
            kernel,
            out_shape=jax.ShapeDtypeStruct((b_pad, out_pad), out_dtype),
            grid=(grid_b,),
            in_specs=[x_spec] + param_specs(single_buffer),
            out_specs=out_spec,
            compiler_params=compiler_params,
        )

    try:
        out = build(True)(x_in, *flat_params)
    except Exception:
        # Fallback if this jax version rejects pipeline_mode=pl.Buffered(1).
        out = build(False)(x_in, *flat_params)

    if b_pad != B or out_pad != out_dim:
        out = out[:B, :out_dim]
    return out


def _init_linear(key, out_dim, in_dim):
    """Deterministic init mimicking torch.nn.Linear default (uniform +-1/sqrt(in))."""
    kw, kb = jax.random.split(key)
    bound = 1.0 / (in_dim ** 0.5)
    w = jax.random.uniform(kw, (out_dim, in_dim), jnp.float32, -bound, bound)
    b = jax.random.uniform(kb, (1, out_dim), jnp.float32, -bound, bound)
    return w, b


def _reference_forward(x, en_params, de_params, act, compute_dtype=jnp.float32):
    """Pure-JAX reference mirroring the PyTorch forward (torch weight layout).
    With compute_dtype=f32 it is the exact PyTorch math; with bf16 it mirrors the
    kernel's bf16-input / f32-accumulate path."""
    layers = list(en_params) + list(de_params)
    n = len(layers)
    h = x
    for li, (w, b) in enumerate(layers):
        y = jnp.dot(h.astype(compute_dtype), jnp.asarray(w, compute_dtype).T,
                    preferred_element_type=jnp.float32) + jnp.asarray(b, jnp.float32).reshape(1, -1)
        h = act(y) if li < n - 1 else y
    return h


if __name__ == "__main__":
    # Lane-dense small config: 128-wide features (full vreg lanes, unmasked stores).
    # batch=512 with the default batch_tile=512 clamps to tb=256 -> grid of 2 so both
    # v7x TensorCores get a tile (no-op on v5e/v6e).
    batch = 512
    in_dim = 128
    hidden_dim = 128
    depth = 2
    act = _relu  # act_fn = ReLU

    key = jax.random.PRNGKey(0)
    keys = jax.random.split(key, 1 + 2 * depth)

    # Parameters with the same shapes as the PyTorch module's __init__ (torch layout).
    en_params = [_init_linear(keys[1], hidden_dim, in_dim)]
    de_params = [_init_linear(keys[2], in_dim, hidden_dim)]
    for i in range(depth - 1):
        en_params.append(_init_linear(keys[3 + 2 * i], hidden_dim, hidden_dim))
        de_params.append(_init_linear(keys[4 + 2 * i], hidden_dim, hidden_dim))

    x = jax.random.normal(keys[0], (batch, in_dim), jnp.float32)

    # --- f32 compute path: exact match to the PyTorch-equivalent reference ---
    ref_f32 = _reference_forward(x, en_params, de_params, act, jnp.float32)
    prep_f32 = prepare_autoendecoder_params(en_params, de_params, compute_dtype=jnp.float32)
    out_f32 = jax.block_until_ready(autoendecoder_forward(x, prep_f32, act, batch_tile=512))
    assert out_f32.shape == (batch, in_dim)
    assert jnp.allclose(out_f32, ref_f32, atol=1e-4, rtol=1e-4), float(
        jnp.max(jnp.abs(out_f32 - ref_f32)))

    # --- bf16 matmul-input path (default; full-rate MXU on v5e/v6e/v7x) ---
    ref_bf16 = _reference_forward(x, en_params, de_params, act, jnp.bfloat16)
    prep_bf16 = prepare_autoendecoder_params(en_params, de_params, compute_dtype=jnp.bfloat16)
    out_bf16 = jax.block_until_ready(autoendecoder_forward(x, prep_bf16, act, batch_tile=512))
    assert out_bf16.shape == (batch, in_dim)
    assert jnp.allclose(out_bf16, ref_bf16, atol=1e-2, rtol=1e-2), float(
        jnp.max(jnp.abs(out_bf16 - ref_bf16)))

    print("KERNEL_OK")
</pallas_src>

<mosaic_0001>
module attributes {stable_mosaic.version = 11 : i64} {
  func.func @kernel(%arg0: i32, %arg1: memref<256x128xf32, #tpu.memory_space<vmem>>, %arg2: memref<128x128xf32, #tpu.memory_space<vmem>>, %arg3: memref<1x128xf32, #tpu.memory_space<vmem>>, %arg4: memref<128x128xf32, #tpu.memory_space<vmem>>, %arg5: memref<1x128xf32, #tpu.memory_space<vmem>>, %arg6: memref<128x128xf32, #tpu.memory_space<vmem>>, %arg7: memref<1x128xf32, #tpu.memory_space<vmem>>, %arg8: memref<128x128xf32, #tpu.memory_space<vmem>>, %arg9: memref<1x128xf32, #tpu.memory_space<vmem>>, %arg10: memref<256x128xf32, #tpu.memory_space<vmem>>) attributes {dimension_semantics = [#tpu.dimension_semantics<parallel>], iteration_bounds = array<i64: 2>, scalar_prefetch = 0 : i64, scratch_operands = 0 : i64, tpu.core_type = #tpu.core_type<tc>, window_params = [{transform_indices = @transform_0, window_bounds = array<i64: 256, 128>}, {pipeline_mode = #tpu.pipeline_mode<synchronous>, transform_indices = @transform_1, window_bounds = array<i64: 128, 128>}, {pipeline_mode = #tpu.pipeline_mode<synchronous>, transform_indices = @transform_2, window_bounds = array<i64: 1, 128>}, {pipeline_mode = #tpu.pipeline_mode<synchronous>, transform_indices = @transform_3, window_bounds = array<i64: 128, 128>}, {pipeline_mode = #tpu.pipeline_mode<synchronous>, transform_indices = @transform_4, window_bounds = array<i64: 1, 128>}, {pipeline_mode = #tpu.pipeline_mode<synchronous>, transform_indices = @transform_5, window_bounds = array<i64: 128, 128>}, {pipeline_mode = #tpu.pipeline_mode<synchronous>, transform_indices = @transform_6, window_bounds = array<i64: 1, 128>}, {pipeline_mode = #tpu.pipeline_mode<synchronous>, transform_indices = @transform_7, window_bounds = array<i64: 128, 128>}, {pipeline_mode = #tpu.pipeline_mode<synchronous>, transform_indices = @transform_8, window_bounds = array<i64: 1, 128>}, {transform_indices = @transform_9, window_bounds = array<i64: 256, 128>}]} {
    %c0 = arith.constant 0 : index
    %c0_0 = arith.constant 0 : index
    %0 = vector.load %arg1[%c0, %c0_0] : memref<256x128xf32, #tpu.memory_space<vmem>>, vector<256x128xf32>
    %c0_1 = arith.constant 0 : index
    %c0_2 = arith.constant 0 : index
    %1 = vector.load %arg2[%c0_1, %c0_2] : memref<128x128xf32, #tpu.memory_space<vmem>>, vector<128x128xf32>
    %c0_3 = arith.constant 0 : index
    %c0_4 = arith.constant 0 : index
    %2 = vector.load %arg3[%c0_3, %c0_4] : memref<1x128xf32, #tpu.memory_space<vmem>>, vector<1x128xf32>
    %cst = arith.constant dense<0.000000e+00> : vector<256x128xf32>
    %3 = tpu.matmul %0, %1, %cst {dimension_numbers = #tpu.dot_dimension_numbers<[1], [0], [0], [1], [0, 0, 1, 1], [], []>} : vector<256x128xf32>, vector<128x128xf32>, vector<256x128xf32> -> vector<256x128xf32>
    %4 = vector.broadcast %2 : vector<1x128xf32> to vector<256x128xf32>
    %5 = arith.addf %3, %4 : vector<256x128xf32>
    %cst_5 = arith.constant 0.000000e+00 : f32
    %6 = vector.broadcast %cst_5 : f32 to vector<256x128xf32>
    %7 = arith.maximumf %5, %6 : vector<256x128xf32>
    %c0_6 = arith.constant 0 : index
    %c0_7 = arith.constant 0 : index
    %8 = vector.load %arg4[%c0_6, %c0_7] : memref<128x128xf32, #tpu.memory_space<vmem>>, vector<128x128xf32>
    %c0_8 = arith.constant 0 : index
    %c0_9 = arith.constant 0 : index
    %9 = vector.load %arg5[%c0_8, %c0_9] : memref<1x128xf32, #tpu.memory_space<vmem>>, vector<1x128xf32>
    %cst_10 = arith.constant dense<0.000000e+00> : vector<256x128xf32>
    %10 = tpu.matmul %7, %8, %cst_10 {dimension_numbers = #tpu.dot_dimension_numbers<[1], [0], [0], [1], [0, 0, 1, 1], [], []>} : vector<256x128xf32>, vector<128x128xf32>, vector<256x128xf32> -> vector<256x128xf32>
    %11 = vector.broadcast %9 : vector<1x128xf32> to vector<256x128xf32>
    %12 = arith.addf %10, %11 : vector<256x128xf32>
    %cst_11 = arith.constant 0.000000e+00 : f32
    %13 = vector.broadcast %cst_11 : f32 to vector<256x128xf32>
    %14 = arith.maximumf %12, %13 : vector<256x128xf32>
    %c0_12 = arith.constant 0 : index
    %c0_13 = arith.constant 0 : index
    %15 = vector.load %arg6[%c0_12, %c0_13] : memref<128x128xf32, #tpu.memory_space<vmem>>, vector<128x128xf32>
    %c0_14 = arith.constant 0 : index
    %c0_15 = arith.constant 0 : index
    %16 = vector.load %arg7[%c0_14, %c0_15] : memref<1x128xf32, #tpu.memory_space<vmem>>, vector<1x128xf32>
    %cst_16 = arith.constant dense<0.000000e+00> : vector<256x128xf32>
    %17 = tpu.matmul %14, %15, %cst_16 {dimension_numbers = #tpu.dot_dimension_numbers<[1], [0], [0], [1], [0, 0, 1, 1], [], []>} : vector<256x128xf32>, vector<128x128xf32>, vector<256x128xf32> -> vector<256x128xf32>
    %18 = vector.broadcast %16 : vector<1x128xf32> to vector<256x128xf32>
    %19 = arith.addf %17, %18 : vector<256x128xf32>
    %cst_17 = arith.constant 0.000000e+00 : f32
    %20 = vector.broadcast %cst_17 : f32 to vector<256x128xf32>
    %21 = arith.maximumf %19, %20 : vector<256x128xf32>
    %c0_18 = arith.constant 0 : index
    %c0_19 = arith.constant 0 : index
    %22 = vector.load %arg8[%c0_18, %c0_19] : memref<128x128xf32, #tpu.memory_space<vmem>>, vector<128x128xf32>
    %c0_20 = arith.constant 0 : index
    %c0_21 = arith.constant 0 : index
    %23 = vector.load %arg9[%c0_20, %c0_21] : memref<1x128xf32, #tpu.memory_space<vmem>>, vector<1x128xf32>
    %cst_22 = arith.constant dense<0.000000e+00> : vector<256x128xf32>
    %24 = tpu.matmul %21, %22, %cst_22 {dimension_numbers = #tpu.dot_dimension_numbers<[1], [0], [0], [1], [0, 0, 1, 1], [], []>} : vector<256x128xf32>, vector<128x128xf32>, vector<256x128xf32> -> vector<256x128xf32>
    %25 = vector.broadcast %23 : vector<1x128xf32> to vector<256x128xf32>
    %26 = arith.addf %24, %25 : vector<256x128xf32>
    %c0_23 = arith.constant 0 : index
    %c0_24 = arith.constant 0 : index
    %27 = vector.load %arg10[%c0_23, %c0_24] : memref<256x128xf32, #tpu.memory_space<vmem>>, vector<256x128xf32>
    tpu.vector_store %arg10[%c0_23, %c0_24], %26 {strides = array<i32>} : memref<256x128xf32, #tpu.memory_space<vmem>>, vector<256x128xf32>,
    return
  }
  func.func @transform_0(%arg0: i32) -> (i32, i32) {
    %c0_i32 = arith.constant 0 : i32
    %c0_i32_0 = arith.constant 0 : i32
    return %arg0, %c0_i32 : i32, i32
  }
  func.func @transform_1(%arg0: i32) -> (i32, i32) {
    %c0_i32 = arith.constant 0 : i32
    %c0_i32_0 = arith.constant 0 : i32
    %c0_i32_1 = arith.constant 0 : i32
    return %c0_i32, %c0_i32_0 : i32, i32
  }
  func.func @transform_2(%arg0: i32) -> (i32, i32) {
    %c0_i32 = arith.constant 0 : i32
    %c0_i32_0 = arith.constant 0 : i32
    %c0_i32_1 = arith.constant 0 : i32
    return %c0_i32, %c0_i32_0 : i32, i32
  }
  func.func @transform_3(%arg0: i32) -> (i32, i32) {
    %c0_i32 = arith.constant 0 : i32
    %c0_i32_0 = arith.constant 0 : i32
    %c0_i32_1 = arith.constant 0 : i32
    return %c0_i32, %c0_i32_0 : i32, i32
  }
  func.func @transform_4(%arg0: i32) -> (i32, i32) {
    %c0_i32 = arith.constant 0 : i32
    %c0_i32_0 = arith.constant 0 : i32
    %c0_i32_1 = arith.constant 0 : i32
    return %c0_i32, %c0_i32_0 : i32, i32
  }
  func.func @transform_5(%arg0: i32) -> (i32, i32) {
    %c0_i32 = arith.constant 0 : i32
    %c0_i32_0 = arith.constant 0 : i32
    %c0_i32_1 = arith.constant 0 : i32
    return %c0_i32, %c0_i32_0 : i32, i32
  }
  func.func @transform_6(%arg0: i32) -> (i32, i32) {
    %c0_i32 = arith.constant 0 : i32
    %c0_i32_0 = arith.constant 0 : i32
    %c0_i32_1 = arith.constant 0 : i32
    return %c0_i32, %c0_i32_0 : i32, i32
  }
  func.func @transform_7(%arg0: i32) -> (i32, i32) {
    %c0_i32 = arith.constant 0 : i32
    %c0_i32_0 = arith.constant 0 : i32
    %c0_i32_1 = arith.constant 0 : i32
    return %c0_i32, %c0_i32_0 : i32, i32
  }
  func.func @transform_8(%arg0: i32) -> (i32, i32) {
    %c0_i32 = arith.constant 0 : i32
    %c0_i32_0 = arith.constant 0 : i32
    %c0_i32_1 = arith.constant 0 : i32
    return %c0_i32, %c0_i32_0 : i32, i32
  }
  func.func @transform_9(%arg0: i32) -> (i32, i32) {
    %c0_i32 = arith.constant 0 : i32
    %c0_i32_0 = arith.constant 0 : i32
    return %arg0, %c0_i32 : i32, i32
  }
}

module attributes {stable_mosaic.version = 11 : i64} {
  func.func @kernel(%arg0: i32, %arg1: memref<256x128xf32, #tpu.memory_space<vmem>>, %arg2: memref<128x128xf32, #tpu.memory_space<vmem>>, %arg3: memref<1x128xf32, #tpu.memory_space<vmem>>, %arg4: memref<128x128xf32, #tpu.memory_space<vmem>>, %arg5: memref<1x128xf32, #tpu.memory_space<vmem>>, %arg6: memref<128x128xf32, #tpu.memory_space<vmem>>, %arg7: memref<1x128xf32, #tpu.memory_space<vmem>>, %arg8: memref<128x128xf32, #tpu.memory_space<vmem>>, %arg9: memref<1x128xf32, #tpu.memory_space<vmem>>, %arg10: memref<256x128xf32, #tpu.memory_space<vmem>>) attributes {dimension_semantics = [#tpu.dimension_semantics<parallel>], iteration_bounds = array<i64: 2>, scalar_prefetch = 0 : i64, scratch_operands = 0 : i64, tpu.core_type = #tpu.core_type<tc>, window_params = [{transform_indices = @transform_0, window_bounds = array<i64: 256, 128>}, {pipeline_mode = #tpu.pipeline_mode<synchronous>, transform_indices = @transform_1, window_bounds = array<i64: 128, 128>}, {pipeline_mode = #tpu.pipeline_mode<synchronous>, transform_indices = @transform_2, window_bounds = array<i64: 1, 128>}, {pipeline_mode = #tpu.pipeline_mode<synchronous>, transform_indices = @transform_3, window_bounds = array<i64: 128, 128>}, {pipeline_mode = #tpu.pipeline_mode<synchronous>, transform_indices = @transform_4, window_bounds = array<i64: 1, 128>}, {pipeline_mode = #tpu.pipeline_mode<synchronous>, transform_indices = @transform_5, window_bounds = array<i64: 128, 128>}, {pipeline_mode = #tpu.pipeline_mode<synchronous>, transform_indices = @transform_6, window_bounds = array<i64: 1, 128>}, {pipeline_mode = #tpu.pipeline_mode<synchronous>, transform_indices = @transform_7, window_bounds = array<i64: 128, 128>}, {pipeline_mode = #tpu.pipeline_mode<synchronous>, transform_indices = @transform_8, window_bounds = array<i64: 1, 128>}, {transform_indices = @transform_9, window_bounds = array<i64: 256, 128>}]} {
    %c0 = arith.constant 0 : index
    %c0_0 = arith.constant 0 : index
    %0 = vector.load %arg1[%c0, %c0_0] : memref<256x128xf32, #tpu.memory_space<vmem>>, vector<256x128xf32>
    %c0_1 = arith.constant 0 : index
    %c0_2 = arith.constant 0 : index
    %1 = vector.load %arg2[%c0_1, %c0_2] : memref<128x128xf32, #tpu.memory_space<vmem>>, vector<128x128xf32>
    %c0_3 = arith.constant 0 : index
    %c0_4 = arith.constant 0 : index
    %2 = vector.load %arg3[%c0_3, %c0_4] : memref<1x128xf32, #tpu.memory_space<vmem>>, vector<1x128xf32>
    %cst = arith.constant dense<0.000000e+00> : vector<256x128xf32>
    %3 = tpu.matmul %0, %1, %cst {dimension_numbers = #tpu.dot_dimension_numbers<[1], [0], [0], [1], [0, 0, 1, 1], [], []>} : vector<256x128xf32>, vector<128x128xf32>, vector<256x128xf32> -> vector<256x128xf32>
    %4 = vector.broadcast %2 : vector<1x128xf32> to vector<256x128xf32>
    %5 = arith.addf %3, %4 : vector<256x128xf32>
    %cst_5 = arith.constant 0.000000e+00 : f32
    %6 = vector.broadcast %cst_5 : f32 to vector<256x128xf32>
    %7 = arith.maximumf %5, %6 : vector<256x128xf32>
    %c0_6 = arith.constant 0 : index
    %c0_7 = arith.constant 0 : index
    %8 = vector.load %arg4[%c0_6, %c0_7] : memref<128x128xf32, #tpu.memory_space<vmem>>, vector<128x128xf32>
    %c0_8 = arith.constant 0 : index
    %c0_9 = arith.constant 0 : index
    %9 = vector.load %arg5[%c0_8, %c0_9] : memref<1x128xf32, #tpu.memory_space<vmem>>, vector<1x128xf32>
    %cst_10 = arith.constant dense<0.000000e+00> : vector<256x128xf32>
    %10 = tpu.matmul %7, %8, %cst_10 {dimension_numbers = #tpu.dot_dimension_numbers<[1], [0], [0], [1], [0, 0, 1, 1], [], []>} : vector<256x128xf32>, vector<128x128xf32>, vector<256x128xf32> -> vector<256x128xf32>
    %11 = vector.broadcast %9 : vector<1x128xf32> to vector<256x128xf32>
    %12 = arith.addf %10, %11 : vector<256x128xf32>
    %cst_11 = arith.constant 0.000000e+00 : f32
    %13 = vector.broadcast %cst_11 : f32 to vector<256x128xf32>
    %14 = arith.maximumf %12, %13 : vector<256x128xf32>
    %c0_12 = arith.constant 0 : index
    %c0_13 = arith.constant 0 : index
    %15 = vector.load %arg6[%c0_12, %c0_13] : memref<128x128xf32, #tpu.memory_space<vmem>>, vector<128x128xf32>
    %c0_14 = arith.constant 0 : index
    %c0_15 = arith.constant 0 : index
    %16 = vector.load %arg7[%c0_14, %c0_15] : memref<1x128xf32, #tpu.memory_space<vmem>>, vector<1x128xf32>
    %cst_16 = arith.constant dense<0.000000e+00> : vector<256x128xf32>
    %17 = tpu.matmul %14, %15, %cst_16 {dimension_numbers = #tpu.dot_dimension_numbers<[1], [0], [0], [1], [0, 0, 1, 1], [], []>} : vector<256x128xf32>, vector<128x128xf32>, vector<256x128xf32> -> vector<256x128xf32>
    %18 = vector.broadcast %16 : vector<1x128xf32> to vector<256x128xf32>
    %19 = arith.addf %17, %18 : vector<256x128xf32>
    %cst_17 = arith.constant 0.000000e+00 : f32
    %20 = vector.broadcast %cst_17 : f32 to vector<256x128xf32>
    %21 = arith.maximumf %19, %20 : vector<256x128xf32>
    %c0_18 = arith.constant 0 : index
    %c0_19 = arith.constant 0 : index
    %22 = vector.load %arg8[%c0_18, %c0_19] : memref<128x128xf32, #tpu.memory_space<vmem>>, vector<128x128xf32>
    %c0_20 = arith.constant 0 : index
    %c0_21 = arith.constant 0 : index
    %23 = vector.load %arg9[%c0_20, %c0_21] : memref<1x128xf32, #tpu.memory_space<vmem>>, vector<1x128xf32>
    %cst_22 = arith.constant dense<0.000000e+00> : vector<256x128xf32>
    %24 = tpu.matmul %21, %22, %cst_22 {dimension_numbers = #tpu.dot_dimension_numbers<[1], [0], [0], [1], [0, 0, 1, 1], [], []>} : vector<256x128xf32>, vector<128x128xf32>, vector<256x128xf32> -> vector<256x128xf32>
    %25 = vector.broadcast %23 : vector<1x128xf32> to vector<256x128xf32>
    %26 = arith.addf %24, %25 : vector<256x128xf32>
    %c0_23 = arith.constant 0 : index
    %c0_24 = arith.constant 0 : index
    %27 = vector.load %arg10[%c0_23, %c0_24] : memref<256x128xf32, #tpu.memory_space<vmem>>, vector<256x128xf32>
    tpu.vector_store %arg10[%c0_23, %c0_24], %26 {strides = array<i32>} : memref<256x128xf32, #tpu.memory_space<vmem>>, vector<256x128xf32>,
    return
  }
  func.func @transform_0(%arg0: i32) -> (i32, i32) {
    %c0_i32 = arith.constant 0 : i32
    %c0_i32_0 = arith.constant 0 : i32
    return %arg0, %c0_i32 : i32, i32
  }
  func.func @transform_1(%arg0: i32) -> (i32, i32) {
    %c0_i32 = arith.constant 0 : i32
    %c0_i32_0 = arith.constant 0 : i32
    %c0_i32_1 = arith.constant 0 : i32
    return %c0_i32, %c0_i32_0 : i32, i32
  }
  func.func @transform_2(%arg0: i32) -> (i32, i32) {
    %c0_i32 = arith.constant 0 : i32
    %c0_i32_0 = arith.constant 0 : i32
    %c0_i32_1 = arith.constant 0 : i32
    return %c0_i32, %c0_i32_0 : i32, i32
  }
  func.func @transform_3(%arg0: i32) -> (i32, i32) {
    %c0_i32 = arith.constant 0 : i32
    %c0_i32_0 = arith.constant 0 : i32
    %c0_i32_1 = arith.constant 0 : i32
    return %c0_i32, %c0_i32_0 : i32, i32
  }
  func.func @transform_4(%arg0: i32) -> (i32, i32) {
    %c0_i32 = arith.constant 0 : i32
    %c0_i32_0 = arith.constant 0 : i32
    %c0_i32_1 = arith.constant 0 : i32
    return %c0_i32, %c0_i32_0 : i32, i32
  }
  func.func @transform_5(%arg0: i32) -> (i32, i32) {
    %c0_i32 = arith.constant 0 : i32
    %c0_i32_0 = arith.constant 0 : i32
    %c0_i32_1 = arith.constant 0 : i32
    return %c0_i32, %c0_i32_0 : i32, i32
  }
  func.func @transform_6(%arg0: i32) -> (i32, i32) {
    %c0_i32 = arith.constant 0 : i32
    %c0_i32_0 = arith.constant 0 : i32
    %c0_i32_1 = arith.constant 0 : i32
    return %c0_i32, %c0_i32_0 : i32, i32
  }
  func.func @transform_7(%arg0: i32) -> (i32, i32) {
    %c0_i32 = arith.constant 0 : i32
    %c0_i32_0 = arith.constant 0 : i32
    %c0_i32_1 = arith.constant 0 : i32
    return %c0_i32, %c0_i32_0 : i32, i32
  }
  func.func @transform_8(%arg0: i32) -> (i32, i32) {
    %c0_i32 = arith.constant 0 : i32
    %c0_i32_0 = arith.constant 0 : i32
    %c0_i32_1 = arith.constant 0 : i32
    return %c0_i32, %c0_i32_0 : i32, i32
  }
  func.func @transform_9(%arg0: i32) -> (i32, i32) {
    %c0_i32 = arith.constant 0 : i32
    %c0_i32_0 = arith.constant 0 : i32
    return %arg0, %c0_i32 : i32, i32
  }
}

</mosaic_0001>

<bundles_post_ra>
// kernel: tpu_custom_call.1
= control target key start
LH: loop header
LB: loop body
LE: loop exit
PB: predicated region body
PF: predicated region fallthrough
CT: control target
= control target key end

     0   :  { %s3238_s0 = inlined_call_operand.hbm [shape: f32[512,128], index: 0, kind: input, shape index: {}]   ;;  %s3239_s1 = inlined_call_operand.hbm [shape: f32[128,128], index: 1, kind: input, shape index: {}]   ;;  %s3240_s2 = inlined_call_operand.vmem [shape: f32[1,128], index: 2, kind: input, shape index: {}]   ;;  %s3241_s3 = inlined_call_operand.hbm [shape: f32[128,128], index: 3, kind: input, shape index: {}]   ;;  %s3242_s4 = inlined_call_operand.vmem [shape: f32[1,128], index: 4, kind: input, shape index: {}]   ;;  %s3243_s5 = inlined_call_operand.hbm [shape: f32[128,128], index: 5, kind: input, shape index: {}]   ;;  %s3244_s6 = inlined_call_operand.vmem [shape: f32[1,128], index: 6, kind: input, shape index: {}]   ;;  %s3245_s7 = inlined_call_operand.hbm [shape: f32[128,128], index: 7, kind: input, shape index: {}]   ;;  %s3246_s8 = inlined_call_operand.vmem [shape: f32[1,128], index: 8, kind: input, shape index: {}]   ;;  %s3247_s9 = inlined_call_operand.hbm [shape: f32[512,128], index: 9, kind: output, shape index: {}]  }
   0x1   :  { %3254 = sst [smem:[#allocation18_spill]] %s3247_s9 }
   0x2   :  { %14 = vsyncpa [#allocation3], 0 }
   0x3   :  { %16 = vsyncpa [#allocation3 + $0x1], 0 }
   0x4   :  { %17 = vsyncpa [#allocation6], 0 }
   0x5   :  { %18 = vsyncpa [#allocation9], 0 }
   0x6   :  { %19 = vsyncpa [#allocation4], 0 }
   0x7   :  { %21 = vsyncpa [#allocation4 + $0x1], 0  ;;  %s2725_s30 = smov 0   ;;  %s2727_s10 = smov 0  }
   0x8   :  { %s2729_s11 = smov 0   ;;  %s2731_s12 = smov 0  }
   0x9 LB: > { %3255 = sst [smem:[#allocation16_spill]] %s2651_s30  ;;  %s2746_s13 = sadd.s32 4294967295, %s2663_s12   ;;  %s2663_s12 = sphi %s2731_s12, %s3279_s12   ;;  %s2659_s11 = sphi %s2729_s11, %s3278_s11   ;;  %s2655_s10 = sphi %s2727_s10, %s3277_s10   ;;  %s2651_s30 = sphi %s2725_s30, %s3276_s30  }
   0xa   : > { %s1688_s14 = sadd.s32 4294967294, %s2663_s12   ;;  %p47_p0 = scmp.ne.s32.totalorder %s2655_s10, %s2651_s30 }
   0xb   : > { %p3248_p1 = scmp.eq.s32.totalorder %s2746_s13, 0  ;;  %p245_p3 = scmp.eq.s32.totalorder %s1688_s14, 1 }
   0xc   : > { %p1689_p5 = scmp.ge.s32.totalorder %s2663_s12, 1  ;;  %p252_p7 = scmp.lt.s32.totalorder %s2663_s12, 3 }
   0xd   : > { %p2755_p4 = por %p3248_p1, %p47_p0  ;;  %p2760_p6 = por %p245_p3, %p47_p0 }
   0xe   : > { %p2765_p8 = pnand %p1689_p5, %p252_p7  ;;  %s2665_s18 = smov [#allocation5]  }
   0xf   : > { %s3256_s15 = scalar_select %p2755_p4, 1, 0 }
  0x10   : > { %s3257_s16 = scalar_select %p2760_p6, 1, 0 }
  0x11   : > { %s3259_s17 = scalar_select %p2765_p8, 1, 0 }
  0x12   : > { %3258 = sst [smem:[#allocation17_spill]] %s3257_s16  ;;  %s264_s19 = sshll.u32 %s2665_s18, 4  ;;  %s2769_s19 = int_to_ptr.vmem [resolvable:$true] %s264_s19 }
  0x13   : > { %p2376_p9 = pneg %p2765_p8  ;;  %s2666_s21 = smov [#allocation8]  }
  0x14   : > { %s296_s22 = sshll.u32 %s2666_s21, 4  ;;  %s2667_s23 = smov [#allocation7]   ;;  %s2780_s22 = int_to_ptr.vmem [resolvable:$true] %s296_s22 }
  0x15   : > { %p2776_p11 = pnand %p2376_p9, %p3248_p1  ;;  %s2782_s24 = sshll.u32 %s2667_s23, 4  ;;  %s281_s24 = int_to_ptr.vmem [resolvable:$true] %s2782_s24 }
  0x16   : > { %s2447_s27 = scalar_lea.hbm %s3239_s1, 2048 }
  0x17   : > { %p2448_p12 = scmp.ne.s32.totalorder %s3239_s1, %s2447_s27  ;;  %p2792_p13 = pneg %p2776_p11 }
  0x18   : > { %p2454_p5 = scmp.lt.u32.totalorder %s2447_s27, %s3239_s1 }
  0x19   : > { %p2450_p0 = pnand %p2792_p13, %p2448_p12 }
  0x1b   : > { %p2451_p3 = pneg %p2450_p0 }
  0x1d   : > { %p2456_p7 = pnand %p2454_p5, %p2451_p3 }
  0x1f   : > { %2459 = shalt.err (!%p2456_p7)
}
  0x20   : > { %s2460_s23 = scalar_lea.vmem %s2769_s19, 2048  ;;  %p2468_p2 = scmp.lt.s32.totalorder %s2769_s19, %s2769_s19 }
  0x21   : > { %p2461_p9 = scmp.ne.s32.totalorder %s2769_s19, %s2460_s23  ;;  %p2469_p6 = scmp.lt.s32.totalorder %s2460_s23, %s2460_s23 }
  0x23   : > { %p2463_p10 = pnand %p2461_p9, %p2792_p13  ;;  %p2470_p12 = por %p2469_p6, %p2468_p2 }
  0x25   : > { %p2464_p1 = pneg %p2463_p10 }
  0x27   : > { %p2471_p0 = pnand %p2470_p12, %p2464_p1 }
  0x29   : > { %2474 = shalt.err (!%p2471_p0)
}
  0x2a   : > { %s2668_s25 = smov 128   ;;  %s2669_s26 = smov 8  }
  0x2b   : > { %2379 = dma.hbm_to_vmem [thread:$0]  (!%p2776_p11), %s3239_s1, 2048, %s2769_s19, [#allocation6], %s2668_s25, %s2668_s25, %s2669_s26  }
  0x2c   : > { %s2475_s21 = scalar_lea.hbm %s3243_s5, 2048 }
  0x2d   : > { %p2476_p1 = scmp.ne.s32.totalorder %s3243_s5, %s2475_s21  ;;  %p2482_p10 = scmp.lt.u32.totalorder %s2475_s21, %s3243_s5 }
  0x2f   : > { %p2478_p2 = pnand %p2476_p1, %p2792_p13 }
  0x31   : > { %p2479_p6 = pneg %p2478_p2 }
  0x33   : > { %p2484_p3 = pnand %p2482_p10, %p2479_p6 }
  0x35   : > { %2487 = shalt.err (!%p2484_p3)
}
  0x36   : > { %s2488_s19 = scalar_lea.vmem %s2780_s22, 2048  ;;  %p2496_p12 = scmp.lt.s32.totalorder %s2780_s22, %s2780_s22 }
  0x37   : > { %p2489_p5 = scmp.ne.s32.totalorder %s2780_s22, %s2488_s19  ;;  %p2497_p0 = scmp.lt.s32.totalorder %s2488_s19, %s2488_s19 }
  0x39   : > { %p2491_p7 = pnand %p2489_p5, %p2792_p13  ;;  %p2498_p1 = por %p2497_p0, %p2496_p12 }
  0x3b   : > { %p2492_p9 = pneg %p2491_p7 }
  0x3d   : > { %p2499_p2 = pnand %p2498_p1, %p2492_p9 }
  0x3f   : > { %2502 = shalt.err (!%p2499_p2)
}
  0x40   : > { %2385 = dma.hbm_to_vmem [thread:$0]  (!%p2776_p11), %s3243_s5, 2048, %s2780_s22, [#allocation9], %s2668_s25, %s2668_s25, %s2669_s26  }
  0x41   : > { %s2503_s28 = scalar_lea.hbm %s3241_s3, 2048 }
  0x42   : > { %p2504_p6 = scmp.ne.s32.totalorder %s3241_s3, %s2503_s28  ;;  %p2510_p5 = scmp.lt.u32.totalorder %s2503_s28, %s3241_s3 }
  0x44   : > { %p2506_p10 = pnand %p2504_p6, %p2792_p13 }
  0x46   : > { %p2507_p3 = pneg %p2506_p10 }
  0x48   : > { %p2512_p7 = pnand %p2510_p5, %p2507_p3 }
  0x4a   : > { %2515 = shalt.err (!%p2512_p7)
}
  0x4b   : > { %s2516_s19 = scalar_lea.vmem %s281_s24, 2048  ;;  %p2524_p1 = scmp.lt.s32.totalorder %s281_s24, %s281_s24 }
  0x4c   : > { %p2517_p9 = scmp.ne.s32.totalorder %s281_s24, %s2516_s19  ;;  %p2525_p2 = scmp.lt.s32.totalorder %s2516_s19, %s2516_s19 }
  0x4e   : > { %p2519_p12 = pnand %p2517_p9, %p2792_p13  ;;  %p2526_p4 = por %p2525_p2, %p2524_p1 }
  0x50   : > { %p2520_p0 = pneg %p2519_p12 }
  0x52   : > { %p2527_p8 = pnand %p2526_p4, %p2520_p0 }
  0x54   : > { %2530 = shalt.err (!%p2527_p8)
}
  0x55   : > { %2382 = dma.hbm_to_vmem [thread:$0]  (!%p2776_p11), %s3241_s3, 2048, %s281_s24, [#allocation6], %s2668_s25, %s2668_s25, %s2669_s26  }
  0x56   : > { %s2670_s30 = smov [#allocation10]   ;;  %s2531_s29 = scalar_lea.hbm %s3245_s7, 2048 }
  0x57   : > { %s312_s16 = sshll.u32 %s2670_s30, 4  ;;  %p2532_p4 = scmp.ne.s32.totalorder %s3245_s7, %s2531_s29  ;;  %s313_s16 = int_to_ptr.vmem [resolvable:$true] %s312_s16 }
  0x58   : > { %p2538_p10 = scmp.lt.u32.totalorder %s2531_s29, %s3245_s7 }
  0x59   : > { %p2534_p8 = pnand %p2532_p4, %p2792_p13 }
  0x5b   : > { %p2535_p6 = pneg %p2534_p8 }
  0x5d   : > { %p2540_p3 = pnand %p2538_p10, %p2535_p6 }
  0x5f   : > { %2543 = shalt.err (!%p2540_p3)
}
  0x60   : > { %s2544_s24 = scalar_lea.vmem %s313_s16, 2048  ;;  %p2552_p12 = scmp.lt.s32.totalorder %s313_s16, %s313_s16 }
  0x61   : > { %p2545_p5 = scmp.ne.s32.totalorder %s313_s16, %s2544_s24  ;;  %p2553_p0 = scmp.lt.s32.totalorder %s2544_s24, %s2544_s24 }
  0x63   : > { %p2547_p7 = pnand %p2545_p5, %p2792_p13  ;;  %p2554_p1 = por %p2553_p0, %p2552_p12 }
  0x65   : > { %p2548_p9 = pneg %p2547_p7 }
  0x67   : > { %p2555_p2 = pnand %p2554_p1, %p2548_p9 }
  0x69   : > { %2558 = shalt.err (!%p2555_p2)
}
  0x6a   : > { %2388 = dma.hbm_to_vmem [thread:$0]  (!%p2776_p11), %s3245_s7, 2048, %s313_s16, [#allocation9], %s2668_s25, %s2668_s25, %s2669_s26  }
  0x6b   : > { %s2886_s14 = sadd.s32 1, %s2663_s12   ;;  %s34_s20 = sadd.s32 1, %s2659_s11 }
  0x6c   : > { %s31_s30 = ssub.s32 %s2663_s12, %s2886_s14  ;;  %p41_p13 = scmp.ne.s32.totalorder %s2659_s11, %s2655_s10 }
  0x6d   : > { %p32_p4 = scmp.eq.s32.totalorder %s31_s30, 0  ;;  %p42_p8 = scmp.eq.s32.totalorder %s2663_s12, 0 }
  0x6e   : > { %p3262_p6 = scmp.eq.s32.totalorder %s2746_s13, 1  ;;  %p2401_p3 = scmp.lt.s32.totalorder %s2663_s12, 2 }
  0x6f   : > { %s2902_s28 = scalar_select %p32_p4, %s2659_s11, %s34_s20  }
  0x70   : > { %p2896_p10 = por %p3262_p6, %p41_p13  ;;  %p43_p5 = por %p42_p8, %p41_p13 }
  0x71   : > { %s329_s29 = sand.u32 1, %s2659_s11   ;;  %s1714_s16 = sshll.u32 %s2663_s12, 12 }
  0x72   : > { %s1695_s18 = sshll.u32 %s329_s29, 8  ;;  %s2909_s19 = scalar_lea.hbm %s3238_s0, %s1714_s16 }
  0x73   : > { %s333_s24 = scalar_lea.vmem [#allocation2], %s1695_s18  ;;  %p2913_p11 = pnand %p2401_p3, %p43_p5 }
  0x74   : > { %s340_s22 = sshll.u32 %s333_s24, 4  ;;  %s2917_s20 = scalar_lea.sflag [#allocation3], %s329_s29  ;;  %s2911_s22 = int_to_ptr.vmem [resolvable:$true] %s340_s22 }
  0x75   : > { %s2559_s30 = scalar_lea.hbm %s2909_s19, 4096  ;;  %p2561_p9 = pneg %p2913_p11 }
  0x76   : > { %p2560_p7 = scmp.ne.s32.totalorder %s2909_s19, %s2559_s30  ;;  %s2564_s21 = scalar_lea.hbm %s3238_s0, 8192 }
  0x77   : > { %p2565_p1 = scmp.lt.u32.totalorder %s2909_s19, %s3238_s0  ;;  %p2566_p2 = scmp.lt.u32.totalorder %s2564_s21, %s2559_s30 }
  0x78   : > { %p2562_p12 = pnand %p2561_p9, %p2560_p7  ;;  %p2568_p4 = scmp.lt.u32.totalorder %s2559_s30, %s2909_s19 }
  0x79   : > { %p2567_p13 = por %p2566_p2, %p2565_p1 }
  0x7a   : > { %p2563_p0 = pneg %p2562_p12 }
  0x7b   : > { %p2569_p8 = por %p2568_p4, %p2567_p13 }
  0x7d   : > { %p2570_p6 = pnand %p2569_p8, %p2563_p0 }
  0x7f   : > { %2573 = shalt.err (!%p2570_p6)
}
  0x80   : > { %s2574_s29 = scalar_lea.vmem %s2911_s22, 4096  ;;  %s2671_s18 = smov [#allocation2]  }
  0x81   : > { %p2575_p3 = scmp.ne.s32.totalorder %s2911_s22, %s2574_s29  ;;  %s2579_s16 = sshll.u32 %s2671_s18, 4  ;;  %s2580_s16 = int_to_ptr.vmem [resolvable:$false] %s2579_s16 }
  0x82   : > { %s2581_s23 = scalar_lea.vmem %s2580_s16, 8192  ;;  %p2582_p12 = scmp.lt.s32.totalorder %s2911_s22, %s2580_s16 }
  0x83   : > { %p2577_p5 = pnand %p2575_p3, %p2561_p9  ;;  %p2583_p1 = scmp.lt.s32.totalorder %s2581_s23, %s2574_s29 }
  0x85   : > { %p2578_p7 = pneg %p2577_p5  ;;  %p2584_p2 = por %p2583_p1, %p2582_p12 }
  0x87   : > { %p2585_p13 = pnand %p2584_p2, %p2578_p7 }
  0x89   : > { %2588 = shalt.err (!%p2585_p13)
}
  0x8a   : > { %2392 = dma.hbm_to_vmem [thread:$0]  (!%p2913_p11), %s2909_s19, 4096, %s2911_s22, %s2917_s20, %s2668_s25, %s2668_s25, %s2669_s26  }
  0x8b   : > { %p3265_p9 = scmp.ne.s32.totalorder %s3259_s17, 0 }
  0x8c   : > { %s2951_s30 = sand.u32 (!%p3265_p9), 1, %s2655_s10   ;;  %p3266_p0 = scmp.ne.s32.totalorder (!%p3265_p9), %s3256_s15, 0 }
  0x8d   : > { %352 = sbr.rel (%p3265_p9) target bundleno = 1135 (0x46f), region = 56  ;;  %s1699_s21 = sshll.u32 (!%p3265_p9), %s2951_s30, 8 }
  0x8e   : > { %s355_s24 = scalar_lea.sflag (!%p3265_p9), [#allocation3], %s2951_s30  ;;  %s2957_s9 = scalar_lea.vmem (!%p3265_p9), [#allocation2], %s1699_s21 }
  0x94   : > { %2634 = dma.done.wait (%p3266_p0), %s355_s24, 4096  }
  0x95   : > { %2636 = vsyncadd (%p3266_p0), %s355_s24, 4294963200  ;;  %p3267_p11 = scmp.eq.s32.totalorder %s2746_s13, 0 }
  0x97   : > { %2638 = dma.done.wait (%p3267_p11), [#allocation6], 4096   ;;  %p3268_p4 = pmov %p3267_p11 }
  0x99   : > { %2640 = vsyncadd (%p3268_p4), [#allocation6], 4294963200  ;;  %p3269_p8 = pmov %p3268_p4 }
  0x9a   : > { %p3270_p6 = pmov %p3268_p4 }
  0x9b   : > { %2642 = dma.done.wait (%p3269_p8), [#allocation9], 4096  }
  0x9c   : > { %2644 = vsyncadd (%p3270_p6), [#allocation9], 4294963200  ;;  %v443_v0 = vld [vmem:[#allocation5] sm:$0xff]  ;;  %v444_v1 = vld [vmem:[#allocation5 + $0x8] sm:$0xff]  ;;  %s3123_s18 = scalar_lea.vmem [#allocation11], %s1699_s21  ;;  %s1715_s16 = sshll.u32 %s2746_s13, 12 }
  0x9d   : > { %v445_v2 = vld [vmem:[#allocation5 + $0x10] sm:$0xff]  ;;  %v2228_v3 = vpack.c.bf16 %v444_v1, %v443_v0  ;;  %v446_v4 = vld [vmem:[#allocation5 + $0x18] sm:$0xff]  ;;  %v447_v6 = vld [vmem:[#allocation5 + $0x20] sm:$0xff]  ;;  %s1577_s23 = sshll.u32 %s3123_s18, 4  ;;  %s1564_s13 = scalar_lea.sflag [#allocation4], %s2951_s30  ;;  %s3191_s23 = int_to_ptr.vmem [resolvable:$true] %s1577_s23 }
  0x9e   : > { %v2232_v5 = vpack.c.bf16 %v446_v4, %v445_v2  ;;  %v448_v7 = vld [vmem:[#allocation5 + $0x28] sm:$0xff]  ;;  %v411_v9 = vld [vmem:[%s2957_s9] sm:$0xff]  ;;  %v449_v10 = vld [vmem:[#allocation5 + $0x30] sm:$0xff]  ;;  %s2589_s17 = scalar_lea.vmem %s3191_s23, 4096  ;;  %s2672_s25 = smov [#allocation11]  }
  0x9f   : > { %2229 = vmatprep.subr.bf16.mxu0 %v2228_v3  ;;  %v2236_v8 = vpack.c.bf16 %v448_v7, %v447_v6  ;;  %v450_v11 = vld [vmem:[#allocation5 + $0x38] sm:$0xff]  ;;  %1940 = vmatprep.mubr.f32.mxu0 %v411_v9  ;;  %v451_v13 = vld [vmem:[#allocation5 + $0x40] sm:$0xff]  ;;  %v452_v14 = vld [vmem:[#allocation5 + $0x48] sm:$0xff]  ;;  %p2590_p3 = scmp.ne.s32.totalorder %s3191_s23, %s2589_s17  ;;  %s2593_s26 = sshll.u32 %s2672_s25, 4  ;;  %s2594_s26 = int_to_ptr.vmem [resolvable:$false] %s2593_s26 }
  0xa0   : > { %2231 = vmatpush3.bf16.msra.mxu0 %v2228_v3  ;;  %v2240_v12 = vpack.c.bf16 %v450_v11, %v449_v10  ;;  %v2244_v15 = vpack.c.bf16 %v452_v14, %v451_v13  ;;  %v453_v16 = vld [vmem:[#allocation5 + $0x50] sm:$0xff]  ;;  %v454_v17 = vld [vmem:[#allocation5 + $0x58] sm:$0xff]  ;;  %v723_v18 = vld [vmem:[#allocation7] sm:$0xff]  ;;  %s2595_s19 = scalar_lea.vmem %s2594_s26, 8192  ;;  %p2596_p12 = scmp.lt.s32.totalorder %s3191_s23, %s2594_s26 }
  0xa1   : > { %2233 = vmatprep.subr.bf16.mxu0 %v2232_v5  ;;  %v724_v19 = vld [vmem:[#allocation7 + $0x8] sm:$0xff]  ;;  %v725_v20 = vld [vmem:[#allocation7 + $0x10] sm:$0xff]  ;;  %v2248_v21 = vpack.c.bf16 %v454_v17, %v453_v16  ;;  %v455_v22 = vld [vmem:[#allocation5 + $0x60] sm:$0xff]  ;;  %p2591_p5 = pnand %p2590_p3, %p2896_p10  ;;  %p2597_p1 = scmp.lt.s32.totalorder %s2595_s19, %s2589_s17 }
  0xa2   : > { %v2260_v23 = vpack.c.bf16 %v724_v19, %v723_v18  ;;  %v726_v24 = vld [vmem:[#allocation7 + $0x18] sm:$0xff]  ;;  %v456_v25 = vld [vmem:[#allocation5 + $0x68] sm:$0xff]  ;;  %v727_v27 = vld [vmem:[#allocation7 + $0x20] sm:$0xff] }
  0xa3   : > { %v2264_v26 = vpack.c.bf16 %v726_v24, %v725_v20  ;;  %v728_v28 = vld [vmem:[#allocation7 + $0x28] sm:$0xff]  ;;  %v2252_v29 = vpack.c.bf16 %v456_v25, %v455_v22  ;;  %v457_v30 = vld [vmem:[#allocation5 + $0x70] sm:$0xff]  ;;  %v458_v32 = vld [vmem:[#allocation5 + $0x78] sm:$0xff]  ;;  %p2592_p7 = pneg %p2591_p5  ;;  %p2598_p2 = por %p2597_p1, %p2596_p12 }
  0xa4   : > { %2235 = vmatpush3.bf16.msra.mxu0 %v2232_v5  ;;  %2261 = vmatprep.subr.bf16.mxu1 %v2260_v23  ;;  %v2268_v31 = vpack.c.bf16 %v728_v28, %v727_v27  ;;  %v729_v33 = vld [vmem:[#allocation7 + $0x30] sm:$0xff]  ;;  %v730_v34 = vld [vmem:[#allocation7 + $0x38] sm:$0xff]  ;;  %v2256_v35 = vpack.c.bf16 %v458_v32, %v457_v30  ;;  %v731_v37 = vld [vmem:[#allocation7 + $0x40] sm:$0xff] }
  0xa5   : > { %2237 = vmatprep.subr.bf16.mxu0 %v2236_v8  ;;  %2263 = vmatpush3.bf16.msra.mxu1 %v2260_v23  ;;  %v2272_v36 = vpack.c.bf16 %v730_v34, %v729_v33  ;;  %v732_v38 = vld [vmem:[#allocation7 + $0x48] sm:$0xff]  ;;  %v733_v40 = vld [vmem:[#allocation7 + $0x50] sm:$0xff]  ;;  %v734_v41 = vld [vmem:[#allocation7 + $0x58] sm:$0xff]  ;;  %p2599_p13 = pnand %p2598_p2, %p2592_p7 }
  0xa6   : > { %2265 = vmatprep.subr.bf16.mxu1 %v2264_v26  ;;  %v2276_v39 = vpack.c.bf16 %v732_v38, %v731_v37  ;;  %v412_v42 = vld [vmem:[%s2957_s9 + $0x8] sm:$0xff]  ;;  %v413_v43 = vld [vmem:[%s2957_s9 + $0x10] sm:$0xff]  ;;  %v2280_v44 = vpack.c.bf16 %v734_v41, %v733_v40  ;;  %v735_v45 = vld [vmem:[#allocation7 + $0x60] sm:$0xff] }
  0xa7   : > { %v736_v46 = vld [vmem:[#allocation7 + $0x68] sm:$0xff]  ;;  %v414_v47 = vld [vmem:[%s2957_s9 + $0x18] sm:$0xff]  ;;  %v415_v48 = vld [vmem:[%s2957_s9 + $0x20] sm:$0xff] }
  0xa8   : > { %2239 = vmatpush3.bf16.msra.mxu0 %v2236_v8  ;;  %v2284_v49 = vpack.c.bf16 %v736_v46, %v735_v45  ;;  %v416_v50 = vld [vmem:[%s2957_s9 + $0x28] sm:$0xff]  ;;  %v417_v51 = vld [vmem:[%s2957_s9 + $0x30] sm:$0xff]  ;;  %v418_v52 = vld [vmem:[%s2957_s9 + $0x38] sm:$0xff] }
  0xa9   : > { %2241 = vmatprep.subr.bf16.mxu0 %v2240_v12  ;;  %2267 = vmatpush3.bf16.msra.mxu1 %v2264_v26  ;;  %v419_v53 = vld [vmem:[%s2957_s9 + $0x40] sm:$0xff]  ;;  %v420_v54 = vld [vmem:[%s2957_s9 + $0x48] sm:$0xff]  ;;  %v421_v55 = vld [vmem:[%s2957_s9 + $0x50] sm:$0xff] }
  0xaa   : > { %2269 = vmatprep.subr.bf16.mxu1 %v2268_v31  ;;  %v422_v56 = vld [vmem:[%s2957_s9 + $0x58] sm:$0xff]  ;;  %v423_v57 = vld [vmem:[%s2957_s9 + $0x60] sm:$0xff]  ;;  %v424_v58 = vld [vmem:[%s2957_s9 + $0x68] sm:$0xff] }
  0xab   : > { %v425_v59 = vld [vmem:[%s2957_s9 + $0x70] sm:$0xff]  ;;  %v426_v60 = vld [vmem:[%s2957_s9 + $0x78] sm:$0xff]  ;;  %v427_v61 = vld [vmem:[%s2957_s9 + $0x80] sm:$0xff] }
  0xac   : > { %2243 = vmatpush3.bf16.msra.mxu0 %v2240_v12  ;;  %v428_v62 = vld [vmem:[%s2957_s9 + $0x88] sm:$0xff]  ;;  %v429_v63 = vld [vmem:[%s2957_s9 + $0x90] sm:$0xff]  ;;  %v430_v0 = vld [vmem:[%s2957_s9 + $0x98] sm:$0xff] }
  0xad   : > { %2245 = vmatprep.subr.bf16.mxu0 %v2244_v15  ;;  %2271 = vmatpush3.bf16.msra.mxu1 %v2268_v31  ;;  %v431_v1 = vld [vmem:[%s2957_s9 + $0xa0] sm:$0xff]  ;;  %v432_v2 = vld [vmem:[%s2957_s9 + $0xa8] sm:$0xff]  ;;  %v433_v3 = vld [vmem:[%s2957_s9 + $0xb0] sm:$0xff] }
  0xae   : > { %2273 = vmatprep.subr.bf16.mxu1 %v2272_v36  ;;  %v434_v4 = vld [vmem:[%s2957_s9 + $0xb8] sm:$0xff]  ;;  %v435_v5 = vld [vmem:[%s2957_s9 + $0xc0] sm:$0xff]  ;;  %v436_v6 = vld [vmem:[%s2957_s9 + $0xc8] sm:$0xff] }
  0xaf   : > { %v437_v7 = vld [vmem:[%s2957_s9 + $0xd0] sm:$0xff]  ;;  %v438_v8 = vld [vmem:[%s2957_s9 + $0xd8] sm:$0xff]  ;;  %v439_v9 = vld [vmem:[%s2957_s9 + $0xe0] sm:$0xff] }
  0xb0   : > { %2247 = vmatpush3.bf16.msra.mxu0 %v2244_v15  ;;  %v440_v10 = vld [vmem:[%s2957_s9 + $0xe8] sm:$0xff]  ;;  %v441_v11 = vld [vmem:[%s2957_s9 + $0xf0] sm:$0xff]  ;;  %v442_v12 = vld [vmem:[%s2957_s9 + $0xf8] sm:$0xff]  ;;  %s3271_s9 = sld [smem:[#allocation18_spill]] }
  0xb1   : > { %2249 = vmatprep.subr.bf16.mxu0 %v2248_v21  ;;  %2275 = vmatpush3.bf16.msra.mxu1 %v2272_v36  ;;  %v737_v13 = vld [vmem:[#allocation7 + $0x70] sm:$0xff]  ;;  %v738_v14 = vld [vmem:[#allocation7 + $0x78] sm:$0xff]  ;;  %v1003_v16 = vld [vmem:[#allocation8] sm:$0xff] }
  0xb2   : > { %2277 = vmatprep.subr.bf16.mxu1 %v2276_v39  ;;  %v2288_v15 = vpack.c.bf16 %v738_v14, %v737_v13  ;;  %v1004_v17 = vld [vmem:[#allocation8 + $0x8] sm:$0xff]  ;;  %v1005_v18 = vld [vmem:[#allocation8 + $0x10] sm:$0xff]  ;;  %v1006_v20 = vld [vmem:[#allocation8 + $0x18] sm:$0xff] }
  0xb3   : > { %v2292_v19 = vpack.c.bf16 %v1004_v17, %v1003_v16  ;;  %v1007_v22 = vld [vmem:[#allocation8 + $0x20] sm:$0xff]  ;;  %v1008_v23 = vld [vmem:[#allocation8 + $0x28] sm:$0xff]  ;;  %v1009_v25 = vld [vmem:[#allocation8 + $0x30] sm:$0xff] }
  0xb4   : > { %2251 = vmatpush3.bf16.msra.mxu0 %v2248_v21  ;;  %v2296_v21 = vpack.c.bf16 %v1006_v20, %v1005_v18  ;;  %v2300_v24 = vpack.c.bf16 %v1008_v23, %v1007_v22  ;;  %v1010_v26 = vld [vmem:[#allocation8 + $0x38] sm:$0xff]  ;;  %v1011_v28 = vld [vmem:[#allocation8 + $0x40] sm:$0xff]  ;;  %v1013_v31 = vld [vmem:[#allocation8 + $0x50] sm:$0xff] }
  0xb5   : > { %2253 = vmatprep.subr.bf16.mxu0 %v2252_v29  ;;  %2279 = vmatpush3.bf16.msra.mxu1 %v2276_v39  ;;  %v2304_v27 = vpack.c.bf16 %v1010_v26, %v1009_v25  ;;  %v1014_v32 = vld [vmem:[#allocation8 + $0x58] sm:$0xff]  ;;  %v1015_v34 = vld [vmem:[#allocation8 + $0x60] sm:$0xff]  ;;  %v1017_v37 = vld [vmem:[#allocation8 + $0x70] sm:$0xff] }
  0xb6   : > { %2281 = vmatprep.subr.bf16.mxu1 %v2280_v44  ;;  %v2312_v33 = vpack.c.bf16 %v1014_v32, %v1013_v31  ;;  %v1018_v38 = vld [vmem:[#allocation8 + $0x78] sm:$0xff]  ;;  %v3006_v40 = vld [vmem:[%s3240_s2] ss:$0 sm:$0xff]  ;;  %s3189_s15 = scalar_lea.hbm %s3271_s9, %s1715_s16 }
  0xb7   : > { %v2320_v39 = vpack.c.bf16 %v1018_v38, %v1017_v37 }
  0xb8   : > { %2255 = vmatpush3.bf16.msra.mxu0 %v2252_v29  ;;  %v1012_v29 = vld [vmem:[#allocation8 + $0x48] sm:$0xff] }
  0xb9   : > { %2257 = vmatprep.subr.bf16.mxu0 %v2256_v35  ;;  %2283 = vmatpush3.bf16.msra.mxu1 %v2280_v44  ;;  %v2308_v30 = vpack.c.bf16 %v1012_v29, %v1011_v28 }
  0xba   : > { %2285 = vmatprep.subr.bf16.mxu1 %v2284_v49 }
  0xbc   : > { %2259 = vmatpush3.bf16.msra.mxu0 %v2256_v35  ;;  %v1016_v35 = vld [vmem:[#allocation8 + $0x68] sm:$0xff] }
  0xbd   : > { %2287 = vmatpush3.bf16.msra.mxu1 %v2284_v49  ;;  %2293 = vmatprep.subr.bf16.mxu0 %v2292_v19  ;;  %v2316_v36 = vpack.c.bf16 %v1016_v35, %v1015_v34 }
  0xbe   : > { %2289 = vmatprep.subr.bf16.mxu1 %v2288_v15 }
  0xbf   : > { %1941 = vmatmul.mubr.f32.vlgmr.msra.gmra.mrb[0].mxu0 %v412_v42 }
  0xc0   : > { %1943 = vmatprep.mubr.f32.mxu0 %v413_v43  ;;  %2295 = vmatpush3.bf16.msra.mxu0 %v2292_v19 }
  0xc1   : > { %2291 = vmatpush3.bf16.msra.mxu1 %v2288_v15  ;;  %2297 = vmatprep.subr.bf16.mxu0 %v2296_v21 }
  0xc3   : > { %1944 = vmatmul.mubr.f32.gmra.mrb[2].mxu0 %v414_v47 }
  0xc4   : > { %1946 = vmatprep.mubr.f32.mxu0 %v415_v48  ;;  %2299 = vmatpush3.bf16.msra.mxu0 %v2296_v21 }
  0xc5   : > { %2301 = vmatprep.subr.bf16.mxu0 %v2300_v24 }
  0xc7   : > { %1947 = vmatmul.mubr.f32.gmra.mrb[4].mxu0 %v416_v50 }
  0xc8   : > { %1949 = vmatprep.mubr.f32.mxu0 %v417_v51  ;;  %2303 = vmatpush3.bf16.msra.mxu0 %v2300_v24 }
  0xc9   : > { %2305 = vmatprep.subr.bf16.mxu0 %v2304_v27 }
  0xcb   : > { %1950 = vmatmul.mubr.f32.gmra.mrb[6].mxu0 %v418_v52 }
  0xcc   : > { %1952 = vmatprep.mubr.f32.mxu0 %v419_v53  ;;  %2307 = vmatpush3.bf16.msra.mxu0 %v2304_v27 }
  0xcd   : > { %2309 = vmatprep.subr.bf16.mxu0 %v2308_v30 }
  0xcf   : > { %1953 = vmatmul.mubr.f32.gmra.mrb[8].mxu0 %v420_v54 }
  0xd0   : > { %1955 = vmatprep.mubr.f32.mxu0 %v421_v55  ;;  %2311 = vmatpush3.bf16.msra.mxu0 %v2308_v30 }
  0xd1   : > { %2313 = vmatprep.subr.bf16.mxu0 %v2312_v33 }
  0xd3   : > { %1956 = vmatmul.mubr.f32.gmra.mrb[10].mxu0 %v422_v56 }
  0xd4   : > { %1958 = vmatprep.mubr.f32.mxu0 %v423_v57  ;;  %2315 = vmatpush3.bf16.msra.mxu0 %v2312_v33 }
  0xd5   : > { %2317 = vmatprep.subr.bf16.mxu0 %v2316_v36 }
  0xd7   : > { %1959 = vmatmul.mubr.f32.gmra.mrb[12].mxu0 %v424_v58 }
  0xd8   : > { %1961 = vmatprep.mubr.f32.mxu0 %v425_v59  ;;  %2319 = vmatpush3.bf16.msra.mxu0 %v2316_v36 }
  0xd9   : > { %2321 = vmatprep.subr.bf16.mxu0 %v2320_v39 }
  0xdb   : > { %1962 = vmatmul.mubr.f32.gmra.mrb[14].mxu0 %v426_v60 }
  0xdc   : > { %1964 = vmatprep.mubr.f32.mxu0 %v427_v61  ;;  %2323 = vmatpush3.bf16.msra.mxu0 %v2320_v39 }
  0xdf   : > { %1965 = vmatmul.mubr.f32.gmra.mrb[16].mxu0 %v428_v62 }
  0xe0   : > { %1967 = vmatprep.mubr.f32.mxu0 %v429_v63 }
  0xe3   : > { %1968 = vmatmul.mubr.f32.gmra.mrb[18].mxu0 %v430_v0 }
  0xe4   : > { %1970 = vmatprep.mubr.f32.mxu0 %v431_v1 }
  0xe7   : > { %1971 = vmatmul.mubr.f32.gmra.mrb[20].mxu0 %v432_v2 }
  0xe8   : > { %1973 = vmatprep.mubr.f32.mxu0 %v433_v3 }
  0xeb   : > { %1974 = vmatmul.mubr.f32.gmra.mrb[22].mxu0 %v434_v4 }
  0xec   : > { %1976 = vmatprep.mubr.f32.mxu0 %v435_v5 }
  0xef   : > { %1977 = vmatmul.mubr.f32.gmra.mrb[24].mxu0 %v436_v6 }
  0xf0   : > { %1979 = vmatprep.mubr.f32.mxu0 %v437_v7 }
  0xf3   : > { %1980 = vmatmul.mubr.f32.gmra.mrb[26].mxu0 %v438_v8 }
  0xf4   : > { %1982 = vmatprep.mubr.f32.mxu0 %v439_v9 }
  0xf7   : > { %1983 = vmatmul.mubr.f32.gmra.mrb[28].mxu0 %v440_v10 }
  0xf8   : > { %1985 = vmatprep.mubr.f32.mxu0 %v441_v11 }
  0xfb   : > { %1986 = vmatmul.mubr.f32.gmra.mrb[30].mxu0 %v442_v12 }
 0x192   : > { %v1942_v41 = vpop.f32.mrb[0].mxu0 }
 0x193   : > { %v538_v42 = vadd.f32 %v1942_v41, %v3006_v40  ;;  %v532_v43 = vpop.f32.mrb[1].mxu0 }
 0x194   : > { %v533_v44 = vadd.f32 %v3006_v40, %v532_v43 }
 0x195   : > { %v692_v47 = vmax.f32 %v538_v42, 0.0 }
 0x196   : > { %v1945_v45 = vpop.f32.mrb[2].mxu0  ;;  %v691_v46 = vmax.f32 %v533_v44, 0.0 }
 0x197   : > { %v548_v48 = vadd.f32 %v1945_v45, %v3006_v40  ;;  %v542_v49 = vpop.f32.mrb[3].mxu0 }
 0x198   : > { %v543_v50 = vadd.f32 %v3006_v40, %v542_v49  ;;  %2020 = vmatprep.mubr.f32.mxu1 %v691_v46 }
 0x199   : > { %2021 = vmatmul.mubr.f32.vlgmr.msra.gmra.mrb[0].mxu1 %v692_v47  ;;  %v694_v53 = vmax.f32 %v548_v48, 0.0 }
 0x19a   : > { %v693_v51 = vmax.f32 %v543_v50, 0.0  ;;  %v1948_v52 = vpop.f32.mrb[4].mxu0 }
 0x19b   : > { %v558_v54 = vadd.f32 %v1948_v52, %v3006_v40  ;;  %v552_v55 = vpop.f32.mrb[5].mxu0 }
 0x19c   : > { %v553_v56 = vadd.f32 %v3006_v40, %v552_v55  ;;  %2023 = vmatprep.mubr.f32.mxu1 %v693_v51 }
 0x19d   : > { %2024 = vmatmul.mubr.f32.gmra.mrb[2].mxu1 %v694_v53  ;;  %v696_v59 = vmax.f32 %v558_v54, 0.0 }
 0x19e   : > { %v695_v57 = vmax.f32 %v553_v56, 0.0  ;;  %v1951_v58 = vpop.f32.mrb[6].mxu0 }
 0x19f   : > { %v568_v60 = vadd.f32 %v1951_v58, %v3006_v40  ;;  %v562_v61 = vpop.f32.mrb[7].mxu0 }
 0x1a0   : > { %v563_v62 = vadd.f32 %v3006_v40, %v562_v61  ;;  %2026 = vmatprep.mubr.f32.mxu1 %v695_v57 }
 0x1a1   : > { %2027 = vmatmul.mubr.f32.gmra.mrb[4].mxu1 %v696_v59  ;;  %v698_v1 = vmax.f32 %v568_v60, 0.0 }
 0x1a2   : > { %v697_v63 = vmax.f32 %v563_v62, 0.0  ;;  %v1954_v0 = vpop.f32.mrb[8].mxu0 }
 0x1a3   : > { %v578_v2 = vadd.f32 %v1954_v0, %v3006_v40  ;;  %v572_v3 = vpop.f32.mrb[9].mxu0 }
 0x1a4   : > { %v573_v4 = vadd.f32 %v3006_v40, %v572_v3  ;;  %2029 = vmatprep.mubr.f32.mxu1 %v697_v63 }
 0x1a5   : > { %2030 = vmatmul.mubr.f32.gmra.mrb[6].mxu1 %v698_v1  ;;  %v700_v7 = vmax.f32 %v578_v2, 0.0 }
 0x1a6   : > { %v699_v5 = vmax.f32 %v573_v4, 0.0  ;;  %v1957_v6 = vpop.f32.mrb[10].mxu0 }
 0x1a7   : > { %v588_v8 = vadd.f32 %v1957_v6, %v3006_v40  ;;  %v582_v9 = vpop.f32.mrb[11].mxu0 }
 0x1a8   : > { %v583_v10 = vadd.f32 %v3006_v40, %v582_v9  ;;  %2032 = vmatprep.mubr.f32.mxu1 %v699_v5 }
 0x1a9   : > { %2033 = vmatmul.mubr.f32.gmra.mrb[8].mxu1 %v700_v7  ;;  %v702_v13 = vmax.f32 %v588_v8, 0.0 }
 0x1aa   : > { %v701_v11 = vmax.f32 %v583_v10, 0.0  ;;  %v1960_v12 = vpop.f32.mrb[12].mxu0  ;;  %v1283_v10 = vld [vmem:[#allocation10] sm:$0xff] }
 0x1ab   : > { %v598_v14 = vadd.f32 %v1960_v12, %v3006_v40  ;;  %v592_v15 = vpop.f32.mrb[13].mxu0  ;;  %v1285_v12 = vld [vmem:[#allocation10 + $0x10] sm:$0xff] }
 0x1ac   : > { %v593_v16 = vadd.f32 %v3006_v40, %v592_v15  ;;  %2035 = vmatprep.mubr.f32.mxu1 %v701_v11  ;;  %v1284_v11 = vld [vmem:[#allocation10 + $0x8] sm:$0xff] }
 0x1ad   : > { %2036 = vmatmul.mubr.f32.gmra.mrb[10].mxu1 %v702_v13  ;;  %v704_v19 = vmax.f32 %v598_v14, 0.0  ;;  %v2324_v13 = vpack.c.bf16 %v1284_v11, %v1283_v10  ;;  %v1286_v14 = vld [vmem:[#allocation10 + $0x18] sm:$0xff] }
 0x1ae   : > { %v703_v17 = vmax.f32 %v593_v16, 0.0  ;;  %v1963_v18 = vpop.f32.mrb[14].mxu0  ;;  %v2328_v15 = vpack.c.bf16 %v1286_v14, %v1285_v12  ;;  %v1287_v16 = vld [vmem:[#allocation10 + $0x20] sm:$0xff] }
 0x1af   : > { %v608_v20 = vadd.f32 %v1963_v18, %v3006_v40  ;;  %v602_v21 = vpop.f32.mrb[15].mxu0  ;;  %2325 = vmatprep.subr.bf16.mxu1 %v2324_v13 }
 0x1b0   : > { %v603_v22 = vadd.f32 %v3006_v40, %v602_v21  ;;  %2038 = vmatprep.mubr.f32.mxu1 %v703_v17  ;;  %v1288_v17 = vld [vmem:[#allocation10 + $0x28] sm:$0xff]  ;;  %2327 = vmatpush3.bf16.msra.mxu1 %v2324_v13  ;;  %v1291_v21 = vld [vmem:[#allocation10 + $0x40] sm:$0xff] }
 0x1b1   : > { %2039 = vmatmul.mubr.f32.gmra.mrb[12].mxu1 %v704_v19  ;;  %v706_v25 = vmax.f32 %v608_v20, 0.0  ;;  %2329 = vmatprep.subr.bf16.mxu1 %v2328_v15  ;;  %v2332_v18 = vpack.c.bf16 %v1288_v17, %v1287_v16  ;;  %v1289_v19 = vld [vmem:[#allocation10 + $0x30] sm:$0xff] }
 0x1b2   : > { %v705_v23 = vmax.f32 %v603_v22, 0.0  ;;  %v1966_v24 = vpop.f32.mrb[16].mxu0  ;;  %v1292_v22 = vld [vmem:[#allocation10 + $0x48] sm:$0xff] }
 0x1b3   : > { %v618_v26 = vadd.f32 %v1966_v24, %v3006_v40  ;;  %v612_v27 = vpop.f32.mrb[17].mxu0  ;;  %v1293_v24 = vld [vmem:[#allocation10 + $0x50] sm:$0xff] }
 0x1b4   : > { %v613_v28 = vadd.f32 %v3006_v40, %v612_v27  ;;  %2041 = vmatprep.mubr.f32.mxu1 %v705_v23  ;;  %2331 = vmatpush3.bf16.msra.mxu1 %v2328_v15  ;;  %v2340_v23 = vpack.c.bf16 %v1292_v22, %v1291_v21  ;;  %v1295_v27 = vld [vmem:[#allocation10 + $0x60] sm:$0xff] }
 0x1b5   : > { %2042 = vmatmul.mubr.f32.gmra.mrb[14].mxu1 %v706_v25  ;;  %v708_v31 = vmax.f32 %v618_v26, 0.0  ;;  %2333 = vmatprep.subr.bf16.mxu1 %v2332_v18  ;;  %v1294_v25 = vld [vmem:[#allocation10 + $0x58] sm:$0xff] }
 0x1b6   : > { %v707_v29 = vmax.f32 %v613_v28, 0.0  ;;  %v1969_v30 = vpop.f32.mrb[18].mxu0  ;;  %v2344_v26 = vpack.c.bf16 %v1294_v25, %v1293_v24  ;;  %v1296_v28 = vld [vmem:[#allocation10 + $0x68] sm:$0xff] }
 0x1b7   : > { %v628_v32 = vadd.f32 %v1969_v30, %v3006_v40  ;;  %v622_v33 = vpop.f32.mrb[19].mxu0  ;;  %v1297_v30 = vld [vmem:[#allocation10 + $0x70] sm:$0xff] }
 0x1b8   : > { %v623_v34 = vadd.f32 %v3006_v40, %v622_v33  ;;  %2044 = vmatprep.mubr.f32.mxu1 %v707_v29  ;;  %2335 = vmatpush3.bf16.msra.mxu1 %v2332_v18  ;;  %v2348_v29 = vpack.c.bf16 %v1296_v28, %v1295_v27  ;;  %v3043_v33 = vld [vmem:[%s3242_s4] ss:$0 sm:$0xff] }
 0x1b9   : > { %2045 = vmatmul.mubr.f32.gmra.mrb[16].mxu1 %v708_v31  ;;  %v710_v37 = vmax.f32 %v628_v32, 0.0  ;;  %v1298_v31 = vld [vmem:[#allocation10 + $0x78] sm:$0xff] }
 0x1ba   : > { %v709_v35 = vmax.f32 %v623_v34, 0.0  ;;  %v1972_v36 = vpop.f32.mrb[20].mxu0  ;;  %v2352_v32 = vpack.c.bf16 %v1298_v31, %v1297_v30 }
 0x1bb   : > { %v638_v38 = vadd.f32 %v1972_v36, %v3006_v40  ;;  %v632_v39 = vpop.f32.mrb[21].mxu0 }
 0x1bc   : > { %v633_v41 = vadd.f32 %v3006_v40, %v632_v39  ;;  %2047 = vmatprep.mubr.f32.mxu1 %v709_v35 }
 0x1bd   : > { %2048 = vmatmul.mubr.f32.gmra.mrb[18].mxu1 %v710_v37  ;;  %v712_v44 = vmax.f32 %v638_v38, 0.0 }
 0x1be   : > { %v711_v42 = vmax.f32 %v633_v41, 0.0  ;;  %v1975_v43 = vpop.f32.mrb[22].mxu0 }
 0x1bf   : > { %v648_v45 = vadd.f32 %v1975_v43, %v3006_v40  ;;  %v642_v46 = vpop.f32.mrb[23].mxu0 }
 0x1c0   : > { %v643_v47 = vadd.f32 %v3006_v40, %v642_v46  ;;  %2050 = vmatprep.mubr.f32.mxu1 %v711_v42 }
 0x1c1   : > { %2051 = vmatmul.mubr.f32.gmra.mrb[20].mxu1 %v712_v44  ;;  %v714_v50 = vmax.f32 %v648_v45, 0.0 }
 0x1c2   : > { %v713_v48 = vmax.f32 %v643_v47, 0.0  ;;  %v1978_v49 = vpop.f32.mrb[24].mxu0 }
 0x1c3   : > { %v658_v51 = vadd.f32 %v1978_v49, %v3006_v40  ;;  %v652_v52 = vpop.f32.mrb[25].mxu0 }
 0x1c4   : > { %v653_v53 = vadd.f32 %v3006_v40, %v652_v52  ;;  %2053 = vmatprep.mubr.f32.mxu1 %v713_v48 }
 0x1c5   : > { %2054 = vmatmul.mubr.f32.gmra.mrb[22].mxu1 %v714_v50  ;;  %v716_v56 = vmax.f32 %v658_v51, 0.0 }
 0x1c6   : > { %v715_v54 = vmax.f32 %v653_v53, 0.0  ;;  %v1981_v55 = vpop.f32.mrb[26].mxu0 }
 0x1c7   : > { %v668_v57 = vadd.f32 %v1981_v55, %v3006_v40  ;;  %v662_v58 = vpop.f32.mrb[27].mxu0 }
 0x1c8   : > { %v663_v59 = vadd.f32 %v3006_v40, %v662_v58  ;;  %2056 = vmatprep.mubr.f32.mxu1 %v715_v54 }
 0x1c9   : > { %2057 = vmatmul.mubr.f32.gmra.mrb[24].mxu1 %v716_v56  ;;  %v718_v62 = vmax.f32 %v668_v57, 0.0 }
 0x1ca   : > { %v717_v60 = vmax.f32 %v663_v59, 0.0  ;;  %v1984_v61 = vpop.f32.mrb[28].mxu0 }
 0x1cb   : > { %v678_v63 = vadd.f32 %v1984_v61, %v3006_v40  ;;  %v672_v0 = vpop.f32.mrb[29].mxu0 }
 0x1cc   : > { %v673_v1 = vadd.f32 %v3006_v40, %v672_v0  ;;  %2059 = vmatprep.mubr.f32.mxu1 %v717_v60 }
 0x1cd   : > { %2060 = vmatmul.mubr.f32.gmra.mrb[26].mxu1 %v718_v62  ;;  %v720_v4 = vmax.f32 %v678_v63, 0.0 }
 0x1ce   : > { %v719_v2 = vmax.f32 %v673_v1, 0.0  ;;  %v1987_v3 = vpop.f32.mrb[30].mxu0 }
 0x1cf   : > { %v688_v5 = vadd.f32 %v1987_v3, %v3006_v40  ;;  %v682_v6 = vpop.f32.mrb[31].mxu0 }
 0x1d0   : > { %v683_v7 = vadd.f32 %v3006_v40, %v682_v6  ;;  %2062 = vmatprep.mubr.f32.mxu1 %v719_v2  ;;  %v1290_v40 = vld [vmem:[#allocation10 + $0x38] sm:$0xff] }
 0x1d1   : > { %2063 = vmatmul.mubr.f32.gmra.mrb[28].mxu1 %v720_v4  ;;  %v722_v9 = vmax.f32 %v688_v5, 0.0  ;;  %v2336_v20 = vpack.c.bf16 %v1290_v40, %v1289_v19 }
 0x1d2   : > { %v721_v8 = vmax.f32 %v683_v7, 0.0 }
 0x1d3   : > { %2337 = vmatprep.subr.bf16.mxu1 %v2336_v20 }
 0x1d4   : > { %2065 = vmatprep.mubr.f32.mxu1 %v721_v8  ;;  %2339 = vmatpush3.bf16.msra.mxu1 %v2336_v20 }
 0x1d5   : > { %2066 = vmatmul.mubr.f32.gmra.mrb[30].mxu1 %v722_v9  ;;  %2341 = vmatprep.subr.bf16.mxu1 %v2340_v23 }
 0x1d8   : > { %2343 = vmatpush3.bf16.msra.mxu1 %v2340_v23 }
 0x1d9   : > { %2345 = vmatprep.subr.bf16.mxu1 %v2344_v26 }
 0x1dc   : > { %2347 = vmatpush3.bf16.msra.mxu1 %v2344_v26 }
 0x1dd   : > { %2349 = vmatprep.subr.bf16.mxu1 %v2348_v29 }
 0x1e0   : > { %2351 = vmatpush3.bf16.msra.mxu1 %v2348_v29 }
 0x1e1   : > { %2353 = vmatprep.subr.bf16.mxu1 %v2352_v32 }
 0x1e4   : > { %2355 = vmatpush3.bf16.msra.mxu1 %v2352_v32 }
 0x26c   : > { %v2022_v34 = vpop.f32.mrb[0].mxu1 }
 0x26d   : > { %v818_v35 = vadd.f32 %v2022_v34, %v3043_v33  ;;  %v812_v36 = vpop.f32.mrb[1].mxu1 }
 0x26e   : > { %v813_v37 = vadd.f32 %v3043_v33, %v812_v36 }
 0x26f   : > { %v972_v41 = vmax.f32 %v818_v35, 0.0 }
 0x270   : > { %v971_v38 = vmax.f32 %v813_v37, 0.0  ;;  %v2025_v39 = vpop.f32.mrb[2].mxu1 }
 0x271   : > { %v828_v42 = vadd.f32 %v2025_v39, %v3043_v33  ;;  %v822_v43 = vpop.f32.mrb[3].mxu1 }
 0x272   : > { %v823_v44 = vadd.f32 %v3043_v33, %v822_v43  ;;  %2100 = vmatprep.mubr.f32.mxu0 %v971_v38 }
 0x273   : > { %2101 = vmatmul.mubr.f32.vlgmr.msra.gmra.mrb[32].mxu0 %v972_v41  ;;  %v974_v47 = vmax.f32 %v828_v42, 0.0 }
 0x274   : > { %v973_v45 = vmax.f32 %v823_v44, 0.0  ;;  %v2028_v46 = vpop.f32.mrb[4].mxu1 }
 0x275   : > { %v838_v48 = vadd.f32 %v2028_v46, %v3043_v33  ;;  %v832_v49 = vpop.f32.mrb[5].mxu1 }
 0x276   : > { %v833_v50 = vadd.f32 %v3043_v33, %v832_v49  ;;  %2103 = vmatprep.mubr.f32.mxu0 %v973_v45 }
 0x277   : > { %2104 = vmatmul.mubr.f32.gmra.mrb[34].mxu0 %v974_v47  ;;  %v976_v53 = vmax.f32 %v838_v48, 0.0 }
 0x278   : > { %v975_v51 = vmax.f32 %v833_v50, 0.0  ;;  %v2031_v52 = vpop.f32.mrb[6].mxu1 }
 0x279   : > { %v848_v54 = vadd.f32 %v2031_v52, %v3043_v33  ;;  %v842_v55 = vpop.f32.mrb[7].mxu1 }
 0x27a   : > { %v843_v56 = vadd.f32 %v3043_v33, %v842_v55  ;;  %2106 = vmatprep.mubr.f32.mxu0 %v975_v51 }
 0x27b   : > { %2107 = vmatmul.mubr.f32.gmra.mrb[36].mxu0 %v976_v53  ;;  %v978_v59 = vmax.f32 %v848_v54, 0.0 }
 0x27c   : > { %v977_v57 = vmax.f32 %v843_v56, 0.0  ;;  %v2034_v58 = vpop.f32.mrb[8].mxu1 }
 0x27d   : > { %v858_v60 = vadd.f32 %v2034_v58, %v3043_v33  ;;  %v852_v61 = vpop.f32.mrb[9].mxu1 }
 0x27e   : > { %v853_v62 = vadd.f32 %v3043_v33, %v852_v61  ;;  %2109 = vmatprep.mubr.f32.mxu0 %v977_v57 }
 0x27f   : > { %2110 = vmatmul.mubr.f32.gmra.mrb[38].mxu0 %v978_v59  ;;  %v980_v1 = vmax.f32 %v858_v60, 0.0 }
 0x280   : > { %v979_v63 = vmax.f32 %v853_v62, 0.0  ;;  %v2037_v0 = vpop.f32.mrb[10].mxu1 }
 0x281   : > { %v868_v2 = vadd.f32 %v2037_v0, %v3043_v33  ;;  %v862_v3 = vpop.f32.mrb[11].mxu1 }
 0x282   : > { %v863_v4 = vadd.f32 %v3043_v33, %v862_v3  ;;  %2112 = vmatprep.mubr.f32.mxu0 %v979_v63 }
 0x283   : > { %2113 = vmatmul.mubr.f32.gmra.mrb[40].mxu0 %v980_v1  ;;  %v982_v7 = vmax.f32 %v868_v2, 0.0 }
 0x284   : > { %v981_v5 = vmax.f32 %v863_v4, 0.0  ;;  %v2040_v6 = vpop.f32.mrb[12].mxu1  ;;  %v3080_v4 = vld [vmem:[%s3244_s6] ss:$0 sm:$0xff] }
 0x285   : > { %v878_v8 = vadd.f32 %v2040_v6, %v3043_v33  ;;  %v872_v9 = vpop.f32.mrb[13].mxu1 }
 0x286   : > { %v873_v10 = vadd.f32 %v3043_v33, %v872_v9  ;;  %2115 = vmatprep.mubr.f32.mxu0 %v981_v5 }
 0x287   : > { %2116 = vmatmul.mubr.f32.gmra.mrb[42].mxu0 %v982_v7  ;;  %v984_v13 = vmax.f32 %v878_v8, 0.0 }
 0x288   : > { %v983_v11 = vmax.f32 %v873_v10, 0.0  ;;  %v2043_v12 = vpop.f32.mrb[14].mxu1 }
 0x289   : > { %v888_v14 = vadd.f32 %v2043_v12, %v3043_v33  ;;  %v882_v15 = vpop.f32.mrb[15].mxu1 }
 0x28a   : > { %v883_v16 = vadd.f32 %v3043_v33, %v882_v15  ;;  %2118 = vmatprep.mubr.f32.mxu0 %v983_v11 }
 0x28b   : > { %2119 = vmatmul.mubr.f32.gmra.mrb[44].mxu0 %v984_v13  ;;  %v986_v19 = vmax.f32 %v888_v14, 0.0 }
 0x28c   : > { %v985_v17 = vmax.f32 %v883_v16, 0.0  ;;  %v2046_v18 = vpop.f32.mrb[16].mxu1 }
 0x28d   : > { %v898_v40 = vadd.f32 %v2046_v18, %v3043_v33  ;;  %v892_v20 = vpop.f32.mrb[17].mxu1 }
 0x28e   : > { %v893_v21 = vadd.f32 %v3043_v33, %v892_v20  ;;  %2121 = vmatprep.mubr.f32.mxu0 %v985_v17 }
 0x28f   : > { %2122 = vmatmul.mubr.f32.gmra.mrb[46].mxu0 %v986_v19  ;;  %v988_v24 = vmax.f32 %v898_v40, 0.0 }
 0x290   : > { %v987_v22 = vmax.f32 %v893_v21, 0.0  ;;  %v2049_v23 = vpop.f32.mrb[18].mxu1 }
 0x291   : > { %v908_v25 = vadd.f32 %v2049_v23, %v3043_v33  ;;  %v902_v26 = vpop.f32.mrb[19].mxu1 }
 0x292   : > { %v903_v27 = vadd.f32 %v3043_v33, %v902_v26  ;;  %2124 = vmatprep.mubr.f32.mxu0 %v987_v22 }
 0x293   : > { %2125 = vmatmul.mubr.f32.gmra.mrb[48].mxu0 %v988_v24  ;;  %v990_v30 = vmax.f32 %v908_v25, 0.0 }
 0x294   : > { %v989_v28 = vmax.f32 %v903_v27, 0.0  ;;  %v2052_v29 = vpop.f32.mrb[20].mxu1 }
 0x295   : > { %v918_v31 = vadd.f32 %v2052_v29, %v3043_v33  ;;  %v912_v32 = vpop.f32.mrb[21].mxu1 }
 0x296   : > { %v913_v34 = vadd.f32 %v3043_v33, %v912_v32  ;;  %2127 = vmatprep.mubr.f32.mxu0 %v989_v28 }
 0x297   : > { %2128 = vmatmul.mubr.f32.gmra.mrb[50].mxu0 %v990_v30  ;;  %v992_v37 = vmax.f32 %v918_v31, 0.0 }
 0x298   : > { %v991_v35 = vmax.f32 %v913_v34, 0.0  ;;  %v2055_v36 = vpop.f32.mrb[22].mxu1 }
 0x299   : > { %v928_v38 = vadd.f32 %v2055_v36, %v3043_v33  ;;  %v922_v39 = vpop.f32.mrb[23].mxu1 }
 0x29a   : > { %v923_v41 = vadd.f32 %v3043_v33, %v922_v39  ;;  %2130 = vmatprep.mubr.f32.mxu0 %v991_v35 }
 0x29b   : > { %2131 = vmatmul.mubr.f32.gmra.mrb[52].mxu0 %v992_v37  ;;  %v994_v44 = vmax.f32 %v928_v38, 0.0 }
 0x29c   : > { %v993_v42 = vmax.f32 %v923_v41, 0.0  ;;  %v2058_v43 = vpop.f32.mrb[24].mxu1 }
 0x29d   : > { %v938_v45 = vadd.f32 %v2058_v43, %v3043_v33  ;;  %v932_v46 = vpop.f32.mrb[25].mxu1 }
 0x29e   : > { %v933_v47 = vadd.f32 %v3043_v33, %v932_v46  ;;  %2133 = vmatprep.mubr.f32.mxu0 %v993_v42 }
 0x29f   : > { %2134 = vmatmul.mubr.f32.gmra.mrb[54].mxu0 %v994_v44  ;;  %v996_v50 = vmax.f32 %v938_v45, 0.0 }
 0x2a0   : > { %v995_v48 = vmax.f32 %v933_v47, 0.0  ;;  %v2061_v49 = vpop.f32.mrb[26].mxu1 }
 0x2a1   : > { %v948_v51 = vadd.f32 %v2061_v49, %v3043_v33  ;;  %v942_v52 = vpop.f32.mrb[27].mxu1 }
 0x2a2   : > { %v943_v53 = vadd.f32 %v3043_v33, %v942_v52  ;;  %2136 = vmatprep.mubr.f32.mxu0 %v995_v48 }
 0x2a3   : > { %2137 = vmatmul.mubr.f32.gmra.mrb[56].mxu0 %v996_v50  ;;  %v998_v56 = vmax.f32 %v948_v51, 0.0 }
 0x2a4   : > { %v997_v54 = vmax.f32 %v943_v53, 0.0  ;;  %v2064_v55 = vpop.f32.mrb[28].mxu1 }
 0x2a5   : > { %v958_v57 = vadd.f32 %v2064_v55, %v3043_v33  ;;  %v952_v58 = vpop.f32.mrb[29].mxu1 }
 0x2a6   : > { %v953_v59 = vadd.f32 %v3043_v33, %v952_v58  ;;  %2139 = vmatprep.mubr.f32.mxu0 %v997_v54 }
 0x2a7   : > { %2140 = vmatmul.mubr.f32.gmra.mrb[58].mxu0 %v998_v56  ;;  %v1000_v62 = vmax.f32 %v958_v57, 0.0 }
 0x2a8   : > { %v999_v60 = vmax.f32 %v953_v59, 0.0  ;;  %v2067_v61 = vpop.f32.mrb[30].mxu1 }
 0x2a9   : > { %v968_v63 = vadd.f32 %v2067_v61, %v3043_v33  ;;  %v962_v0 = vpop.f32.mrb[31].mxu1 }
 0x2aa   : > { %v963_v1 = vadd.f32 %v3043_v33, %v962_v0  ;;  %2142 = vmatprep.mubr.f32.mxu0 %v999_v60 }
 0x2ab   : > { %2143 = vmatmul.mubr.f32.gmra.mrb[60].mxu0 %v1000_v62  ;;  %v1002_v3 = vmax.f32 %v968_v63, 0.0 }
 0x2ac   : > { %v1001_v2 = vmax.f32 %v963_v1, 0.0 }
 0x2ae   : > { %2145 = vmatprep.mubr.f32.mxu0 %v1001_v2 }
 0x2af   : > { %2146 = vmatmul.mubr.f32.gmra.mrb[62].mxu0 %v1002_v3 }
 0x346   : > { %v2102_v5 = vpop.f32.mrb[32].mxu0 }
 0x347   : > { %v1098_v6 = vadd.f32 %v2102_v5, %v3080_v4  ;;  %v1092_v7 = vpop.f32.mrb[33].mxu0 }
 0x348   : > { %v1093_v8 = vadd.f32 %v3080_v4, %v1092_v7 }
 0x349   : > { %v1252_v33 = vmax.f32 %v1098_v6, 0.0 }
 0x34a   : > { %v1251_v9 = vmax.f32 %v1093_v8, 0.0  ;;  %v2105_v10 = vpop.f32.mrb[34].mxu0 }
 0x34b   : > { %v1108_v11 = vadd.f32 %v2105_v10, %v3080_v4  ;;  %v1102_v12 = vpop.f32.mrb[35].mxu0 }
 0x34c   : > { %v1103_v13 = vadd.f32 %v3080_v4, %v1102_v12  ;;  %2180 = vmatprep.mubr.f32.mxu1 %v1251_v9 }
 0x34d   : > { %2181 = vmatmul.mubr.f32.vlgmr.msra.gmra.mrb[32].mxu1 %v1252_v33  ;;  %v1254_v16 = vmax.f32 %v1108_v11, 0.0 }
 0x34e   : > { %v1253_v14 = vmax.f32 %v1103_v13, 0.0  ;;  %v2108_v15 = vpop.f32.mrb[36].mxu0 }
 0x34f   : > { %v1118_v17 = vadd.f32 %v2108_v15, %v3080_v4  ;;  %v1112_v18 = vpop.f32.mrb[37].mxu0 }
 0x350   : > { %v1113_v19 = vadd.f32 %v3080_v4, %v1112_v18  ;;  %2183 = vmatprep.mubr.f32.mxu1 %v1253_v14 }
 0x351   : > { %2184 = vmatmul.mubr.f32.gmra.mrb[34].mxu1 %v1254_v16  ;;  %v1256_v21 = vmax.f32 %v1118_v17, 0.0 }
 0x352   : > { %v1255_v40 = vmax.f32 %v1113_v19, 0.0  ;;  %v2111_v20 = vpop.f32.mrb[38].mxu0 }
 0x353   : > { %v1128_v22 = vadd.f32 %v2111_v20, %v3080_v4  ;;  %v1122_v23 = vpop.f32.mrb[39].mxu0 }
 0x354   : > { %v1123_v24 = vadd.f32 %v3080_v4, %v1122_v23  ;;  %2186 = vmatprep.mubr.f32.mxu1 %v1255_v40 }
 0x355   : > { %2187 = vmatmul.mubr.f32.gmra.mrb[36].mxu1 %v1256_v21  ;;  %v1258_v27 = vmax.f32 %v1128_v22, 0.0 }
 0x356   : > { %v1257_v25 = vmax.f32 %v1123_v24, 0.0  ;;  %v2114_v26 = vpop.f32.mrb[40].mxu0 }
 0x357   : > { %v1138_v28 = vadd.f32 %v2114_v26, %v3080_v4  ;;  %v1132_v29 = vpop.f32.mrb[41].mxu0 }
 0x358   : > { %v1133_v30 = vadd.f32 %v3080_v4, %v1132_v29  ;;  %2189 = vmatprep.mubr.f32.mxu1 %v1257_v25 }
 0x359   : > { %2190 = vmatmul.mubr.f32.gmra.mrb[38].mxu1 %v1258_v27  ;;  %v1260_v34 = vmax.f32 %v1138_v28, 0.0 }
 0x35a   : > { %v1259_v31 = vmax.f32 %v1133_v30, 0.0  ;;  %v2117_v32 = vpop.f32.mrb[42].mxu0 }
 0x35b   : > { %v1148_v35 = vadd.f32 %v2117_v32, %v3080_v4  ;;  %v1142_v36 = vpop.f32.mrb[43].mxu0 }
 0x35c   : > { %v1143_v37 = vadd.f32 %v3080_v4, %v1142_v36  ;;  %2192 = vmatprep.mubr.f32.mxu1 %v1259_v31 }
 0x35d   : > { %2193 = vmatmul.mubr.f32.gmra.mrb[40].mxu1 %v1260_v34  ;;  %v1262_v41 = vmax.f32 %v1148_v35, 0.0 }
 0x35e   : > { %v1261_v38 = vmax.f32 %v1143_v37, 0.0  ;;  %v2120_v39 = vpop.f32.mrb[44].mxu0  ;;  %v3117_v37 = vld [vmem:[%s3246_s8] ss:$0 sm:$0xff] }
 0x35f   : > { %v1158_v42 = vadd.f32 %v2120_v39, %v3080_v4  ;;  %v1152_v43 = vpop.f32.mrb[45].mxu0 }
 0x360   : > { %v1153_v44 = vadd.f32 %v3080_v4, %v1152_v43  ;;  %2195 = vmatprep.mubr.f32.mxu1 %v1261_v38 }
 0x361   : > { %2196 = vmatmul.mubr.f32.gmra.mrb[42].mxu1 %v1262_v41  ;;  %v1264_v47 = vmax.f32 %v1158_v42, 0.0 }
 0x362   : > { %v1263_v45 = vmax.f32 %v1153_v44, 0.0  ;;  %v2123_v46 = vpop.f32.mrb[46].mxu0 }
 0x363   : > { %v1168_v48 = vadd.f32 %v2123_v46, %v3080_v4  ;;  %v1162_v49 = vpop.f32.mrb[47].mxu0 }
 0x364   : > { %v1163_v50 = vadd.f32 %v3080_v4, %v1162_v49  ;;  %2198 = vmatprep.mubr.f32.mxu1 %v1263_v45 }
 0x365   : > { %2199 = vmatmul.mubr.f32.gmra.mrb[44].mxu1 %v1264_v47  ;;  %v1266_v53 = vmax.f32 %v1168_v48, 0.0 }
 0x366   : > { %v1265_v51 = vmax.f32 %v1163_v50, 0.0  ;;  %v2126_v52 = vpop.f32.mrb[48].mxu0 }
 0x367   : > { %v1178_v54 = vadd.f32 %v2126_v52, %v3080_v4  ;;  %v1172_v55 = vpop.f32.mrb[49].mxu0 }
 0x368   : > { %v1173_v56 = vadd.f32 %v3080_v4, %v1172_v55  ;;  %2201 = vmatprep.mubr.f32.mxu1 %v1265_v51 }
 0x369   : > { %2202 = vmatmul.mubr.f32.gmra.mrb[46].mxu1 %v1266_v53  ;;  %v1268_v59 = vmax.f32 %v1178_v54, 0.0 }
 0x36a   : > { %v1267_v57 = vmax.f32 %v1173_v56, 0.0  ;;  %v2129_v58 = vpop.f32.mrb[50].mxu0 }
 0x36b   : > { %v1188_v60 = vadd.f32 %v2129_v58, %v3080_v4  ;;  %v1182_v61 = vpop.f32.mrb[51].mxu0 }
 0x36c   : > { %v1183_v62 = vadd.f32 %v3080_v4, %v1182_v61  ;;  %2204 = vmatprep.mubr.f32.mxu1 %v1267_v57 }
 0x36d   : > { %2205 = vmatmul.mubr.f32.gmra.mrb[48].mxu1 %v1268_v59  ;;  %v1270_v1 = vmax.f32 %v1188_v60, 0.0 }
 0x36e   : > { %v1269_v63 = vmax.f32 %v1183_v62, 0.0  ;;  %v2132_v0 = vpop.f32.mrb[52].mxu0 }
 0x36f   : > { %v1198_v2 = vadd.f32 %v2132_v0, %v3080_v4  ;;  %v1192_v3 = vpop.f32.mrb[53].mxu0 }
 0x370   : > { %v1193_v5 = vadd.f32 %v3080_v4, %v1192_v3  ;;  %2207 = vmatprep.mubr.f32.mxu1 %v1269_v63 }
 0x371   : > { %2208 = vmatmul.mubr.f32.gmra.mrb[50].mxu1 %v1270_v1  ;;  %v1272_v8 = vmax.f32 %v1198_v2, 0.0 }
 0x372   : > { %v1271_v6 = vmax.f32 %v1193_v5, 0.0  ;;  %v2135_v7 = vpop.f32.mrb[54].mxu0 }
 0x373   : > { %v1208_v9 = vadd.f32 %v2135_v7, %v3080_v4  ;;  %v1202_v10 = vpop.f32.mrb[55].mxu0 }
 0x374   : > { %v1203_v33 = vadd.f32 %v3080_v4, %v1202_v10  ;;  %2210 = vmatprep.mubr.f32.mxu1 %v1271_v6 }
 0x375   : > { %2211 = vmatmul.mubr.f32.gmra.mrb[52].mxu1 %v1272_v8  ;;  %v1274_v13 = vmax.f32 %v1208_v9, 0.0 }
 0x376   : > { %v1273_v11 = vmax.f32 %v1203_v33, 0.0  ;;  %v2138_v12 = vpop.f32.mrb[56].mxu0 }
 0x377   : > { %v1218_v14 = vadd.f32 %v2138_v12, %v3080_v4  ;;  %v1212_v15 = vpop.f32.mrb[57].mxu0 }
 0x378   : > { %v1213_v16 = vadd.f32 %v3080_v4, %v1212_v15  ;;  %2213 = vmatprep.mubr.f32.mxu1 %v1273_v11 }
 0x379   : > { %2214 = vmatmul.mubr.f32.gmra.mrb[54].mxu1 %v1274_v13  ;;  %v1276_v19 = vmax.f32 %v1218_v14, 0.0 }
 0x37a   : > { %v1275_v17 = vmax.f32 %v1213_v16, 0.0  ;;  %v2141_v18 = vpop.f32.mrb[58].mxu0 }
 0x37b   : > { %v1228_v40 = vadd.f32 %v2141_v18, %v3080_v4  ;;  %v1222_v20 = vpop.f32.mrb[59].mxu0 }
 0x37c   : > { %v1223_v21 = vadd.f32 %v3080_v4, %v1222_v20  ;;  %2216 = vmatprep.mubr.f32.mxu1 %v1275_v17 }
 0x37d   : > { %2217 = vmatmul.mubr.f32.gmra.mrb[56].mxu1 %v1276_v19  ;;  %v1278_v24 = vmax.f32 %v1228_v40, 0.0 }
 0x37e   : > { %v1277_v22 = vmax.f32 %v1223_v21, 0.0  ;;  %v2144_v23 = vpop.f32.mrb[60].mxu0 }
 0x37f   : > { %v1238_v25 = vadd.f32 %v2144_v23, %v3080_v4  ;;  %v1232_v26 = vpop.f32.mrb[61].mxu0 }
 0x380   : > { %v1233_v27 = vadd.f32 %v3080_v4, %v1232_v26  ;;  %2219 = vmatprep.mubr.f32.mxu1 %v1277_v22 }
 0x381   : > { %2220 = vmatmul.mubr.f32.gmra.mrb[58].mxu1 %v1278_v24  ;;  %v1280_v30 = vmax.f32 %v1238_v25, 0.0 }
 0x382   : > { %v1279_v28 = vmax.f32 %v1233_v27, 0.0  ;;  %v2147_v29 = vpop.f32.mrb[62].mxu0 }
 0x383   : > { %v1248_v31 = vadd.f32 %v2147_v29, %v3080_v4  ;;  %v1242_v32 = vpop.f32.mrb[63].mxu0 }
 0x384   : > { %v1243_v34 = vadd.f32 %v3080_v4, %v1242_v32  ;;  %2222 = vmatprep.mubr.f32.mxu1 %v1279_v28 }
 0x385   : > { %2223 = vmatmul.mubr.f32.gmra.mrb[60].mxu1 %v1280_v30  ;;  %v1282_v36 = vmax.f32 %v1248_v31, 0.0 }
 0x386   : > { %v1281_v35 = vmax.f32 %v1243_v34, 0.0 }
 0x388   : > { %2225 = vmatprep.mubr.f32.mxu1 %v1281_v35 }
 0x389   : > { %2226 = vmatmul.mubr.f32.gmra.mrb[62].mxu1 %v1282_v36 }
 0x420   : > { %v2182_v38 = vpop.f32.mrb[32].mxu1 }
 0x421   : > { %v1378_v39 = vadd.f32 %v2182_v38, %v3117_v37  ;;  %v1372_v41 = vpop.f32.mrb[33].mxu1 }
 0x422   : > { %v1373_v42 = vadd.f32 %v3117_v37, %v1372_v41 }
 0x423   : > { %1532 = vst [vmem:[%s3123_s18 + $0x8] sm:$0xff] %v1378_v39 }
 0x424   : > { %1531 = vst [vmem:[%s3123_s18] sm:$0xff] %v1373_v42  ;;  %v2185_v4 = vpop.f32.mrb[34].mxu1 }
 0x425   : > { %v1388_v43 = vadd.f32 %v2185_v4, %v3117_v37  ;;  %v1382_v44 = vpop.f32.mrb[35].mxu1 }
 0x426   : > { %v1383_v45 = vadd.f32 %v3117_v37, %v1382_v44 }
 0x427   : > { %1534 = vst [vmem:[%s3123_s18 + $0x18] sm:$0xff] %v1388_v43 }
 0x428   : > { %1533 = vst [vmem:[%s3123_s18 + $0x10] sm:$0xff] %v1383_v45  ;;  %v2188_v46 = vpop.f32.mrb[36].mxu1 }
 0x429   : > { %v1398_v47 = vadd.f32 %v2188_v46, %v3117_v37  ;;  %v1392_v48 = vpop.f32.mrb[37].mxu1 }
 0x42a   : > { %v1393_v49 = vadd.f32 %v3117_v37, %v1392_v48 }
 0x42b   : > { %1536 = vst [vmem:[%s3123_s18 + $0x28] sm:$0xff] %v1398_v47 }
 0x42c   : > { %1535 = vst [vmem:[%s3123_s18 + $0x20] sm:$0xff] %v1393_v49  ;;  %v2191_v50 = vpop.f32.mrb[38].mxu1 }
 0x42d   : > { %v1408_v51 = vadd.f32 %v2191_v50, %v3117_v37  ;;  %v1402_v52 = vpop.f32.mrb[39].mxu1 }
 0x42e   : > { %v1403_v53 = vadd.f32 %v3117_v37, %v1402_v52 }
 0x42f   : > { %1538 = vst [vmem:[%s3123_s18 + $0x38] sm:$0xff] %v1408_v51 }
 0x430   : > { %1537 = vst [vmem:[%s3123_s18 + $0x30] sm:$0xff] %v1403_v53  ;;  %v2194_v54 = vpop.f32.mrb[40].mxu1 }
 0x431   : > { %v1418_v55 = vadd.f32 %v2194_v54, %v3117_v37  ;;  %v1412_v56 = vpop.f32.mrb[41].mxu1 }
 0x432   : > { %v1413_v57 = vadd.f32 %v3117_v37, %v1412_v56 }
 0x433   : > { %1540 = vst [vmem:[%s3123_s18 + $0x48] sm:$0xff] %v1418_v55 }
 0x434   : > { %1539 = vst [vmem:[%s3123_s18 + $0x40] sm:$0xff] %v1413_v57  ;;  %v2197_v58 = vpop.f32.mrb[42].mxu1 }
 0x435   : > { %v1428_v59 = vadd.f32 %v2197_v58, %v3117_v37  ;;  %v1422_v60 = vpop.f32.mrb[43].mxu1 }
 0x436   : > { %v1423_v61 = vadd.f32 %v3117_v37, %v1422_v60 }
 0x437   : > { %1542 = vst [vmem:[%s3123_s18 + $0x58] sm:$0xff] %v1428_v59 }
 0x438   : > { %1541 = vst [vmem:[%s3123_s18 + $0x50] sm:$0xff] %v1423_v61  ;;  %v2200_v62 = vpop.f32.mrb[44].mxu1 }
 0x439   : > { %v1438_v63 = vadd.f32 %v2200_v62, %v3117_v37  ;;  %v1432_v0 = vpop.f32.mrb[45].mxu1 }
 0x43a   : > { %v1433_v1 = vadd.f32 %v3117_v37, %v1432_v0 }
 0x43b   : > { %1544 = vst [vmem:[%s3123_s18 + $0x68] sm:$0xff] %v1438_v63 }
 0x43c   : > { %1543 = vst [vmem:[%s3123_s18 + $0x60] sm:$0xff] %v1433_v1  ;;  %v2203_v2 = vpop.f32.mrb[46].mxu1 }
 0x43d   : > { %v1448_v3 = vadd.f32 %v2203_v2, %v3117_v37  ;;  %v1442_v5 = vpop.f32.mrb[47].mxu1 }
 0x43e   : > { %v1443_v6 = vadd.f32 %v3117_v37, %v1442_v5 }
 0x43f   : > { %1546 = vst [vmem:[%s3123_s18 + $0x78] sm:$0xff] %v1448_v3 }
 0x440   : > { %1545 = vst [vmem:[%s3123_s18 + $0x70] sm:$0xff] %v1443_v6  ;;  %v2206_v7 = vpop.f32.mrb[48].mxu1 }
 0x441   : > { %v1458_v8 = vadd.f32 %v2206_v7, %v3117_v37  ;;  %v1452_v9 = vpop.f32.mrb[49].mxu1 }
 0x442   : > { %v1453_v10 = vadd.f32 %v3117_v37, %v1452_v9 }
 0x443   : > { %1548 = vst [vmem:[%s3123_s18 + $0x88] sm:$0xff] %v1458_v8 }
 0x444   : > { %1547 = vst [vmem:[%s3123_s18 + $0x80] sm:$0xff] %v1453_v10  ;;  %v2209_v33 = vpop.f32.mrb[50].mxu1 }
 0x445   : > { %v1468_v11 = vadd.f32 %v2209_v33, %v3117_v37  ;;  %v1462_v12 = vpop.f32.mrb[51].mxu1 }
 0x446   : > { %v1463_v13 = vadd.f32 %v3117_v37, %v1462_v12 }
 0x447   : > { %1550 = vst [vmem:[%s3123_s18 + $0x98] sm:$0xff] %v1468_v11 }
 0x448   : > { %1549 = vst [vmem:[%s3123_s18 + $0x90] sm:$0xff] %v1463_v13  ;;  %v2212_v14 = vpop.f32.mrb[52].mxu1 }
 0x449   : > { %v1478_v15 = vadd.f32 %v2212_v14, %v3117_v37  ;;  %v1472_v16 = vpop.f32.mrb[53].mxu1 }
 0x44a   : > { %v1473_v17 = vadd.f32 %v3117_v37, %v1472_v16 }
 0x44b   : > { %1552 = vst [vmem:[%s3123_s18 + $0xa8] sm:$0xff] %v1478_v15 }
 0x44c   : > { %1551 = vst [vmem:[%s3123_s18 + $0xa0] sm:$0xff] %v1473_v17  ;;  %v2215_v18 = vpop.f32.mrb[54].mxu1 }
 0x44d   : > { %v1488_v19 = vadd.f32 %v2215_v18, %v3117_v37  ;;  %v1482_v40 = vpop.f32.mrb[55].mxu1 }
 0x44e   : > { %v1483_v20 = vadd.f32 %v3117_v37, %v1482_v40 }
 0x44f   : > { %1554 = vst [vmem:[%s3123_s18 + $0xb8] sm:$0xff] %v1488_v19 }
 0x450   : > { %1553 = vst [vmem:[%s3123_s18 + $0xb0] sm:$0xff] %v1483_v20  ;;  %v2218_v21 = vpop.f32.mrb[56].mxu1 }
 0x451   : > { %v1498_v22 = vadd.f32 %v2218_v21, %v3117_v37  ;;  %v1492_v23 = vpop.f32.mrb[57].mxu1 }
 0x452   : > { %v1493_v24 = vadd.f32 %v3117_v37, %v1492_v23 }
 0x453   : > { %1556 = vst [vmem:[%s3123_s18 + $0xc8] sm:$0xff] %v1498_v22 }
 0x454   : > { %1555 = vst [vmem:[%s3123_s18 + $0xc0] sm:$0xff] %v1493_v24  ;;  %v2221_v25 = vpop.f32.mrb[58].mxu1 }
 0x455   : > { %v1508_v26 = vadd.f32 %v2221_v25, %v3117_v37  ;;  %v1502_v27 = vpop.f32.mrb[59].mxu1 }
 0x456   : > { %v1503_v28 = vadd.f32 %v3117_v37, %v1502_v27 }
 0x457   : > { %1558 = vst [vmem:[%s3123_s18 + $0xd8] sm:$0xff] %v1508_v26 }
 0x458   : > { %1557 = vst [vmem:[%s3123_s18 + $0xd0] sm:$0xff] %v1503_v28  ;;  %v2224_v29 = vpop.f32.mrb[60].mxu1 }
 0x459   : > { %v1518_v30 = vadd.f32 %v2224_v29, %v3117_v37  ;;  %v1512_v31 = vpop.f32.mrb[61].mxu1 }
 0x45a   : > { %v1513_v32 = vadd.f32 %v3117_v37, %v1512_v31 }
 0x45b   : > { %1560 = vst [vmem:[%s3123_s18 + $0xe8] sm:$0xff] %v1518_v30 }
 0x45c   : > { %1559 = vst [vmem:[%s3123_s18 + $0xe0] sm:$0xff] %v1513_v32  ;;  %v2227_v34 = vpop.f32.mrb[62].mxu1 }
 0x45d   : > { %v1528_v35 = vadd.f32 %v2227_v34, %v3117_v37  ;;  %v1522_v36 = vpop.f32.mrb[63].mxu1 }
 0x45e   : > { %v1523_v38 = vadd.f32 %v3117_v37, %v1522_v36 }
 0x45f   : > { %1562 = vst [vmem:[%s3123_s18 + $0xf8] sm:$0xff] %v1528_v35 }
 0x460   : > { %1561 = vst [vmem:[%s3123_s18 + $0xf0] sm:$0xff] %v1523_v38 }
 0x461   : > { %2602 = shalt.err (!%p2599_p13)
}
 0x462   : > { %s2603_s22 = scalar_lea.hbm %s3189_s15, 4096  ;;  %s2607_s18 = scalar_lea.hbm %s3271_s9, 8192 }
 0x463   : > { %p2604_p9 = scmp.ne.s32.totalorder %s3189_s15, %s2603_s22  ;;  %p2608_p4 = scmp.lt.u32.totalorder %s3189_s15, %s3271_s9 }
 0x464   : > { %p2609_p8 = scmp.lt.u32.totalorder %s2607_s18, %s2603_s22  ;;  %p2611_p3 = scmp.lt.u32.totalorder %s2603_s22, %s3189_s15 }
 0x465   : > { %p2605_p0 = pnand %p2604_p9, %p2896_p10 }
 0x466   : > { %p2610_p6 = por %p2609_p8, %p2608_p4 }
 0x467   : > { %p2606_p11 = pneg %p2605_p0 }
 0x468   : > { %p2612_p5 = por %p2611_p3, %p2610_p6 }
 0x46a   : > { %p2613_p7 = pnand %p2612_p5, %p2606_p11 }
 0x46c   : > { %2616 = shalt.err (!%p2613_p7)
}
 0x46d   : > { %s2673_s24 = smov 128   ;;  %s2674_s17 = smov 8  }
 0x46e   : > { %2374 = dma.vmem_to_hbm [thread:$0]  (%p2896_p10), %s3191_s23, 4096, %s3189_s15, %s1564_s13, %s2673_s24, %s2673_s24, %s2674_s17  }
 0x46f PF: > { %s3272_s25 = sld [smem:[#allocation16_spill]]  ;;  %s3273_s26 = sld [smem:[#allocation17_spill]] }
 0x470   : > { %p3275_p1 = scmp.ge.s32.totalorder %s2663_s12, 2 }
 0x475   : > { %s1592_s19 = sand.u32 1, %s3272_s25   ;;  %p3274_p12 = scmp.ne.s32.totalorder %s3273_s26, 0 }
 0x476   : > { %s1593_s22 = scalar_lea.sflag [#allocation4], %s1592_s19 }
 0x477   : > { %p2394_p2 = pnand %p3275_p1, %p3274_p12 }
 0x479   : > { %2646 = dma.done.wait (!%p2394_p2), %s1593_s22, 4096  }
 0x47a   : > { %2648 = vsyncadd (!%p2394_p2), %s1593_s22, 4294963200  ;;  %p24_p13 = scmp.ge.s32.totalorder %s2886_s14, 4   ;;  %s3276_s30 = smov %s2655_s10 }
 0x47b   : > { %s3277_s10 = smov %s2659_s11  ;;  %s3278_s11 = smov %s2902_s28 }
 0x47c   : > { %s3279_s12 = smov %s2886_s14  ;;  %26 = sbr.rel (!%p24_p13) target bundleno = 9 (0x9), region = 117 }
 0x483   :  { %1598 = vsyncpa [#allocation3], 1 }
 0x484   :  { %1600 = vsyncpa [#allocation3 + $0x1], 1 }
 0x485   :  { %1601 = vsyncpa [#allocation6], 1 }
 0x486   :  { %1602 = vsyncpa [#allocation9], 1 }
 0x487   :  { %1603 = vsyncpa [#allocation4], 1 }
 0x488   :  { %1605 = vsyncpa [#allocation4 + $0x1], 1 }

// kernel: tpu_custom_call.1
= control target key start
LH: loop header
LB: loop body
LE: loop exit
PB: predicated region body
PF: predicated region fallthrough
CT: control target
= control target key end

     0   :  { %s3238_s0 = inlined_call_operand.hbm [shape: f32[512,128], index: 0, kind: input, shape index: {}]   ;;  %s3239_s1 = inlined_call_operand.hbm [shape: f32[128,128], index: 1, kind: input, shape index: {}]   ;;  %s3240_s2 = inlined_call_operand.vmem [shape: f32[1,128], index: 2, kind: input, shape index: {}]   ;;  %s3241_s3 = inlined_call_operand.hbm [shape: f32[128,128], index: 3, kind: input, shape index: {}]   ;;  %s3242_s4 = inlined_call_operand.vmem [shape: f32[1,128], index: 4, kind: input, shape index: {}]   ;;  %s3243_s5 = inlined_call_operand.hbm [shape: f32[128,128], index: 5, kind: input, shape index: {}]   ;;  %s3244_s6 = inlined_call_operand.vmem [shape: f32[1,128], index: 6, kind: input, shape index: {}]   ;;  %s3245_s7 = inlined_call_operand.hbm [shape: f32[128,128], index: 7, kind: input, shape index: {}]   ;;  %s3246_s8 = inlined_call_operand.vmem [shape: f32[1,128], index: 8, kind: input, shape index: {}]   ;;  %s3247_s9 = inlined_call_operand.hbm [shape: f32[512,128], index: 9, kind: output, shape index: {}]  }
   0x1   :  { %3254 = sst [smem:[#allocation18_spill]] %s3247_s9 }
   0x2   :  { %14 = vsyncpa [#allocation3], 0 }
   0x3   :  { %16 = vsyncpa [#allocation3 + $0x1], 0 }
   0x4   :  { %17 = vsyncpa [#allocation6], 0 }
   0x5   :  { %18 = vsyncpa [#allocation9], 0 }
   0x6   :  { %19 = vsyncpa [#allocation4], 0 }
   0x7   :  { %21 = vsyncpa [#allocation4 + $0x1], 0  ;;  %s2725_s30 = smov 0   ;;  %s2727_s10 = smov 0  }
   0x8   :  { %s2729_s11 = smov 0   ;;  %s2731_s12 = smov 0  }
   0x9 LB: > { %3255 = sst [smem:[#allocation16_spill]] %s2651_s30  ;;  %s2746_s13 = sadd.s32 4294967295, %s2663_s12   ;;  %s2663_s12 = sphi %s2731_s12, %s3279_s12   ;;  %s2659_s11 = sphi %s2729_s11, %s3278_s11   ;;  %s2655_s10 = sphi %s2727_s10, %s3277_s10   ;;  %s2651_s30 = sphi %s2725_s30, %s3276_s30  }
   0xa   : > { %s1688_s14 = sadd.s32 4294967294, %s2663_s12   ;;  %p47_p0 = scmp.ne.s32.totalorder %s2655_s10, %s2651_s30 }
   0xb   : > { %p3248_p1 = scmp.eq.s32.totalorder %s2746_s13, 0  ;;  %p245_p3 = scmp.eq.s32.totalorder %s1688_s14, 1 }
   0xc   : > { %p1689_p5 = scmp.ge.s32.totalorder %s2663_s12, 1  ;;  %p252_p7 = scmp.lt.s32.totalorder %s2663_s12, 3 }
   0xd   : > { %p2755_p4 = por %p3248_p1, %p47_p0  ;;  %p2760_p6 = por %p245_p3, %p47_p0 }
   0xe   : > { %p2765_p8 = pnand %p1689_p5, %p252_p7  ;;  %s2665_s18 = smov [#allocation5]  }
   0xf   : > { %s3256_s15 = scalar_select %p2755_p4, 1, 0 }
  0x10   : > { %s3257_s16 = scalar_select %p2760_p6, 1, 0 }
  0x11   : > { %s3259_s17 = scalar_select %p2765_p8, 1, 0 }
  0x12   : > { %3258 = sst [smem:[#allocation17_spill]] %s3257_s16  ;;  %s264_s19 = sshll.u32 %s2665_s18, 4  ;;  %s2769_s19 = int_to_ptr.vmem [resolvable:$true] %s264_s19 }
  0x13   : > { %p2376_p9 = pneg %p2765_p8  ;;  %s2666_s21 = smov [#allocation8]  }
  0x14   : > { %s296_s22 = sshll.u32 %s2666_s21, 4  ;;  %s2667_s23 = smov [#allocation7]   ;;  %s2780_s22 = int_to_ptr.vmem [resolvable:$true] %s296_s22 }
  0x15   : > { %p2776_p11 = pnand %p2376_p9, %p3248_p1  ;;  %s2782_s24 = sshll.u32 %s2667_s23, 4  ;;  %s281_s24 = int_to_ptr.vmem [resolvable:$true] %s2782_s24 }
  0x16   : > { %s2447_s27 = scalar_lea.hbm %s3239_s1, 2048 }
  0x17   : > { %p2448_p12 = scmp.ne.s32.totalorder %s3239_s1, %s2447_s27  ;;  %p2792_p13 = pneg %p2776_p11 }
  0x18   : > { %p2454_p5 = scmp.lt.u32.totalorder %s2447_s27, %s3239_s1 }
  0x19   : > { %p2450_p0 = pnand %p2792_p13, %p2448_p12 }
  0x1b   : > { %p2451_p3 = pneg %p2450_p0 }
  0x1d   : > { %p2456_p7 = pnand %p2454_p5, %p2451_p3 }
  0x1f   : > { %2459 = shalt.err (!%p2456_p7)
}
  0x20   : > { %s2460_s23 = scalar_lea.vmem %s2769_s19, 2048  ;;  %p2468_p2 = scmp.lt.s32.totalorder %s2769_s19, %s2769_s19 }
  0x21   : > { %p2461_p9 = scmp.ne.s32.totalorder %s2769_s19, %s2460_s23  ;;  %p2469_p6 = scmp.lt.s32.totalorder %s2460_s23, %s2460_s23 }
  0x23   : > { %p2463_p10 = pnand %p2461_p9, %p2792_p13  ;;  %p2470_p12 = por %p2469_p6, %p2468_p2 }
  0x25   : > { %p2464_p1 = pneg %p2463_p10 }
  0x27   : > { %p2471_p0 = pnand %p2470_p12, %p2464_p1 }
  0x29   : > { %2474 = shalt.err (!%p2471_p0)
}
  0x2a   : > { %s2668_s25 = smov 128   ;;  %s2669_s26 = smov 8  }
  0x2b   : > { %2379 = dma.hbm_to_vmem [thread:$0]  (!%p2776_p11), %s3239_s1, 2048, %s2769_s19, [#allocation6], %s2668_s25, %s2668_s25, %s2669_s26  }
  0x2c   : > { %s2475_s21 = scalar_lea.hbm %s3243_s5, 2048 }
  0x2d   : > { %p2476_p1 = scmp.ne.s32.totalorder %s3243_s5, %s2475_s21  ;;  %p2482_p10 = scmp.lt.u32.totalorder %s2475_s21, %s3243_s5 }
  0x2f   : > { %p2478_p2 = pnand %p2476_p1, %p2792_p13 }
  0x31   : > { %p2479_p6 = pneg %p2478_p2 }
  0x33   : > { %p2484_p3 = pnand %p2482_p10, %p2479_p6 }
  0x35   : > { %2487 = shalt.err (!%p2484_p3)
}
  0x36   : > { %s2488_s19 = scalar_lea.vmem %s2780_s22, 2048  ;;  %p2496_p12 = scmp.lt.s32.totalorder %s2780_s22, %s2780_s22 }
  0x37   : > { %p2489_p5 = scmp.ne.s32.totalorder %s2780_s22, %s2488_s19  ;;  %p2497_p0 = scmp.lt.s32.totalorder %s2488_s19, %s2488_s19 }
  0x39   : > { %p2491_p7 = pnand %p2489_p5, %p2792_p13  ;;  %p2498_p1 = por %p2497_p0, %p2496_p12 }
  0x3b   : > { %p2492_p9 = pneg %p2491_p7 }
  0x3d   : > { %p2499_p2 = pnand %p2498_p1, %p2492_p9 }
  0x3f   : > { %2502 = shalt.err (!%p2499_p2)
}
  0x40   : > { %2385 = dma.hbm_to_vmem [thread:$0]  (!%p2776_p11), %s3243_s5, 2048, %s2780_s22, [#allocation9], %s2668_s25, %s2668_s25, %s2669_s26  }
  0x41   : > { %s2503_s28 = scalar_lea.hbm %s3241_s3, 2048 }
  0x42   : > { %p2504_p6 = scmp.ne.s32.totalorder %s3241_s3, %s2503_s28  ;;  %p2510_p5 = scmp.lt.u32.totalorder %s2503_s28, %s3241_s3 }
  0x44   : > { %p2506_p10 = pnand %p2504_p6, %p2792_p13 }
  0x46   : > { %p2507_p3 = pneg %p2506_p10 }
  0x48   : > { %p2512_p7 = pnand %p2510_p5, %p2507_p3 }
  0x4a   : > { %2515 = shalt.err (!%p2512_p7)
}
  0x4b   : > { %s2516_s19 = scalar_lea.vmem %s281_s24, 2048  ;;  %p2524_p1 = scmp.lt.s32.totalorder %s281_s24, %s281_s24 }
  0x4c   : > { %p2517_p9 = scmp.ne.s32.totalorder %s281_s24, %s2516_s19  ;;  %p2525_p2 = scmp.lt.s32.totalorder %s2516_s19, %s2516_s19 }
  0x4e   : > { %p2519_p12 = pnand %p2517_p9, %p2792_p13  ;;  %p2526_p4 = por %p2525_p2, %p2524_p1 }
  0x50   : > { %p2520_p0 = pneg %p2519_p12 }
  0x52   : > { %p2527_p8 = pnand %p2526_p4, %p2520_p0 }
  0x54   : > { %2530 = shalt.err (!%p2527_p8)
}
  0x55   : > { %2382 = dma.hbm_to_vmem [thread:$0]  (!%p2776_p11), %s3241_s3, 2048, %s281_s24, [#allocation6], %s2668_s25, %s2668_s25, %s2669_s26  }
  0x56   : > { %s2670_s30 = smov [#allocation10]   ;;  %s2531_s29 = scalar_lea.hbm %s3245_s7, 2048 }
  0x57   : > { %s312_s16 = sshll.u32 %s2670_s30, 4  ;;  %p2532_p4 = scmp.ne.s32.totalorder %s3245_s7, %s2531_s29  ;;  %s313_s16 = int_to_ptr.vmem [resolvable:$true] %s312_s16 }
  0x58   : > { %p2538_p10 = scmp.lt.u32.totalorder %s2531_s29, %s3245_s7 }
  0x59   : > { %p2534_p8 = pnand %p2532_p4, %p2792_p13 }
  0x5b   : > { %p2535_p6 = pneg %p2534_p8 }
  0x5d   : > { %p2540_p3 = pnand %p2538_p10, %p2535_p6 }
  0x5f   : > { %2543 = shalt.err (!%p2540_p3)
}
  0x60   : > { %s2544_s24 = scalar_lea.vmem %s313_s16, 2048  ;;  %p2552_p12 = scmp.lt.s32.totalorder %s313_s16, %s313_s16 }
  0x61   : > { %p2545_p5 = scmp.ne.s32.totalorder %s313_s16, %s2544_s24  ;;  %p2553_p0 = scmp.lt.s32.totalorder %s2544_s24, %s2544_s24 }
  0x63   : > { %p2547_p7 = pnand %p2545_p5, %p2792_p13  ;;  %p2554_p1 = por %p2553_p0, %p2552_p12 }
  0x65   : > { %p2548_p9 = pneg %p2547_p7 }
  0x67   : > { %p2555_p2 = pnand %p2554_p1, %p2548_p9 }
  0x69   : > { %2558 = shalt.err (!%p2555_p2)
}
  0x6a   : > { %2388 = dma.hbm_to_vmem [thread:$0]  (!%p2776_p11), %s3245_s7, 2048, %s313_s16, [#allocation9], %s2668_s25, %s2668_s25, %s2669_s26  }
  0x6b   : > { %s2886_s14 = sadd.s32 1, %s2663_s12   ;;  %s34_s20 = sadd.s32 1, %s2659_s11 }
  0x6c   : > { %s31_s30 = ssub.s32 %s2663_s12, %s2886_s14  ;;  %p41_p13 = scmp.ne.s32.totalorder %s2659_s11, %s2655_s10 }
  0x6d   : > { %p32_p4 = scmp.eq.s32.totalorder %s31_s30, 0  ;;  %p42_p8 = scmp.eq.s32.totalorder %s2663_s12, 0 }
  0x6e   : > { %p3262_p6 = scmp.eq.s32.totalorder %s2746_s13, 1  ;;  %p2401_p3 = scmp.lt.s32.totalorder %s2663_s12, 2 }
  0x6f   : > { %s2902_s28 = scalar_select %p32_p4, %s2659_s11, %s34_s20  }
  0x70   : > { %p2896_p10 = por %p3262_p6, %p41_p13  ;;  %p43_p5 = por %p42_p8, %p41_p13 }
  0x71   : > { %s329_s29 = sand.u32 1, %s2659_s11   ;;  %s1714_s16 = sshll.u32 %s2663_s12, 12 }
  0x72   : > { %s1695_s18 = sshll.u32 %s329_s29, 8  ;;  %s2909_s19 = scalar_lea.hbm %s3238_s0, %s1714_s16 }
  0x73   : > { %s333_s24 = scalar_lea.vmem [#allocation2], %s1695_s18  ;;  %p2913_p11 = pnand %p2401_p3, %p43_p5 }
  0x74   : > { %s340_s22 = sshll.u32 %s333_s24, 4  ;;  %s2917_s20 = scalar_lea.sflag [#allocation3], %s329_s29  ;;  %s2911_s22 = int_to_ptr.vmem [resolvable:$true] %s340_s22 }
  0x75   : > { %s2559_s30 = scalar_lea.hbm %s2909_s19, 4096  ;;  %p2561_p9 = pneg %p2913_p11 }
  0x76   : > { %p2560_p7 = scmp.ne.s32.totalorder %s2909_s19, %s2559_s30  ;;  %s2564_s21 = scalar_lea.hbm %s3238_s0, 8192 }
  0x77   : > { %p2565_p1 = scmp.lt.u32.totalorder %s2909_s19, %s3238_s0  ;;  %p2566_p2 = scmp.lt.u32.totalorder %s2564_s21, %s2559_s30 }
  0x78   : > { %p2562_p12 = pnand %p2561_p9, %p2560_p7  ;;  %p2568_p4 = scmp.lt.u32.totalorder %s2559_s30, %s2909_s19 }
  0x79   : > { %p2567_p13 = por %p2566_p2, %p2565_p1 }
  0x7a   : > { %p2563_p0 = pneg %p2562_p12 }
  0x7b   : > { %p2569_p8 = por %p2568_p4, %p2567_p13 }
  0x7d   : > { %p2570_p6 = pnand %p2569_p8, %p2563_p0 }
  0x7f   : > { %2573 = shalt.err (!%p2570_p6)
}
  0x80   : > { %s2574_s29 = scalar_lea.vmem %s2911_s22, 4096  ;;  %s2671_s18 = smov [#allocation2]  }
  0x81   : > { %p2575_p3 = scmp.ne.s32.totalorder %s2911_s22, %s2574_s29  ;;  %s2579_s16 = sshll.u32 %s2671_s18, 4  ;;  %s2580_s16 = int_to_ptr.vmem [resolvable:$false] %s2579_s16 }
  0x82   : > { %s2581_s23 = scalar_lea.vmem %s2580_s16, 8192  ;;  %p2582_p12 = scmp.lt.s32.totalorder %s2911_s22, %s2580_s16 }
  0x83   : > { %p2577_p5 = pnand %p2575_p3, %p2561_p9  ;;  %p2583_p1 = scmp.lt.s32.totalorder %s2581_s23, %s2574_s29 }
  0x85   : > { %p2578_p7 = pneg %p2577_p5  ;;  %p2584_p2 = por %p2583_p1, %p2582_p12 }
  0x87   : > { %p2585_p13 = pnand %p2584_p2, %p2578_p7 }
  0x89   : > { %2588 = shalt.err (!%p2585_p13)
}
  0x8a   : > { %2392 = dma.hbm_to_vmem [thread:$0]  (!%p2913_p11), %s2909_s19, 4096, %s2911_s22, %s2917_s20, %s2668_s25, %s2668_s25, %s2669_s26  }
  0x8b   : > { %p3265_p9 = scmp.ne.s32.totalorder %s3259_s17, 0 }
  0x8c   : > { %s2951_s30 = sand.u32 (!%p3265_p9), 1, %s2655_s10   ;;  %p3266_p0 = scmp.ne.s32.totalorder (!%p3265_p9), %s3256_s15, 0 }
  0x8d   : > { %352 = sbr.rel (%p3265_p9) target bundleno = 1135 (0x46f), region = 56  ;;  %s1699_s21 = sshll.u32 (!%p3265_p9), %s2951_s30, 8 }
  0x8e   : > { %s355_s24 = scalar_lea.sflag (!%p3265_p9), [#allocation3], %s2951_s30  ;;  %s2957_s9 = scalar_lea.vmem (!%p3265_p9), [#allocation2], %s1699_s21 }
  0x94   : > { %2634 = dma.done.wait (%p3266_p0), %s355_s24, 4096  }
  0x95   : > { %2636 = vsyncadd (%p3266_p0), %s355_s24, 4294963200  ;;  %p3267_p11 = scmp.eq.s32.totalorder %s2746_s13, 0 }
  0x97   : > { %2638 = dma.done.wait (%p3267_p11), [#allocation6], 4096   ;;  %p3268_p4 = pmov %p3267_p11 }
  0x99   : > { %2640 = vsyncadd (%p3268_p4), [#allocation6], 4294963200  ;;  %p3269_p8 = pmov %p3268_p4 }
  0x9a   : > { %p3270_p6 = pmov %p3268_p4 }
  0x9b   : > { %2642 = dma.done.wait (%p3269_p8), [#allocation9], 4096  }
  0x9c   : > { %2644 = vsyncadd (%p3270_p6), [#allocation9], 4294963200  ;;  %v443_v0 = vld [vmem:[#allocation5] sm:$0xff]  ;;  %v444_v1 = vld [vmem:[#allocation5 + $0x8] sm:$0xff]  ;;  %s3123_s18 = scalar_lea.vmem [#allocation11], %s1699_s21  ;;  %s1715_s16 = sshll.u32 %s2746_s13, 12 }
  0x9d   : > { %v445_v2 = vld [vmem:[#allocation5 + $0x10] sm:$0xff]  ;;  %v2228_v3 = vpack.c.bf16 %v444_v1, %v443_v0  ;;  %v446_v4 = vld [vmem:[#allocation5 + $0x18] sm:$0xff]  ;;  %v447_v6 = vld [vmem:[#allocation5 + $0x20] sm:$0xff]  ;;  %s1577_s23 = sshll.u32 %s3123_s18, 4  ;;  %s1564_s13 = scalar_lea.sflag [#allocation4], %s2951_s30  ;;  %s3191_s23 = int_to_ptr.vmem [resolvable:$true] %s1577_s23 }
  0x9e   : > { %v2232_v5 = vpack.c.bf16 %v446_v4, %v445_v2  ;;  %v448_v7 = vld [vmem:[#allocation5 + $0x28] sm:$0xff]  ;;  %v411_v9 = vld [vmem:[%s2957_s9] sm:$0xff]  ;;  %v449_v10 = vld [vmem:[#allocation5 + $0x30] sm:$0xff]  ;;  %s2589_s17 = scalar_lea.vmem %s3191_s23, 4096  ;;  %s2672_s25 = smov [#allocation11]  }
  0x9f   : > { %2229 = vmatprep.subr.bf16.mxu0 %v2228_v3  ;;  %v2236_v8 = vpack.c.bf16 %v448_v7, %v447_v6  ;;  %v450_v11 = vld [vmem:[#allocation5 + $0x38] sm:$0xff]  ;;  %1940 = vmatprep.mubr.f32.mxu0 %v411_v9  ;;  %v451_v13 = vld [vmem:[#allocation5 + $0x40] sm:$0xff]  ;;  %v452_v14 = vld [vmem:[#allocation5 + $0x48] sm:$0xff]  ;;  %p2590_p3 = scmp.ne.s32.totalorder %s3191_s23, %s2589_s17  ;;  %s2593_s26 = sshll.u32 %s2672_s25, 4  ;;  %s2594_s26 = int_to_ptr.vmem [resolvable:$false] %s2593_s26 }
  0xa0   : > { %2231 = vmatpush3.bf16.msra.mxu0 %v2228_v3  ;;  %v2240_v12 = vpack.c.bf16 %v450_v11, %v449_v10  ;;  %v2244_v15 = vpack.c.bf16 %v452_v14, %v451_v13  ;;  %v453_v16 = vld [vmem:[#allocation5 + $0x50] sm:$0xff]  ;;  %v454_v17 = vld [vmem:[#allocation5 + $0x58] sm:$0xff]  ;;  %v723_v18 = vld [vmem:[#allocation7] sm:$0xff]  ;;  %s2595_s19 = scalar_lea.vmem %s2594_s26, 8192  ;;  %p2596_p12 = scmp.lt.s32.totalorder %s3191_s23, %s2594_s26 }
  0xa1   : > { %2233 = vmatprep.subr.bf16.mxu0 %v2232_v5  ;;  %v724_v19 = vld [vmem:[#allocation7 + $0x8] sm:$0xff]  ;;  %v725_v20 = vld [vmem:[#allocation7 + $0x10] sm:$0xff]  ;;  %v2248_v21 = vpack.c.bf16 %v454_v17, %v453_v16  ;;  %v455_v22 = vld [vmem:[#allocation5 + $0x60] sm:$0xff]  ;;  %p2591_p5 = pnand %p2590_p3, %p2896_p10  ;;  %p2597_p1 = scmp.lt.s32.totalorder %s2595_s19, %s2589_s17 }
  0xa2   : > { %v2260_v23 = vpack.c.bf16 %v724_v19, %v723_v18  ;;  %v726_v24 = vld [vmem:[#allocation7 + $0x18] sm:$0xff]  ;;  %v456_v25 = vld [vmem:[#allocation5 + $0x68] sm:$0xff]  ;;  %v727_v27 = vld [vmem:[#allocation7 + $0x20] sm:$0xff] }
  0xa3   : > { %v2264_v26 = vpack.c.bf16 %v726_v24, %v725_v20  ;;  %v728_v28 = vld [vmem:[#allocation7 + $0x28] sm:$0xff]  ;;  %v2252_v29 = vpack.c.bf16 %v456_v25, %v455_v22  ;;  %v457_v30 = vld [vmem:[#allocation5 + $0x70] sm:$0xff]  ;;  %v458_v32 = vld [vmem:[#allocation5 + $0x78] sm:$0xff]  ;;  %p2592_p7 = pneg %p2591_p5  ;;  %p2598_p2 = por %p2597_p1, %p2596_p12 }
  0xa4   : > { %2235 = vmatpush3.bf16.msra.mxu0 %v2232_v5  ;;  %2261 = vmatprep.subr.bf16.mxu1 %v2260_v23  ;;  %v2268_v31 = vpack.c.bf16 %v728_v28, %v727_v27  ;;  %v729_v33 = vld [vmem:[#allocation7 + $0x30] sm:$0xff]  ;;  %v730_v34 = vld [vmem:[#allocation7 + $0x38] sm:$0xff]  ;;  %v2256_v35 = vpack.c.bf16 %v458_v32, %v457_v30  ;;  %v731_v37 = vld [vmem:[#allocation7 + $0x40] sm:$0xff] }
  0xa5   : > { %2237 = vmatprep.subr.bf16.mxu0 %v2236_v8  ;;  %2263 = vmatpush3.bf16.msra.mxu1 %v2260_v23  ;;  %v2272_v36 = vpack.c.bf16 %v730_v34, %v729_v33  ;;  %v732_v38 = vld [vmem:[#allocation7 + $0x48] sm:$0xff]  ;;  %v733_v40 = vld [vmem:[#allocation7 + $0x50] sm:$0xff]  ;;  %v734_v41 = vld [vmem:[#allocation7 + $0x58] sm:$0xff]  ;;  %p2599_p13 = pnand %p2598_p2, %p2592_p7 }
  0xa6   : > { %2265 = vmatprep.subr.bf16.mxu1 %v2264_v26  ;;  %v2276_v39 = vpack.c.bf16 %v732_v38, %v731_v37  ;;  %v412_v42 = vld [vmem:[%s2957_s9 + $0x8] sm:$0xff]  ;;  %v413_v43 = vld [vmem:[%s2957_s9 + $0x10] sm:$0xff]  ;;  %v2280_v44 = vpack.c.bf16 %v734_v41, %v733_v40  ;;  %v735_v45 = vld [vmem:[#allocation7 + $0x60] sm:$0xff] }
  0xa7   : > { %v736_v46 = vld [vmem:[#allocation7 + $0x68] sm:$0xff]  ;;  %v414_v47 = vld [vmem:[%s2957_s9 + $0x18] sm:$0xff]  ;;  %v415_v48 = vld [vmem:[%s2957_s9 + $0x20] sm:$0xff] }
  0xa8   : > { %2239 = vmatpush3.bf16.msra.mxu0 %v2236_v8  ;;  %v2284_v49 = vpack.c.bf16 %v736_v46, %v735_v45  ;;  %v416_v50 = vld [vmem:[%s2957_s9 + $0x28] sm:$0xff]  ;;  %v417_v51 = vld [vmem:[%s2957_s9 + $0x30] sm:$0xff]  ;;  %v418_v52 = vld [vmem:[%s2957_s9 + $0x38] sm:$0xff] }
  0xa9   : > { %2241 = vmatprep.subr.bf16.mxu0 %v2240_v12  ;;  %2267 = vmatpush3.bf16.msra.mxu1 %v2264_v26  ;;  %v419_v53 = vld [vmem:[%s2957_s9 + $0x40] sm:$0xff]  ;;  %v420_v54 = vld [vmem:[%s2957_s9 + $0x48] sm:$0xff]  ;;  %v421_v55 = vld [vmem:[%s2957_s9 + $0x50] sm:$0xff] }
  0xaa   : > { %2269 = vmatprep.subr.bf16.mxu1 %v2268_v31  ;;  %v422_v56 = vld [vmem:[%s2957_s9 + $0x58] sm:$0xff]  ;;  %v423_v57 = vld [vmem:[%s2957_s9 + $0x60] sm:$0xff]  ;;  %v424_v58 = vld [vmem:[%s2957_s9 + $0x68] sm:$0xff] }
  0xab   : > { %v425_v59 = vld [vmem:[%s2957_s9 + $0x70] sm:$0xff]  ;;  %v426_v60 = vld [vmem:[%s2957_s9 + $0x78] sm:$0xff]  ;;  %v427_v61 = vld [vmem:[%s2957_s9 + $0x80] sm:$0xff] }
  0xac   : > { %2243 = vmatpush3.bf16.msra.mxu0 %v2240_v12  ;;  %v428_v62 = vld [vmem:[%s2957_s9 + $0x88] sm:$0xff]  ;;  %v429_v63 = vld [vmem:[%s2957_s9 + $0x90] sm:$0xff]  ;;  %v430_v0 = vld [vmem:[%s2957_s9 + $0x98] sm:$0xff] }
  0xad   : > { %2245 = vmatprep.subr.bf16.mxu0 %v2244_v15  ;;  %2271 = vmatpush3.bf16.msra.mxu1 %v2268_v31  ;;  %v431_v1 = vld [vmem:[%s2957_s9 + $0xa0] sm:$0xff]  ;;  %v432_v2 = vld [vmem:[%s2957_s9 + $0xa8] sm:$0xff]  ;;  %v433_v3 = vld [vmem:[%s2957_s9 + $0xb0] sm:$0xff] }
  0xae   : > { %2273 = vmatprep.subr.bf16.mxu1 %v2272_v36  ;;  %v434_v4 = vld [vmem:[%s2957_s9 + $0xb8] sm:$0xff]  ;;  %v435_v5 = vld [vmem:[%s2957_s9 + $0xc0] sm:$0xff]  ;;  %v436_v6 = vld [vmem:[%s2957_s9 + $0xc8] sm:$0xff] }
  0xaf   : > { %v437_v7 = vld [vmem:[%s2957_s9 + $0xd0] sm:$0xff]  ;;  %v438_v8 = vld [vmem:[%s2957_s9 + $0xd8] sm:$0xff]  ;;  %v439_v9 = vld [vmem:[%s2957_s9 + $0xe0] sm:$0xff] }
  0xb0   : > { %2247 = vmatpush3.bf16.msra.mxu0 %v2244_v15  ;;  %v440_v10 = vld [vmem:[%s2957_s9 + $0xe8] sm:$0xff]  ;;  %v441_v11 = vld [vmem:[%s2957_s9 + $0xf0] sm:$0xff]  ;;  %v442_v12 = vld [vmem:[%s2957_s9 + $0xf8] sm:$0xff]  ;;  %s3271_s9 = sld [smem:[#allocation18_spill]] }
  0xb1   : > { %2249 = vmatprep.subr.bf16.mxu0 %v2248_v21  ;;  %2275 = vmatpush3.bf16.msra.mxu1 %v2272_v36  ;;  %v737_v13 = vld [vmem:[#allocation7 + $0x70] sm:$0xff]  ;;  %v738_v14 = vld [vmem:[#allocation7 + $0x78] sm:$0xff]  ;;  %v1003_v16 = vld [vmem:[#allocation8] sm:$0xff] }
  0xb2   : > { %2277 = vmatprep.subr.bf16.mxu1 %v2276_v39  ;;  %v2288_v15 = vpack.c.bf16 %v738_v14, %v737_v13  ;;  %v1004_v17 = vld [vmem:[#allocation8 + $0x8] sm:$0xff]  ;;  %v1005_v18 = vld [vmem:[#allocation8 + $0x10] sm:$0xff]  ;;  %v1006_v20 = vld [vmem:[#allocation8 + $0x18] sm:$0xff] }
  0xb3   : > { %v2292_v19 = vpack.c.bf16 %v1004_v17, %v1003_v16  ;;  %v1007_v22 = vld [vmem:[#allocation8 + $0x20] sm:$0xff]  ;;  %v1008_v23 = vld [vmem:[#allocation8 + $0x28] sm:$0xff]  ;;  %v1009_v25 = vld [vmem:[#allocation8 + $0x30] sm:$0xff] }
  0xb4   : > { %2251 = vmatpush3.bf16.msra.mxu0 %v2248_v21  ;;  %v2296_v21 = vpack.c.bf16 %v1006_v20, %v1005_v18  ;;  %v2300_v24 = vpack.c.bf16 %v1008_v23, %v1007_v22  ;;  %v1010_v26 = vld [vmem:[#allocation8 + $0x38] sm:$0xff]  ;;  %v1011_v28 = vld [vmem:[#allocation8 + $0x40] sm:$0xff]  ;;  %v1013_v31 = vld [vmem:[#allocation8 + $0x50] sm:$0xff] }
  0xb5   : > { %2253 = vmatprep.subr.bf16.mxu0 %v2252_v29  ;;  %2279 = vmatpush3.bf16.msra.mxu1 %v2276_v39  ;;  %v2304_v27 = vpack.c.bf16 %v1010_v26, %v1009_v25  ;;  %v1014_v32 = vld [vmem:[#allocation8 + $0x58] sm:$0xff]  ;;  %v1015_v34 = vld [vmem:[#allocation8 + $0x60] sm:$0xff]  ;;  %v1017_v37 = vld [vmem:[#allocation8 + $0x70] sm:$0xff] }
  0xb6   : > { %2281 = vmatprep.subr.bf16.mxu1 %v2280_v44  ;;  %v2312_v33 = vpack.c.bf16 %v1014_v32, %v1013_v31  ;;  %v1018_v38 = vld [vmem:[#allocation8 + $0x78] sm:$0xff]  ;;  %v3006_v40 = vld [vmem:[%s3240_s2] ss:$0 sm:$0xff]  ;;  %s3189_s15 = scalar_lea.hbm %s3271_s9, %s1715_s16 }
  0xb7   : > { %v2320_v39 = vpack.c.bf16 %v1018_v38, %v1017_v37 }
  0xb8   : > { %2255 = vmatpush3.bf16.msra.mxu0 %v2252_v29  ;;  %v1012_v29 = vld [vmem:[#allocation8 + $0x48] sm:$0xff] }
  0xb9   : > { %2257 = vmatprep.subr.bf16.mxu0 %v2256_v35  ;;  %2283 = vmatpush3.bf16.msra.mxu1 %v2280_v44  ;;  %v2308_v30 = vpack.c.bf16 %v1012_v29, %v1011_v28 }
  0xba   : > { %2285 = vmatprep.subr.bf16.mxu1 %v2284_v49 }
  0xbc   : > { %2259 = vmatpush3.bf16.msra.mxu0 %v2256_v35  ;;  %v1016_v35 = vld [vmem:[#allocation8 + $0x68] sm:$0xff] }
  0xbd   : > { %2287 = vmatpush3.bf16.msra.mxu1 %v2284_v49  ;;  %2293 = vmatprep.subr.bf16.mxu0 %v2292_v19  ;;  %v2316_v36 = vpack.c.bf16 %v1016_v35, %v1015_v34 }
  0xbe   : > { %2289 = vmatprep.subr.bf16.mxu1 %v2288_v15 }
  0xbf   : > { %1941 = vmatmul.mubr.f32.vlgmr.msra.gmra.mrb[0].mxu0 %v412_v42 }
  0xc0   : > { %1943 = vmatprep.mubr.f32.mxu0 %v413_v43  ;;  %2295 = vmatpush3.bf16.msra.mxu0 %v2292_v19 }
  0xc1   : > { %2291 = vmatpush3.bf16.msra.mxu1 %v2288_v15  ;;  %2297 = vmatprep.subr.bf16.mxu0 %v2296_v21 }
  0xc3   : > { %1944 = vmatmul.mubr.f32.gmra.mrb[2].mxu0 %v414_v47 }
  0xc4   : > { %1946 = vmatprep.mubr.f32.mxu0 %v415_v48  ;;  %2299 = vmatpush3.bf16.msra.mxu0 %v2296_v21 }
  0xc5   : > { %2301 = vmatprep.subr.bf16.mxu0 %v2300_v24 }
  0xc7   : > { %1947 = vmatmul.mubr.f32.gmra.mrb[4].mxu0 %v416_v50 }
  0xc8   : > { %1949 = vmatprep.mubr.f32.mxu0 %v417_v51  ;;  %2303 = vmatpush3.bf16.msra.mxu0 %v2300_v24 }
  0xc9   : > { %2305 = vmatprep.subr.bf16.mxu0 %v2304_v27 }
  0xcb   : > { %1950 = vmatmul.mubr.f32.gmra.mrb[6].mxu0 %v418_v52 }
  0xcc   : > { %1952 = vmatprep.mubr.f32.mxu0 %v419_v53  ;;  %2307 = vmatpush3.bf16.msra.mxu0 %v2304_v27 }
  0xcd   : > { %2309 = vmatprep.subr.bf16.mxu0 %v2308_v30 }
  0xcf   : > { %1953 = vmatmul.mubr.f32.gmra.mrb[8].mxu0 %v420_v54 }
  0xd0   : > { %1955 = vmatprep.mubr.f32.mxu0 %v421_v55  ;;  %2311 = vmatpush3.bf16.msra.mxu0 %v2308_v30 }
  0xd1   : > { %2313 = vmatprep.subr.bf16.mxu0 %v2312_v33 }
  0xd3   : > { %1956 = vmatmul.mubr.f32.gmra.mrb[10].mxu0 %v422_v56 }
  0xd4   : > { %1958 = vmatprep.mubr.f32.mxu0 %v423_v57  ;;  %2315 = vmatpush3.bf16.msra.mxu0 %v2312_v33 }
  0xd5   : > { %2317 = vmatprep.subr.bf16.mxu0 %v2316_v36 }
  0xd7   : > { %1959 = vmatmul.mubr.f32.gmra.mrb[12].mxu0 %v424_v58 }
  0xd8   : > { %1961 = vmatprep.mubr.f32.mxu0 %v425_v59  ;;  %2319 = vmatpush3.bf16.msra.mxu0 %v2316_v36 }
  0xd9   : > { %2321 = vmatprep.subr.bf16.mxu0 %v2320_v39 }
  0xdb   : > { %1962 = vmatmul.mubr.f32.gmra.mrb[14].mxu0 %v426_v60 }
  0xdc   : > { %1964 = vmatprep.mubr.f32.mxu0 %v427_v61  ;;  %2323 = vmatpush3.bf16.msra.mxu0 %v2320_v39 }
  0xdf   : > { %1965 = vmatmul.mubr.f32.gmra.mrb[16].mxu0 %v428_v62 }
  0xe0   : > { %1967 = vmatprep.mubr.f32.mxu0 %v429_v63 }
  0xe3   : > { %1968 = vmatmul.mubr.f32.gmra.mrb[18].mxu0 %v430_v0 }
  0xe4   : > { %1970 = vmatprep.mubr.f32.mxu0 %v431_v1 }
  0xe7   : > { %1971 = vmatmul.mubr.f32.gmra.mrb[20].mxu0 %v432_v2 }
  0xe8   : > { %1973 = vmatprep.mubr.f32.mxu0 %v433_v3 }
  0xeb   : > { %1974 = vmatmul.mubr.f32.gmra.mrb[22].mxu0 %v434_v4 }
  0xec   : > { %1976 = vmatprep.mubr.f32.mxu0 %v435_v5 }
  0xef   : > { %1977 = vmatmul.mubr.f32.gmra.mrb[24].mxu0 %v436_v6 }
  0xf0   : > { %1979 = vmatprep.mubr.f32.mxu0 %v437_v7 }
  0xf3   : > { %1980 = vmatmul.mubr.f32.gmra.mrb[26].mxu0 %v438_v8 }
  0xf4   : > { %1982 = vmatprep.mubr.f32.mxu0 %v439_v9 }
  0xf7   : > { %1983 = vmatmul.mubr.f32.gmra.mrb[28].mxu0 %v440_v10 }
  0xf8   : > { %1985 = vmatprep.mubr.f32.mxu0 %v441_v11 }
  0xfb   : > { %1986 = vmatmul.mubr.f32.gmra.mrb[30].mxu0 %v442_v12 }
 0x192   : > { %v1942_v41 = vpop.f32.mrb[0].mxu0 }
 0x193   : > { %v538_v42 = vadd.f32 %v1942_v41, %v3006_v40  ;;  %v532_v43 = vpop.f32.mrb[1].mxu0 }
 0x194   : > { %v533_v44 = vadd.f32 %v3006_v40, %v532_v43 }
 0x195   : > { %v692_v47 = vmax.f32 %v538_v42, 0.0 }
 0x196   : > { %v1945_v45 = vpop.f32.mrb[2].mxu0  ;;  %v691_v46 = vmax.f32 %v533_v44, 0.0 }
 0x197   : > { %v548_v48 = vadd.f32 %v1945_v45, %v3006_v40  ;;  %v542_v49 = vpop.f32.mrb[3].mxu0 }
 0x198   : > { %v543_v50 = vadd.f32 %v3006_v40, %v542_v49  ;;  %2020 = vmatprep.mubr.f32.mxu1 %v691_v46 }
 0x199   : > { %2021 = vmatmul.mubr.f32.vlgmr.msra.gmra.mrb[0].mxu1 %v692_v47  ;;  %v694_v53 = vmax.f32 %v548_v48, 0.0 }
 0x19a   : > { %v693_v51 = vmax.f32 %v543_v50, 0.0  ;;  %v1948_v52 = vpop.f32.mrb[4].mxu0 }
 0x19b   : > { %v558_v54 = vadd.f32 %v1948_v52, %v3006_v40  ;;  %v552_v55 = vpop.f32.mrb[5].mxu0 }
 0x19c   : > { %v553_v56 = vadd.f32 %v3006_v40, %v552_v55  ;;  %2023 = vmatprep.mubr.f32.mxu1 %v693_v51 }
 0x19d   : > { %2024 = vmatmul.mubr.f32.gmra.mrb[2].mxu1 %v694_v53  ;;  %v696_v59 = vmax.f32 %v558_v54, 0.0 }
 0x19e   : > { %v695_v57 = vmax.f32 %v553_v56, 0.0  ;;  %v1951_v58 = vpop.f32.mrb[6].mxu0 }
 0x19f   : > { %v568_v60 = vadd.f32 %v1951_v58, %v3006_v40  ;;  %v562_v61 = vpop.f32.mrb[7].mxu0 }
 0x1a0   : > { %v563_v62 = vadd.f32 %v3006_v40, %v562_v61  ;;  %2026 = vmatprep.mubr.f32.mxu1 %v695_v57 }
 0x1a1   : > { %2027 = vmatmul.mubr.f32.gmra.mrb[4].mxu1 %v696_v59  ;;  %v698_v1 = vmax.f32 %v568_v60, 0.0 }
 0x1a2   : > { %v697_v63 = vmax.f32 %v563_v62, 0.0  ;;  %v1954_v0 = vpop.f32.mrb[8].mxu0 }
 0x1a3   : > { %v578_v2 = vadd.f32 %v1954_v0, %v3006_v40  ;;  %v572_v3 = vpop.f32.mrb[9].mxu0 }
 0x1a4   : > { %v573_v4 = vadd.f32 %v3006_v40, %v572_v3  ;;  %2029 = vmatprep.mubr.f32.mxu1 %v697_v63 }
 0x1a5   : > { %2030 = vmatmul.mubr.f32.gmra.mrb[6].mxu1 %v698_v1  ;;  %v700_v7 = vmax.f32 %v578_v2, 0.0 }
 0x1a6   : > { %v699_v5 = vmax.f32 %v573_v4, 0.0  ;;  %v1957_v6 = vpop.f32.mrb[10].mxu0 }
 0x1a7   : > { %v588_v8 = vadd.f32 %v1957_v6, %v3006_v40  ;;  %v582_v9 = vpop.f32.mrb[11].mxu0 }
 0x1a8   : > { %v583_v10 = vadd.f32 %v3006_v40, %v582_v9  ;;  %2032 = vmatprep.mubr.f32.mxu1 %v699_v5 }
 0x1a9   : > { %2033 = vmatmul.mubr.f32.gmra.mrb[8].mxu1 %v700_v7  ;;  %v702_v13 = vmax.f32 %v588_v8, 0.0 }
 0x1aa   : > { %v701_v11 = vmax.f32 %v583_v10, 0.0  ;;  %v1960_v12 = vpop.f32.mrb[12].mxu0  ;;  %v1283_v10 = vld [vmem:[#allocation10] sm:$0xff] }
 0x1ab   : > { %v598_v14 = vadd.f32 %v1960_v12, %v3006_v40  ;;  %v592_v15 = vpop.f32.mrb[13].mxu0  ;;  %v1285_v12 = vld [vmem:[#allocation10 + $0x10] sm:$0xff] }
 0x1ac   : > { %v593_v16 = vadd.f32 %v3006_v40, %v592_v15  ;;  %2035 = vmatprep.mubr.f32.mxu1 %v701_v11  ;;  %v1284_v11 = vld [vmem:[#allocation10 + $0x8] sm:$0xff] }
 0x1ad   : > { %2036 = vmatmul.mubr.f32.gmra.mrb[10].mxu1 %v702_v13  ;;  %v704_v19 = vmax.f32 %v598_v14, 0.0  ;;  %v2324_v13 = vpack.c.bf16 %v1284_v11, %v1283_v10  ;;  %v1286_v14 = vld [vmem:[#allocation10 + $0x18] sm:$0xff] }
 0x1ae   : > { %v703_v17 = vmax.f32 %v593_v16, 0.0  ;;  %v1963_v18 = vpop.f32.mrb[14].mxu0  ;;  %v2328_v15 = vpack.c.bf16 %v1286_v14, %v1285_v12  ;;  %v1287_v16 = vld [vmem:[#allocation10 + $0x20] sm:$0xff] }
 0x1af   : > { %v608_v20 = vadd.f32 %v1963_v18, %v3006_v40  ;;  %v602_v21 = vpop.f32.mrb[15].mxu0  ;;  %2325 = vmatprep.subr.bf16.mxu1 %v2324_v13 }
 0x1b0   : > { %v603_v22 = vadd.f32 %v3006_v40, %v602_v21  ;;  %2038 = vmatprep.mubr.f32.mxu1 %v703_v17  ;;  %v1288_v17 = vld [vmem:[#allocation10 + $0x28] sm:$0xff]  ;;  %2327 = vmatpush3.bf16.msra.mxu1 %v2324_v13  ;;  %v1291_v21 = vld [vmem:[#allocation10 + $0x40] sm:$0xff] }
 0x1b1   : > { %2039 = vmatmul.mubr.f32.gmra.mrb[12].mxu1 %v704_v19  ;;  %v706_v25 = vmax.f32 %v608_v20, 0.0  ;;  %2329 = vmatprep.subr.bf16.mxu1 %v2328_v15  ;;  %v2332_v18 = vpack.c.bf16 %v1288_v17, %v1287_v16  ;;  %v1289_v19 = vld [vmem:[#allocation10 + $0x30] sm:$0xff] }
 0x1b2   : > { %v705_v23 = vmax.f32 %v603_v22, 0.0  ;;  %v1966_v24 = vpop.f32.mrb[16].mxu0  ;;  %v1292_v22 = vld [vmem:[#allocation10 + $0x48] sm:$0xff] }
 0x1b3   : > { %v618_v26 = vadd.f32 %v1966_v24, %v3006_v40  ;;  %v612_v27 = vpop.f32.mrb[17].mxu0  ;;  %v1293_v24 = vld [vmem:[#allocation10 + $0x50] sm:$0xff] }
 0x1b4   : > { %v613_v28 = vadd.f32 %v3006_v40, %v612_v27  ;;  %2041 = vmatprep.mubr.f32.mxu1 %v705_v23  ;;  %2331 = vmatpush3.bf16.msra.mxu1 %v2328_v15  ;;  %v2340_v23 = vpack.c.bf16 %v1292_v22, %v1291_v21  ;;  %v1295_v27 = vld [vmem:[#allocation10 + $0x60] sm:$0xff] }
 0x1b5   : > { %2042 = vmatmul.mubr.f32.gmra.mrb[14].mxu1 %v706_v25  ;;  %v708_v31 = vmax.f32 %v618_v26, 0.0  ;;  %2333 = vmatprep.subr.bf16.mxu1 %v2332_v18  ;;  %v1294_v25 = vld [vmem:[#allocation10 + $0x58] sm:$0xff] }
 0x1b6   : > { %v707_v29 = vmax.f32 %v613_v28, 0.0  ;;  %v1969_v30 = vpop.f32.mrb[18].mxu0  ;;  %v2344_v26 = vpack.c.bf16 %v1294_v25, %v1293_v24  ;;  %v1296_v28 = vld [vmem:[#allocation10 + $0x68] sm:$0xff] }
 0x1b7   : > { %v628_v32 = vadd.f32 %v1969_v30, %v3006_v40  ;;  %v622_v33 = vpop.f32.mrb[19].mxu0  ;;  %v1297_v30 = vld [vmem:[#allocation10 + $0x70] sm:$0xff] }
 0x1b8   : > { %v623_v34 = vadd.f32 %v3006_v40, %v622_v33  ;;  %2044 = vmatprep.mubr.f32.mxu1 %v707_v29  ;;  %2335 = vmatpush3.bf16.msra.mxu1 %v2332_v18  ;;  %v2348_v29 = vpack.c.bf16 %v1296_v28, %v1295_v27  ;;  %v3043_v33 = vld [vmem:[%s3242_s4] ss:$0 sm:$0xff] }
 0x1b9   : > { %2045 = vmatmul.mubr.f32.gmra.mrb[16].mxu1 %v708_v31  ;;  %v710_v37 = vmax.f32 %v628_v32, 0.0  ;;  %v1298_v31 = vld [vmem:[#allocation10 + $0x78] sm:$0xff] }
 0x1ba   : > { %v709_v35 = vmax.f32 %v623_v34, 0.0  ;;  %v1972_v36 = vpop.f32.mrb[20].mxu0  ;;  %v2352_v32 = vpack.c.bf16 %v1298_v31, %v1297_v30 }
 0x1bb   : > { %v638_v38 = vadd.f32 %v1972_v36, %v3006_v40  ;;  %v632_v39 = vpop.f32.mrb[21].mxu0 }
 0x1bc   : > { %v633_v41 = vadd.f32 %v3006_v40, %v632_v39  ;;  %2047 = vmatprep.mubr.f32.mxu1 %v709_v35 }
 0x1bd   : > { %2048 = vmatmul.mubr.f32.gmra.mrb[18].mxu1 %v710_v37  ;;  %v712_v44 = vmax.f32 %v638_v38, 0.0 }
 0x1be   : > { %v711_v42 = vmax.f32 %v633_v41, 0.0  ;;  %v1975_v43 = vpop.f32.mrb[22].mxu0 }
 0x1bf   : > { %v648_v45 = vadd.f32 %v1975_v43, %v3006_v40  ;;  %v642_v46 = vpop.f32.mrb[23].mxu0 }
 0x1c0   : > { %v643_v47 = vadd.f32 %v3006_v40, %v642_v46  ;;  %2050 = vmatprep.mubr.f32.mxu1 %v711_v42 }
 0x1c1   : > { %2051 = vmatmul.mubr.f32.gmra.mrb[20].mxu1 %v712_v44  ;;  %v714_v50 = vmax.f32 %v648_v45, 0.0 }
 0x1c2   : > { %v713_v48 = vmax.f32 %v643_v47, 0.0  ;;  %v1978_v49 = vpop.f32.mrb[24].mxu0 }
 0x1c3   : > { %v658_v51 = vadd.f32 %v1978_v49, %v3006_v40  ;;  %v652_v52 = vpop.f32.mrb[25].mxu0 }
 0x1c4   : > { %v653_v53 = vadd.f32 %v3006_v40, %v652_v52  ;;  %2053 = vmatprep.mubr.f32.mxu1 %v713_v48 }
 0x1c5   : > { %2054 = vmatmul.mubr.f32.gmra.mrb[22].mxu1 %v714_v50  ;;  %v716_v56 = vmax.f32 %v658_v51, 0.0 }
 0x1c6   : > { %v715_v54 = vmax.f32 %v653_v53, 0.0  ;;  %v1981_v55 = vpop.f32.mrb[26].mxu0 }
 0x1c7   : > { %v668_v57 = vadd.f32 %v1981_v55, %v3006_v40  ;;  %v662_v58 = vpop.f32.mrb[27].mxu0 }
 0x1c8   : > { %v663_v59 = vadd.f32 %v3006_v40, %v662_v58  ;;  %2056 = vmatprep.mubr.f32.mxu1 %v715_v54 }
 0x1c9   : > { %2057 = vmatmul.mubr.f32.gmra.mrb[24].mxu1 %v716_v56  ;;  %v718_v62 = vmax.f32 %v668_v57, 0.0 }
 0x1ca   : > { %v717_v60 = vmax.f32 %v663_v59, 0.0  ;;  %v1984_v61 = vpop.f32.mrb[28].mxu0 }
 0x1cb   : > { %v678_v63 = vadd.f32 %v1984_v61, %v3006_v40  ;;  %v672_v0 = vpop.f32.mrb[29].mxu0 }
 0x1cc   : > { %v673_v1 = vadd.f32 %v3006_v40, %v672_v0  ;;  %2059 = vmatprep.mubr.f32.mxu1 %v717_v60 }
 0x1cd   : > { %2060 = vmatmul.mubr.f32.gmra.mrb[26].mxu1 %v718_v62  ;;  %v720_v4 = vmax.f32 %v678_v63, 0.0 }
 0x1ce   : > { %v719_v2 = vmax.f32 %v673_v1, 0.0  ;;  %v1987_v3 = vpop.f32.mrb[30].mxu0 }
 0x1cf   : > { %v688_v5 = vadd.f32 %v1987_v3, %v3006_v40  ;;  %v682_v6 = vpop.f32.mrb[31].mxu0 }
 0x1d0   : > { %v683_v7 = vadd.f32 %v3006_v40, %v682_v6  ;;  %2062 = vmatprep.mubr.f32.mxu1 %v719_v2  ;;  %v1290_v40 = vld [vmem:[#allocation10 + $0x38] sm:$0xff] }
 0x1d1   : > { %2063 = vmatmul.mubr.f32.gmra.mrb[28].mxu1 %v720_v4  ;;  %v722_v9 = vmax.f32 %v688_v5, 0.0  ;;  %v2336_v20 = vpack.c.bf16 %v1290_v40, %v1289_v19 }
 0x1d2   : > { %v721_v8 = vmax.f32 %v683_v7, 0.0 }
 0x1d3   : > { %2337 = vmatprep.subr.bf16.mxu1 %v2336_v20 }
 0x1d4   : > { %2065 = vmatprep.mubr.f32.mxu1 %v721_v8  ;;  %2339 = vmatpush3.bf16.msra.mxu1 %v2336_v20 }
 0x1d5   : > { %2066 = vmatmul.mubr.f32.gmra.mrb[30].mxu1 %v722_v9  ;;  %2341 = vmatprep.subr.bf16.mxu1 %v2340_v23 }
 0x1d8   : > { %2343 = vmatpush3.bf16.msra.mxu1 %v2340_v23 }
 0x1d9   : > { %2345 = vmatprep.subr.bf16.mxu1 %v2344_v26 }
 0x1dc   : > { %2347 = vmatpush3.bf16.msra.mxu1 %v2344_v26 }
 0x1dd   : > { %2349 = vmatprep.subr.bf16.mxu1 %v2348_v29 }
 0x1e0   : > { %2351 = vmatpush3.bf16.msra.mxu1 %v2348_v29 }
 0x1e1   : > { %2353 = vmatprep.subr.bf16.mxu1 %v2352_v32 }
 0x1e4   : > { %2355 = vmatpush3.bf16.msra.mxu1 %v2352_v32 }
 0x26c   : > { %v2022_v34 = vpop.f32.mrb[0].mxu1 }
 0x26d   : > { %v818_v35 = vadd.f32 %v2022_v34, %v3043_v33  ;;  %v812_v36 = vpop.f32.mrb[1].mxu1 }
 0x26e   : > { %v813_v37 = vadd.f32 %v3043_v33, %v812_v36 }
 0x26f   : > { %v972_v41 = vmax.f32 %v818_v35, 0.0 }
 0x270   : > { %v971_v38 = vmax.f32 %v813_v37, 0.0  ;;  %v2025_v39 = vpop.f32.mrb[2].mxu1 }
 0x271   : > { %v828_v42 = vadd.f32 %v2025_v39, %v3043_v33  ;;  %v822_v43 = vpop.f32.mrb[3].mxu1 }
 0x272   : > { %v823_v44 = vadd.f32 %v3043_v33, %v822_v43  ;;  %2100 = vmatprep.mubr.f32.mxu0 %v971_v38 }
 0x273   : > { %2101 = vmatmul.mubr.f32.vlgmr.msra.gmra.mrb[32].mxu0 %v972_v41  ;;  %v974_v47 = vmax.f32 %v828_v42, 0.0 }
 0x274   : > { %v973_v45 = vmax.f32 %v823_v44, 0.0  ;;  %v2028_v46 = vpop.f32.mrb[4].mxu1 }
 0x275   : > { %v838_v48 = vadd.f32 %v2028_v46, %v3043_v33  ;;  %v832_v49 = vpop.f32.mrb[5].mxu1 }
 0x276   : > { %v833_v50 = vadd.f32 %v3043_v33, %v832_v49  ;;  %2103 = vmatprep.mubr.f32.mxu0 %v973_v45 }
 0x277   : > { %2104 = vmatmul.mubr.f32.gmra.mrb[34].mxu0 %v974_v47  ;;  %v976_v53 = vmax.f32 %v838_v48, 0.0 }
 0x278   : > { %v975_v51 = vmax.f32 %v833_v50, 0.0  ;;  %v2031_v52 = vpop.f32.mrb[6].mxu1 }
 0x279   : > { %v848_v54 = vadd.f32 %v2031_v52, %v3043_v33  ;;  %v842_v55 = vpop.f32.mrb[7].mxu1 }
 0x27a   : > { %v843_v56 = vadd.f32 %v3043_v33, %v842_v55  ;;  %2106 = vmatprep.mubr.f32.mxu0 %v975_v51 }
 0x27b   : > { %2107 = vmatmul.mubr.f32.gmra.mrb[36].mxu0 %v976_v53  ;;  %v978_v59 = vmax.f32 %v848_v54, 0.0 }
 0x27c   : > { %v977_v57 = vmax.f32 %v843_v56, 0.0  ;;  %v2034_v58 = vpop.f32.mrb[8].mxu1 }
 0x27d   : > { %v858_v60 = vadd.f32 %v2034_v58, %v3043_v33  ;;  %v852_v61 = vpop.f32.mrb[9].mxu1 }
 0x27e   : > { %v853_v62 = vadd.f32 %v3043_v33, %v852_v61  ;;  %2109 = vmatprep.mubr.f32.mxu0 %v977_v57 }
 0x27f   : > { %2110 = vmatmul.mubr.f32.gmra.mrb[38].mxu0 %v978_v59  ;;  %v980_v1 = vmax.f32 %v858_v60, 0.0 }
 0x280   : > { %v979_v63 = vmax.f32 %v853_v62, 0.0  ;;  %v2037_v0 = vpop.f32.mrb[10].mxu1 }
 0x281   : > { %v868_v2 = vadd.f32 %v2037_v0, %v3043_v33  ;;  %v862_v3 = vpop.f32.mrb[11].mxu1 }
 0x282   : > { %v863_v4 = vadd.f32 %v3043_v33, %v862_v3  ;;  %2112 = vmatprep.mubr.f32.mxu0 %v979_v63 }
 0x283   : > { %2113 = vmatmul.mubr.f32.gmra.mrb[40].mxu0 %v980_v1  ;;  %v982_v7 = vmax.f32 %v868_v2, 0.0 }
 0x284   : > { %v981_v5 = vmax.f32 %v863_v4, 0.0  ;;  %v2040_v6 = vpop.f32.mrb[12].mxu1  ;;  %v3080_v4 = vld [vmem:[%s3244_s6] ss:$0 sm:$0xff] }
 0x285   : > { %v878_v8 = vadd.f32 %v2040_v6, %v3043_v33  ;;  %v872_v9 = vpop.f32.mrb[13].mxu1 }
 0x286   : > { %v873_v10 = vadd.f32 %v3043_v33, %v872_v9  ;;  %2115 = vmatprep.mubr.f32.mxu0 %v981_v5 }
 0x287   : > { %2116 = vmatmul.mubr.f32.gmra.mrb[42].mxu0 %v982_v7  ;;  %v984_v13 = vmax.f32 %v878_v8, 0.0 }
 0x288   : > { %v983_v11 = vmax.f32 %v873_v10, 0.0  ;;  %v2043_v12 = vpop.f32.mrb[14].mxu1 }
 0x289   : > { %v888_v14 = vadd.f32 %v2043_v12, %v3043_v33  ;;  %v882_v15 = vpop.f32.mrb[15].mxu1 }
 0x28a   : > { %v883_v16 = vadd.f32 %v3043_v33, %v882_v15  ;;  %2118 = vmatprep.mubr.f32.mxu0 %v983_v11 }
 0x28b   : > { %2119 = vmatmul.mubr.f32.gmra.mrb[44].mxu0 %v984_v13  ;;  %v986_v19 = vmax.f32 %v888_v14, 0.0 }
 0x28c   : > { %v985_v17 = vmax.f32 %v883_v16, 0.0  ;;  %v2046_v18 = vpop.f32.mrb[16].mxu1 }
 0x28d   : > { %v898_v40 = vadd.f32 %v2046_v18, %v3043_v33  ;;  %v892_v20 = vpop.f32.mrb[17].mxu1 }
 0x28e   : > { %v893_v21 = vadd.f32 %v3043_v33, %v892_v20  ;;  %2121 = vmatprep.mubr.f32.mxu0 %v985_v17 }
 0x28f   : > { %2122 = vmatmul.mubr.f32.gmra.mrb[46].mxu0 %v986_v19  ;;  %v988_v24 = vmax.f32 %v898_v40, 0.0 }
 0x290   : > { %v987_v22 = vmax.f32 %v893_v21, 0.0  ;;  %v2049_v23 = vpop.f32.mrb[18].mxu1 }
 0x291   : > { %v908_v25 = vadd.f32 %v2049_v23, %v3043_v33  ;;  %v902_v26 = vpop.f32.mrb[19].mxu1 }
 0x292   : > { %v903_v27 = vadd.f32 %v3043_v33, %v902_v26  ;;  %2124 = vmatprep.mubr.f32.mxu0 %v987_v22 }
 0x293   : > { %2125 = vmatmul.mubr.f32.gmra.mrb[48].mxu0 %v988_v24  ;;  %v990_v30 = vmax.f32 %v908_v25, 0.0 }
 0x294   : > { %v989_v28 = vmax.f32 %v903_v27, 0.0  ;;  %v2052_v29 = vpop.f32.mrb[20].mxu1 }
 0x295   : > { %v918_v31 = vadd.f32 %v2052_v29, %v3043_v33  ;;  %v912_v32 = vpop.f32.mrb[21].mxu1 }
 0x296   : > { %v913_v34 = vadd.f32 %v3043_v33, %v912_v32  ;;  %2127 = vmatprep.mubr.f32.mxu0 %v989_v28 }
 0x297   : > { %2128 = vmatmul.mubr.f32.gmra.mrb[50].mxu0 %v990_v30  ;;  %v992_v37 = vmax.f32 %v918_v31, 0.0 }
 0x298   : > { %v991_v35 = vmax.f32 %v913_v34, 0.0  ;;  %v2055_v36 = vpop.f32.mrb[22].mxu1 }
 0x299   : > { %v928_v38 = vadd.f32 %v2055_v36, %v3043_v33  ;;  %v922_v39 = vpop.f32.mrb[23].mxu1 }
 0x29a   : > { %v923_v41 = vadd.f32 %v3043_v33, %v922_v39  ;;  %2130 = vmatprep.mubr.f32.mxu0 %v991_v35 }
 0x29b   : > { %2131 = vmatmul.mubr.f32.gmra.mrb[52].mxu0 %v992_v37  ;;  %v994_v44 = vmax.f32 %v928_v38, 0.0 }
 0x29c   : > { %v993_v42 = vmax.f32 %v923_v41, 0.0  ;;  %v2058_v43 = vpop.f32.mrb[24].mxu1 }
 0x29d   : > { %v938_v45 = vadd.f32 %v2058_v43, %v3043_v33  ;;  %v932_v46 = vpop.f32.mrb[25].mxu1 }
 0x29e   : > { %v933_v47 = vadd.f32 %v3043_v33, %v932_v46  ;;  %2133 = vmatprep.mubr.f32.mxu0 %v993_v42 }
 0x29f   : > { %2134 = vmatmul.mubr.f32.gmra.mrb[54].mxu0 %v994_v44  ;;  %v996_v50 = vmax.f32 %v938_v45, 0.0 }
 0x2a0   : > { %v995_v48 = vmax.f32 %v933_v47, 0.0  ;;  %v2061_v49 = vpop.f32.mrb[26].mxu1 }
 0x2a1   : > { %v948_v51 = vadd.f32 %v2061_v49, %v3043_v33  ;;  %v942_v52 = vpop.f32.mrb[27].mxu1 }
 0x2a2   : > { %v943_v53 = vadd.f32 %v3043_v33, %v942_v52  ;;  %2136 = vmatprep.mubr.f32.mxu0 %v995_v48 }
 0x2a3   : > { %2137 = vmatmul.mubr.f32.gmra.mrb[56].mxu0 %v996_v50  ;;  %v998_v56 = vmax.f32 %v948_v51, 0.0 }
 0x2a4   : > { %v997_v54 = vmax.f32 %v943_v53, 0.0  ;;  %v2064_v55 = vpop.f32.mrb[28].mxu1 }
 0x2a5   : > { %v958_v57 = vadd.f32 %v2064_v55, %v3043_v33  ;;  %v952_v58 = vpop.f32.mrb[29].mxu1 }
 0x2a6   : > { %v953_v59 = vadd.f32 %v3043_v33, %v952_v58  ;;  %2139 = vmatprep.mubr.f32.mxu0 %v997_v54 }
 0x2a7   : > { %2140 = vmatmul.mubr.f32.gmra.mrb[58].mxu0 %v998_v56  ;;  %v1000_v62 = vmax.f32 %v958_v57, 0.0 }
 0x2a8   : > { %v999_v60 = vmax.f32 %v953_v59, 0.0  ;;  %v2067_v61 = vpop.f32.mrb[30].mxu1 }
 0x2a9   : > { %v968_v63 = vadd.f32 %v2067_v61, %v3043_v33  ;;  %v962_v0 = vpop.f32.mrb[31].mxu1 }
 0x2aa   : > { %v963_v1 = vadd.f32 %v3043_v33, %v962_v0  ;;  %2142 = vmatprep.mubr.f32.mxu0 %v999_v60 }
 0x2ab   : > { %2143 = vmatmul.mubr.f32.gmra.mrb[60].mxu0 %v1000_v62  ;;  %v1002_v3 = vmax.f32 %v968_v63, 0.0 }
 0x2ac   : > { %v1001_v2 = vmax.f32 %v963_v1, 0.0 }
 0x2ae   : > { %2145 = vmatprep.mubr.f32.mxu0 %v1001_v2 }
 0x2af   : > { %2146 = vmatmul.mubr.f32.gmra.mrb[62].mxu0 %v1002_v3 }
 0x346   : > { %v2102_v5 = vpop.f32.mrb[32].mxu0 }
 0x347   : > { %v1098_v6 = vadd.f32 %v2102_v5, %v3080_v4  ;;  %v1092_v7 = vpop.f32.mrb[33].mxu0 }
 0x348   : > { %v1093_v8 = vadd.f32 %v3080_v4, %v1092_v7 }
 0x349   : > { %v1252_v33 = vmax.f32 %v1098_v6, 0.0 }
 0x34a   : > { %v1251_v9 = vmax.f32 %v1093_v8, 0.0  ;;  %v2105_v10 = vpop.f32.mrb[34].mxu0 }
 0x34b   : > { %v1108_v11 = vadd.f32 %v2105_v10, %v3080_v4  ;;  %v1102_v12 = vpop.f32.mrb[35].mxu0 }
 0x34c   : > { %v1103_v13 = vadd.f32 %v3080_v4, %v1102_v12  ;;  %2180 = vmatprep.mubr.f32.mxu1 %v1251_v9 }
 0x34d   : > { %2181 = vmatmul.mubr.f32.vlgmr.msra.gmra.mrb[32].mxu1 %v1252_v33  ;;  %v1254_v16 = vmax.f32 %v1108_v11, 0.0 }
 0x34e   : > { %v1253_v14 = vmax.f32 %v1103_v13, 0.0  ;;  %v2108_v15 = vpop.f32.mrb[36].mxu0 }
 0x34f   : > { %v1118_v17 = vadd.f32 %v2108_v15, %v3080_v4  ;;  %v1112_v18 = vpop.f32.mrb[37].mxu0 }
 0x350   : > { %v1113_v19 = vadd.f32 %v3080_v4, %v1112_v18  ;;  %2183 = vmatprep.mubr.f32.mxu1 %v1253_v14 }
 0x351   : > { %2184 = vmatmul.mubr.f32.gmra.mrb[34].mxu1 %v1254_v16  ;;  %v1256_v21 = vmax.f32 %v1118_v17, 0.0 }
 0x352   : > { %v1255_v40 = vmax.f32 %v1113_v19, 0.0  ;;  %v2111_v20 = vpop.f32.mrb[38].mxu0 }
 0x353   : > { %v1128_v22 = vadd.f32 %v2111_v20, %v3080_v4  ;;  %v1122_v23 = vpop.f32.mrb[39].mxu0 }
 0x354   : > { %v1123_v24 = vadd.f32 %v3080_v4, %v1122_v23  ;;  %2186 = vmatprep.mubr.f32.mxu1 %v1255_v40 }
 0x355   : > { %2187 = vmatmul.mubr.f32.gmra.mrb[36].mxu1 %v1256_v21  ;;  %v1258_v27 = vmax.f32 %v1128_v22, 0.0 }
 0x356   : > { %v1257_v25 = vmax.f32 %v1123_v24, 0.0  ;;  %v2114_v26 = vpop.f32.mrb[40].mxu0 }
 0x357   : > { %v1138_v28 = vadd.f32 %v2114_v26, %v3080_v4  ;;  %v1132_v29 = vpop.f32.mrb[41].mxu0 }
 0x358   : > { %v1133_v30 = vadd.f32 %v3080_v4, %v1132_v29  ;;  %2189 = vmatprep.mubr.f32.mxu1 %v1257_v25 }
 0x359   : > { %2190 = vmatmul.mubr.f32.gmra.mrb[38].mxu1 %v1258_v27  ;;  %v1260_v34 = vmax.f32 %v1138_v28, 0.0 }
 0x35a   : > { %v1259_v31 = vmax.f32 %v1133_v30, 0.0  ;;  %v2117_v32 = vpop.f32.mrb[42].mxu0 }
 0x35b   : > { %v1148_v35 = vadd.f32 %v2117_v32, %v3080_v4  ;;  %v1142_v36 = vpop.f32.mrb[43].mxu0 }
 0x35c   : > { %v1143_v37 = vadd.f32 %v3080_v4, %v1142_v36  ;;  %2192 = vmatprep.mubr.f32.mxu1 %v1259_v31 }
 0x35d   : > { %2193 = vmatmul.mubr.f32.gmra.mrb[40].mxu1 %v1260_v34  ;;  %v1262_v41 = vmax.f32 %v1148_v35, 0.0 }
 0x35e   : > { %v1261_v38 = vmax.f32 %v1143_v37, 0.0  ;;  %v2120_v39 = vpop.f32.mrb[44].mxu0  ;;  %v3117_v37 = vld [vmem:[%s3246_s8] ss:$0 sm:$0xff] }
 0x35f   : > { %v1158_v42 = vadd.f32 %v2120_v39, %v3080_v4  ;;  %v1152_v43 = vpop.f32.mrb[45].mxu0 }
 0x360   : > { %v1153_v44 = vadd.f32 %v3080_v4, %v1152_v43  ;;  %2195 = vmatprep.mubr.f32.mxu1 %v1261_v38 }
 0x361   : > { %2196 = vmatmul.mubr.f32.gmra.mrb[42].mxu1 %v1262_v41  ;;  %v1264_v47 = vmax.f32 %v1158_v42, 0.0 }
 0x362   : > { %v1263_v45 = vmax.f32 %v1153_v44, 0.0  ;;  %v2123_v46 = vpop.f32.mrb[46].mxu0 }
 0x363   : > { %v1168_v48 = vadd.f32 %v2123_v46, %v3080_v4  ;;  %v1162_v49 = vpop.f32.mrb[47].mxu0 }
 0x364   : > { %v1163_v50 = vadd.f32 %v3080_v4, %v1162_v49  ;;  %2198 = vmatprep.mubr.f32.mxu1 %v1263_v45 }
 0x365   : > { %2199 = vmatmul.mubr.f32.gmra.mrb[44].mxu1 %v1264_v47  ;;  %v1266_v53 = vmax.f32 %v1168_v48, 0.0 }
 0x366   : > { %v1265_v51 = vmax.f32 %v1163_v50, 0.0  ;;  %v2126_v52 = vpop.f32.mrb[48].mxu0 }
 0x367   : > { %v1178_v54 = vadd.f32 %v2126_v52, %v3080_v4  ;;  %v1172_v55 = vpop.f32.mrb[49].mxu0 }
 0x368   : > { %v1173_v56 = vadd.f32 %v3080_v4, %v1172_v55  ;;  %2201 = vmatprep.mubr.f32.mxu1 %v1265_v51 }
 0x369   : > { %2202 = vmatmul.mubr.f32.gmra.mrb[46].mxu1 %v1266_v53  ;;  %v1268_v59 = vmax.f32 %v1178_v54, 0.0 }
 0x36a   : > { %v1267_v57 = vmax.f32 %v1173_v56, 0.0  ;;  %v2129_v58 = vpop.f32.mrb[50].mxu0 }
 0x36b   : > { %v1188_v60 = vadd.f32 %v2129_v58, %v3080_v4  ;;  %v1182_v61 = vpop.f32.mrb[51].mxu0 }
 0x36c   : > { %v1183_v62 = vadd.f32 %v3080_v4, %v1182_v61  ;;  %2204 = vmatprep.mubr.f32.mxu1 %v1267_v57 }
 0x36d   : > { %2205 = vmatmul.mubr.f32.gmra.mrb[48].mxu1 %v1268_v59  ;;  %v1270_v1 = vmax.f32 %v1188_v60, 0.0 }
 0x36e   : > { %v1269_v63 = vmax.f32 %v1183_v62, 0.0  ;;  %v2132_v0 = vpop.f32.mrb[52].mxu0 }
 0x36f   : > { %v1198_v2 = vadd.f32 %v2132_v0, %v3080_v4  ;;  %v1192_v3 = vpop.f32.mrb[53].mxu0 }
 0x370   : > { %v1193_v5 = vadd.f32 %v3080_v4, %v1192_v3  ;;  %2207 = vmatprep.mubr.f32.mxu1 %v1269_v63 }
 0x371   : > { %2208 = vmatmul.mubr.f32.gmra.mrb[50].mxu1 %v1270_v1  ;;  %v1272_v8 = vmax.f32 %v1198_v2, 0.0 }
 0x372   : > { %v1271_v6 = vmax.f32 %v1193_v5, 0.0  ;;  %v2135_v7 = vpop.f32.mrb[54].mxu0 }
 0x373   : > { %v1208_v9 = vadd.f32 %v2135_v7, %v3080_v4  ;;  %v1202_v10 = vpop.f32.mrb[55].mxu0 }
 0x374   : > { %v1203_v33 = vadd.f32 %v3080_v4, %v1202_v10  ;;  %2210 = vmatprep.mubr.f32.mxu1 %v1271_v6 }
 0x375   : > { %2211 = vmatmul.mubr.f32.gmra.mrb[52].mxu1 %v1272_v8  ;;  %v1274_v13 = vmax.f32 %v1208_v9, 0.0 }
 0x376   : > { %v1273_v11 = vmax.f32 %v1203_v33, 0.0  ;;  %v2138_v12 = vpop.f32.mrb[56].mxu0 }
 0x377   : > { %v1218_v14 = vadd.f32 %v2138_v12, %v3080_v4  ;;  %v1212_v15 = vpop.f32.mrb[57].mxu0 }
 0x378   : > { %v1213_v16 = vadd.f32 %v3080_v4, %v1212_v15  ;;  %2213 = vmatprep.mubr.f32.mxu1 %v1273_v11 }
 0x379   : > { %2214 = vmatmul.mubr.f32.gmra.mrb[54].mxu1 %v1274_v13  ;;  %v1276_v19 = vmax.f32 %v1218_v14, 0.0 }
 0x37a   : > { %v1275_v17 = vmax.f32 %v1213_v16, 0.0  ;;  %v2141_v18 = vpop.f32.mrb[58].mxu0 }
 0x37b   : > { %v1228_v40 = vadd.f32 %v2141_v18, %v3080_v4  ;;  %v1222_v20 = vpop.f32.mrb[59].mxu0 }
 0x37c   : > { %v1223_v21 = vadd.f32 %v3080_v4, %v1222_v20  ;;  %2216 = vmatprep.mubr.f32.mxu1 %v1275_v17 }
 0x37d   : > { %2217 = vmatmul.mubr.f32.gmra.mrb[56].mxu1 %v1276_v19  ;;  %v1278_v24 = vmax.f32 %v1228_v40, 0.0 }
 0x37e   : > { %v1277_v22 = vmax.f32 %v1223_v21, 0.0  ;;  %v2144_v23 = vpop.f32.mrb[60].mxu0 }
 0x37f   : > { %v1238_v25 = vadd.f32 %v2144_v23, %v3080_v4  ;;  %v1232_v26 = vpop.f32.mrb[61].mxu0 }
 0x380   : > { %v1233_v27 = vadd.f32 %v3080_v4, %v1232_v26  ;;  %2219 = vmatprep.mubr.f32.mxu1 %v1277_v22 }
 0x381   : > { %2220 = vmatmul.mubr.f32.gmra.mrb[58].mxu1 %v1278_v24  ;;  %v1280_v30 = vmax.f32 %v1238_v25, 0.0 }
 0x382   : > { %v1279_v28 = vmax.f32 %v1233_v27, 0.0  ;;  %v2147_v29 = vpop.f32.mrb[62].mxu0 }
 0x383   : > { %v1248_v31 = vadd.f32 %v2147_v29, %v3080_v4  ;;  %v1242_v32 = vpop.f32.mrb[63].mxu0 }
 0x384   : > { %v1243_v34 = vadd.f32 %v3080_v4, %v1242_v32  ;;  %2222 = vmatprep.mubr.f32.mxu1 %v1279_v28 }
 0x385   : > { %2223 = vmatmul.mubr.f32.gmra.mrb[60].mxu1 %v1280_v30  ;;  %v1282_v36 = vmax.f32 %v1248_v31, 0.0 }
 0x386   : > { %v1281_v35 = vmax.f32 %v1243_v34, 0.0 }
 0x388   : > { %2225 = vmatprep.mubr.f32.mxu1 %v1281_v35 }
 0x389   : > { %2226 = vmatmul.mubr.f32.gmra.mrb[62].mxu1 %v1282_v36 }
 0x420   : > { %v2182_v38 = vpop.f32.mrb[32].mxu1 }
 0x421   : > { %v1378_v39 = vadd.f32 %v2182_v38, %v3117_v37  ;;  %v1372_v41 = vpop.f32.mrb[33].mxu1 }
 0x422   : > { %v1373_v42 = vadd.f32 %v3117_v37, %v1372_v41 }
 0x423   : > { %1532 = vst [vmem:[%s3123_s18 + $0x8] sm:$0xff] %v1378_v39 }
 0x424   : > { %1531 = vst [vmem:[%s3123_s18] sm:$0xff] %v1373_v42  ;;  %v2185_v4 = vpop.f32.mrb[34].mxu1 }
 0x425   : > { %v1388_v43 = vadd.f32 %v2185_v4, %v3117_v37  ;;  %v1382_v44 = vpop.f32.mrb[35].mxu1 }
 0x426   : > { %v1383_v45 = vadd.f32 %v3117_v37, %v1382_v44 }
 0x427   : > { %1534 = vst [vmem:[%s3123_s18 + $0x18] sm:$0xff] %v1388_v43 }
 0x428   : > { %1533 = vst [vmem:[%s3123_s18 + $0x10] sm:$0xff] %v1383_v45  ;;  %v2188_v46 = vpop.f32.mrb[36].mxu1 }
 0x429   : > { %v1398_v47 = vadd.f32 %v2188_v46, %v3117_v37  ;;  %v1392_v48 = vpop.f32.mrb[37].mxu1 }
 0x42a   : > { %v1393_v49 = vadd.f32 %v3117_v37, %v1392_v48 }
 0x42b   : > { %1536 = vst [vmem:[%s3123_s18 + $0x28] sm:$0xff] %v1398_v47 }
 0x42c   : > { %1535 = vst [vmem:[%s3123_s18 + $0x20] sm:$0xff] %v1393_v49  ;;  %v2191_v50 = vpop.f32.mrb[38].mxu1 }
 0x42d   : > { %v1408_v51 = vadd.f32 %v2191_v50, %v3117_v37  ;;  %v1402_v52 = vpop.f32.mrb[39].mxu1 }
 0x42e   : > { %v1403_v53 = vadd.f32 %v3117_v37, %v1402_v52 }
 0x42f   : > { %1538 = vst [vmem:[%s3123_s18 + $0x38] sm:$0xff] %v1408_v51 }
 0x430   : > { %1537 = vst [vmem:[%s3123_s18 + $0x30] sm:$0xff] %v1403_v53  ;;  %v2194_v54 = vpop.f32.mrb[40].mxu1 }
 0x431   : > { %v1418_v55 = vadd.f32 %v2194_v54, %v3117_v37  ;;  %v1412_v56 = vpop.f32.mrb[41].mxu1 }
 0x432   : > { %v1413_v57 = vadd.f32 %v3117_v37, %v1412_v56 }
 0x433   : > { %1540 = vst [vmem:[%s3123_s18 + $0x48] sm:$0xff] %v1418_v55 }
 0x434   : > { %1539 = vst [vmem:[%s3123_s18 + $0x40] sm:$0xff] %v1413_v57  ;;  %v2197_v58 = vpop.f32.mrb[42].mxu1 }
 0x435   : > { %v1428_v59 = vadd.f32 %v2197_v58, %v3117_v37  ;;  %v1422_v60 = vpop.f32.mrb[43].mxu1 }
 0x436   : > { %v1423_v61 = vadd.f32 %v3117_v37, %v1422_v60 }
 0x437   : > { %1542 = vst [vmem:[%s3123_s18 + $0x58] sm:$0xff] %v1428_v59 }
 0x438   : > { %1541 = vst [vmem:[%s3123_s18 + $0x50] sm:$0xff] %v1423_v61  ;;  %v2200_v62 = vpop.f32.mrb[44].mxu1 }
 0x439   : > { %v1438_v63 = vadd.f32 %v2200_v62, %v3117_v37  ;;  %v1432_v0 = vpop.f32.mrb[45].mxu1 }
 0x43a   : > { %v1433_v1 = vadd.f32 %v3117_v37, %v1432_v0 }
 0x43b   : > { %1544 = vst [vmem:[%s3123_s18 + $0x68] sm:$0xff] %v1438_v63 }
 0x43c   : > { %1543 = vst [vmem:[%s3123_s18 + $0x60] sm:$0xff] %v1433_v1  ;;  %v2203_v2 = vpop.f32.mrb[46].mxu1 }
 0x43d   : > { %v1448_v3 = vadd.f32 %v2203_v2, %v3117_v37  ;;  %v1442_v5 = vpop.f32.mrb[47].mxu1 }
 0x43e   : > { %v1443_v6 = vadd.f32 %v3117_v37, %v1442_v5 }
 0x43f   : > { %1546 = vst [vmem:[%s3123_s18 + $0x78] sm:$0xff] %v1448_v3 }
 0x440   : > { %1545 = vst [vmem:[%s3123_s18 + $0x70] sm:$0xff] %v1443_v6  ;;  %v2206_v7 = vpop.f32.mrb[48].mxu1 }
 0x441   : > { %v1458_v8 = vadd.f32 %v2206_v7, %v3117_v37  ;;  %v1452_v9 = vpop.f32.mrb[49].mxu1 }
 0x442   : > { %v1453_v10 = vadd.f32 %v3117_v37, %v1452_v9 }
 0x443   : > { %1548 = vst [vmem:[%s3123_s18 + $0x88] sm:$0xff] %v1458_v8 }
 0x444   : > { %1547 = vst [vmem:[%s3123_s18 + $0x80] sm:$0xff] %v1453_v10  ;;  %v2209_v33 = vpop.f32.mrb[50].mxu1 }
 0x445   : > { %v1468_v11 = vadd.f32 %v2209_v33, %v3117_v37  ;;  %v1462_v12 = vpop.f32.mrb[51].mxu1 }
 0x446   : > { %v1463_v13 = vadd.f32 %v3117_v37, %v1462_v12 }
 0x447   : > { %1550 = vst [vmem:[%s3123_s18 + $0x98] sm:$0xff] %v1468_v11 }
 0x448   : > { %1549 = vst [vmem:[%s3123_s18 + $0x90] sm:$0xff] %v1463_v13  ;;  %v2212_v14 = vpop.f32.mrb[52].mxu1 }
 0x449   : > { %v1478_v15 = vadd.f32 %v2212_v14, %v3117_v37  ;;  %v1472_v16 = vpop.f32.mrb[53].mxu1 }
 0x44a   : > { %v1473_v17 = vadd.f32 %v3117_v37, %v1472_v16 }
 0x44b   : > { %1552 = vst [vmem:[%s3123_s18 + $0xa8] sm:$0xff] %v1478_v15 }
 0x44c   : > { %1551 = vst [vmem:[%s3123_s18 + $0xa0] sm:$0xff] %v1473_v17  ;;  %v2215_v18 = vpop.f32.mrb[54].mxu1 }
 0x44d   : > { %v1488_v19 = vadd.f32 %v2215_v18, %v3117_v37  ;;  %v1482_v40 = vpop.f32.mrb[55].mxu1 }
 0x44e   : > { %v1483_v20 = vadd.f32 %v3117_v37, %v1482_v40 }
 0x44f   : > { %1554 = vst [vmem:[%s3123_s18 + $0xb8] sm:$0xff] %v1488_v19 }
 0x450   : > { %1553 = vst [vmem:[%s3123_s18 + $0xb0] sm:$0xff] %v1483_v20  ;;  %v2218_v21 = vpop.f32.mrb[56].mxu1 }
 0x451   : > { %v1498_v22 = vadd.f32 %v2218_v21, %v3117_v37  ;;  %v1492_v23 = vpop.f32.mrb[57].mxu1 }
 0x452   : > { %v1493_v24 = vadd.f32 %v3117_v37, %v1492_v23 }
 0x453   : > { %1556 = vst [vmem:[%s3123_s18 + $0xc8] sm:$0xff] %v1498_v22 }
 0x454   : > { %1555 = vst [vmem:[%s3123_s18 + $0xc0] sm:$0xff] %v1493_v24  ;;  %v2221_v25 = vpop.f32.mrb[58].mxu1 }
 0x455   : > { %v1508_v26 = vadd.f32 %v2221_v25, %v3117_v37  ;;  %v1502_v27 = vpop.f32.mrb[59].mxu1 }
 0x456   : > { %v1503_v28 = vadd.f32 %v3117_v37, %v1502_v27 }
 0x457   : > { %1558 = vst [vmem:[%s3123_s18 + $0xd8] sm:$0xff] %v1508_v26 }
 0x458   : > { %1557 = vst [vmem:[%s3123_s18 + $0xd0] sm:$0xff] %v1503_v28  ;;  %v2224_v29 = vpop.f32.mrb[60].mxu1 }
 0x459   : > { %v1518_v30 = vadd.f32 %v2224_v29, %v3117_v37  ;;  %v1512_v31 = vpop.f32.mrb[61].mxu1 }
 0x45a   : > { %v1513_v32 = vadd.f32 %v3117_v37, %v1512_v31 }
 0x45b   : > { %1560 = vst [vmem:[%s3123_s18 + $0xe8] sm:$0xff] %v1518_v30 }
 0x45c   : > { %1559 = vst [vmem:[%s3123_s18 + $0xe0] sm:$0xff] %v1513_v32  ;;  %v2227_v34 = vpop.f32.mrb[62].mxu1 }
 0x45d   : > { %v1528_v35 = vadd.f32 %v2227_v34, %v3117_v37  ;;  %v1522_v36 = vpop.f32.mrb[63].mxu1 }
 0x45e   : > { %v1523_v38 = vadd.f32 %v3117_v37, %v1522_v36 }
 0x45f   : > { %1562 = vst [vmem:[%s3123_s18 + $0xf8] sm:$0xff] %v1528_v35 }
 0x460   : > { %1561 = vst [vmem:[%s3123_s18 + $0xf0] sm:$0xff] %v1523_v38 }
 0x461   : > { %2602 = shalt.err (!%p2599_p13)
}
 0x462   : > { %s2603_s22 = scalar_lea.hbm %s3189_s15, 4096  ;;  %s2607_s18 = scalar_lea.hbm %s3271_s9, 8192 }
 0x463   : > { %p2604_p9 = scmp.ne.s32.totalorder %s3189_s15, %s2603_s22  ;;  %p2608_p4 = scmp.lt.u32.totalorder %s3189_s15, %s3271_s9 }
 0x464   : > { %p2609_p8 = scmp.lt.u32.totalorder %s2607_s18, %s2603_s22  ;;  %p2611_p3 = scmp.lt.u32.totalorder %s2603_s22, %s3189_s15 }
 0x465   : > { %p2605_p0 = pnand %p2604_p9, %p2896_p10 }
 0x466   : > { %p2610_p6 = por %p2609_p8, %p2608_p4 }
 0x467   : > { %p2606_p11 = pneg %p2605_p0 }
 0x468   : > { %p2612_p5 = por %p2611_p3, %p2610_p6 }
 0x46a   : > { %p2613_p7 = pnand %p2612_p5, %p2606_p11 }
 0x46c   : > { %2616 = shalt.err (!%p2613_p7)
}
 0x46d   : > { %s2673_s24 = smov 128   ;;  %s2674_s17 = smov 8  }
 0x46e   : > { %2374 = dma.vmem_to_hbm [thread:$0]  (%p2896_p10), %s3191_s23, 4096, %s3189_s15, %s1564_s13, %s2673_s24, %s2673_s24, %s2674_s17  }
 0x46f PF: > { %s3272_s25 = sld [smem:[#allocation16_spill]]  ;;  %s3273_s26 = sld [smem:[#allocation17_spill]] }
 0x470   : > { %p3275_p1 = scmp.ge.s32.totalorder %s2663_s12, 2 }
 0x475   : > { %s1592_s19 = sand.u32 1, %s3272_s25   ;;  %p3274_p12 = scmp.ne.s32.totalorder %s3273_s26, 0 }
 0x476   : > { %s1593_s22 = scalar_lea.sflag [#allocation4], %s1592_s19 }
 0x477   : > { %p2394_p2 = pnand %p3275_p1, %p3274_p12 }
 0x479   : > { %2646 = dma.done.wait (!%p2394_p2), %s1593_s22, 4096  }
 0x47a   : > { %2648 = vsyncadd (!%p2394_p2), %s1593_s22, 4294963200  ;;  %p24_p13 = scmp.ge.s32.totalorder %s2886_s14, 4   ;;  %s3276_s30 = smov %s2655_s10 }
 0x47b   : > { %s3277_s10 = smov %s2659_s11  ;;  %s3278_s11 = smov %s2902_s28 }
 0x47c   : > { %s3279_s12 = smov %s2886_s14  ;;  %26 = sbr.rel (!%p24_p13) target bundleno = 9 (0x9), region = 117 }
 0x483   :  { %1598 = vsyncpa [#allocation3], 1 }
 0x484   :  { %1600 = vsyncpa [#allocation3 + $0x1], 1 }
 0x485   :  { %1601 = vsyncpa [#allocation6], 1 }
 0x486   :  { %1602 = vsyncpa [#allocation9], 1 }
 0x487   :  { %1603 = vsyncpa [#allocation4], 1 }
 0x488   :  { %1605 = vsyncpa [#allocation4 + $0x1], 1 }

</bundles_post_ra>
